<compile_context>
chip_gen: v7x
topology: tpu7x:2x2x1
jax: 0.10.0
libtpu: 0.0.40
codegen_flags: <defaults>
</compile_context>

<pallas_src>
import numpy as np
import jax
import jax.numpy as jnp
from jax import lax
from jax.experimental import pallas as pl
from jax.experimental.pallas import tpu as pltpu

EPS = 1e-5                      # nn.BatchNorm3d default eps
MATMUL_DTYPE = jnp.float32      # set to jnp.bfloat16 on v6e/v7x (bf16-native MXU) for ~2x
                                # matmul throughput + half the staging VMEM; BN statistics,
                                # the residual add and the output always stay f32.


def _resnet_block_kernel(x_ref, w1_ref, g1_ref, be1_ref, w2_ref, g2_ref, be2_ref,
                         cprj_ref, cexp_ref, out_ref, buf_ref, col_ref):
    N, D, H, L = x_ref.shape            # L = W * C, chosen as a multiple of 128 lanes
    C = g1_ref.shape[-1]
    W = L // C
    M = N * D * H
    inv_cnt = 1.0 / float(M * W)        # 1 / (N*D*H*W)

    # One small VMEM memset: the D/H halo is shared by both convolutions (the interior is
    # overwritten each time, halo rows stay zero).  "Same" padding along W is implicit in
    # the banded weight matrix, so no W halo is needed at all.
    buf_ref[...] = jnp.zeros(buf_ref.shape, buf_ref.dtype)

    def conv(w_ref):
        # im2col: 9 aligned, full-lane-width slab copies -> one deep-K MXU matmul.
        j = 0
        for kd in range(3):
            for kh in range(3):
                slab = buf_ref[:, kd:kd + D, kh:kh + H, :].reshape(M, L)
                col_ref[:, j * L:(j + 1) * L] = slab
                j += 1
        return jnp.dot(col_ref[...], w_ref[...],
                       preferred_element_type=jnp.float32)            # (M, L), f32

    def bn_scale_shift(y, g_ref, be_ref):
        # Fused training-mode BatchNorm: one stats pass -> per-lane scale & shift.
        # (Conv bias is omitted entirely; the mean subtraction cancels it exactly.)
        s1 = jnp.sum(y, axis=0, keepdims=True)                          # (1, L)
        s2 = jnp.sum(y * y, axis=0, keepdims=True)                      # (1, L)
        # lane(=w*C+c) -> channel projection for both moments in a single tiny matmul
        sc = jnp.dot(jnp.concatenate([s1, s2], axis=0), cprj_ref[...],
                     preferred_element_type=jnp.float32)                # (2, C)
        mean = sc[0:1] * inv_cnt
        var = sc[1:2] * inv_cnt - mean * mean
        scale = g_ref[...] * lax.rsqrt(var + EPS)                       # (1, C)
        shift = be_ref[...] - mean * scale                              # (1, C)
        # broadcast per-channel -> per-lane with one tiny projection matmul
        ss = jnp.dot(jnp.concatenate([scale, shift], axis=0), cexp_ref[...],
                     preferred_element_type=jnp.float32)                # (2, L)
        return ss[0:1], ss[1:2]                                         # (1, L) each

    # Residual input loaded once, reused for conv1 input fill and the final add.
    x_f = x_ref[...].astype(jnp.float32)                                # (N, D, H, L)

    # ---- conv1 -> BN1 -> ReLU (BN + ReLU fused into one FMA + max pass) ----
    buf_ref[:, 1:D + 1, 1:H + 1, :] = x_f.astype(buf_ref.dtype)
    y = conv(w1_ref)
    sc1, sh1 = bn_scale_shift(y, g1_ref, be1_ref)
    y = jnp.maximum(y * sc1 + sh1, 0.0)

    # ---- conv2 -> BN2 -> residual add (fused into one FMA + add pass) ----
    buf_ref[:, 1:D + 1, 1:H + 1, :] = y.reshape(N, D, H, L).astype(buf_ref.dtype)
    z = conv(w2_ref)
    sc2, sh2 = bn_scale_shift(z, g2_ref, be2_ref)
    out = x_f.reshape(M, L) + z * sc2 + sh2
    out_ref[...] = out.reshape(N, D, H, L).astype(out_ref.dtype)


def _banded_conv_weight(w27, C, W):
    """(27, Cin, Cout), tap-major (kd, kh, kw)  ->  (9*W*C, W*C) block-banded matrix.

    With rows=(n,d,h) and lanes=(w,c), a single (N*D*H, 9*W*C) x (9*W*C, W*C) matmul then
    computes the full 3x3x3 'same' convolution; rows that would need w-1 < 0 or w+1 >= W
    simply do not exist, which is exactly the zero padding along W.
    """
    w = w27.reshape(3, 3, 3, C, C).astype(MATMUL_DTYPE)
    blocks = []
    for kd in range(3):
        for kh in range(3):
            blk = jnp.zeros((W * C, W * C), MATMUL_DTYPE)
            for kw in range(3):
                # sel[w_in, w_out] = 1  iff  w_in == w_out + (kw - 1)
                sel = jnp.asarray(np.eye(W, W, 1 - kw, dtype=np.float32), MATMUL_DTYPE)
                blk = blk + jnp.kron(sel, w[kd, kh, kw])
            blocks.append(blk)
    return jnp.concatenate(blocks, axis=0)


def resnet_block_forward(x_ncdhw, params):
    """x_ncdhw: (N, C, D, H, W) like the PyTorch module; returns NCDHW."""
    w1, b1, g1, be1, w2, b2, g2, be2 = params   # conv biases accepted but folded away (BN cancels them)
    N, C, D, H, W = x_ncdhw.shape
    L = W * C
    if L % 128 != 0:
        # TODO(synk): general W*C needs either masked unaligned lane slabs or the plain
        # (M, 27*C) im2col fallback; the demo packs (w, c) onto full 128-lane vregs.
        raise NotImplementedError("demo layout requires W*C to be a multiple of 128")

    # NCDHW -> NDHWC -> rows=(n,d,h), lanes=(w,c).  No host-side zero padding: the halo
    # lives in a VMEM scratch inside the kernel.
    x = jnp.transpose(x_ncdhw, (0, 2, 3, 4, 1)).reshape(N, D, H, L)

    wm1 = _banded_conv_weight(w1, C, W)
    wm2 = _banded_conv_weight(w2, C, W)
    # per-channel <-> per-lane projection constants for the fused BatchNorm
    cprj = jnp.asarray(np.kron(np.ones((W, 1), np.float32), np.eye(C, dtype=np.float32)))
    cexp = cprj.T

    vmem = pl.BlockSpec(memory_space=pltpu.MemorySpace.VMEM)
    out = pl.pallas_call(
        _resnet_block_kernel,
        out_shape=jax.ShapeDtypeStruct((N, D, H, L), x_ncdhw.dtype),
        in_specs=[vmem] * 9,
        out_specs=vmem,
        scratch_shapes=[
            pltpu.VMEM((N, D + 2, H + 2, L), MATMUL_DTYPE),  # zero-halo conv-input buffer
            pltpu.VMEM((N * D * H, 9 * L), MATMUL_DTYPE),    # im2col buffer (reused by both convs)
        ],
        compiler_params=pltpu.CompilerParams(vmem_limit_bytes=32 * 1024 * 1024),
    )(x, wm1, g1.reshape(1, C), be1.reshape(1, C),
      wm2, g2.reshape(1, C), be2.reshape(1, C), cprj, cexp)
    # TODO(synk): for production-size volumes, tile a grid over (N, D) with "parallel"
    # dimension_semantics (v7x megacore) and a two-pass BN (stat-accumulate / normalize)
    # so nothing has to be whole-volume resident in VMEM.
    return jnp.transpose(out.reshape(N, D, H, W, C), (0, 4, 1, 2, 3))


def reference_forward(x_ncdhw, params):
    """Pure-JAX reference (same math as the PyTorch module's forward, biases included)."""
    w1, b1, g1, be1, w2, b2, g2, be2 = params
    x = jnp.transpose(x_ncdhw, (0, 2, 3, 4, 1)).astype(jnp.float32)
    C = x.shape[-1]

    def conv(v, w, b):
        k = w.reshape(3, 3, 3, C, C)  # DHWIO
        y = lax.conv_general_dilated(v, k, (1, 1, 1), 'SAME',
                                     dimension_numbers=('NDHWC', 'DHWIO', 'NDHWC'))
        return y + b

    def bn(y, g, be):
        mean = y.mean(axis=(0, 1, 2, 3), keepdims=True)
        var = ((y - mean) ** 2).mean(axis=(0, 1, 2, 3), keepdims=True)
        return (y - mean) * lax.rsqrt(var + EPS) * g + be

    y = jnp.maximum(bn(conv(x, w1, b1), g1, be1), 0.0)
    z = bn(conv(y, w2, b2), g2, be2)
    return jnp.transpose(x + z, (0, 4, 1, 2, 3))


if __name__ == "__main__":
    # ResNetBlock(in_channels=16) on a (N, C, 8, 8, 8) volume; W*C = 128 = one full vreg width.
    N, C, D, H, W = 2, 16, 8, 8, 8
    key = jax.random.PRNGKey(0)
    ks = jax.random.split(key, 9)

    x = jax.random.normal(ks[0], (N, C, D, H, W), jnp.float32)

    # deterministic synthetic parameters (conv weights stored as (27, Cin, Cout), tap-major kd,kh,kw)
    w1 = jax.random.normal(ks[1], (27, C, C), jnp.float32) * 0.1
    b1 = jax.random.normal(ks[2], (C,), jnp.float32) * 0.1
    g1 = 1.0 + 0.1 * jax.random.normal(ks[3], (C,), jnp.float32)
    be1 = 0.1 * jax.random.normal(ks[4], (C,), jnp.float32)
    w2 = jax.random.normal(ks[5], (27, C, C), jnp.float32) * 0.1
    b2 = jax.random.normal(ks[6], (C,), jnp.float32) * 0.1
    g2 = 1.0 + 0.1 * jax.random.normal(ks[7], (C,), jnp.float32)
    be2 = 0.1 * jax.random.normal(ks[8], (C,), jnp.float32)
    params = (w1, b1, g1, be1, w2, b2, g2, be2)

    out = jax.block_until_ready(resnet_block_forward(x, params))
    ref = jax.block_until_ready(reference_forward(x, params))
    assert out.shape == (N, C, D, H, W) and out.dtype == x.dtype
    assert np.allclose(np.asarray(out), np.asarray(ref), rtol=1e-3, atol=1e-3)
    print("KERNEL_OK")
</pallas_src>

<mosaic_0001>
module attributes {stable_mosaic.version = 11 : i64} {
  func.func @_resnet_block_kernel(%arg0: memref<2x8x8x128xf32, #tpu.memory_space<vmem>>, %arg1: memref<1152x128xf32, #tpu.memory_space<vmem>>, %arg2: memref<1x16xf32, #tpu.memory_space<vmem>>, %arg3: memref<1x16xf32, #tpu.memory_space<vmem>>, %arg4: memref<1152x128xf32, #tpu.memory_space<vmem>>, %arg5: memref<1x16xf32, #tpu.memory_space<vmem>>, %arg6: memref<1x16xf32, #tpu.memory_space<vmem>>, %arg7: memref<128x16xf32, #tpu.memory_space<vmem>>, %arg8: memref<16x128xf32, #tpu.memory_space<vmem>>, %arg9: memref<2x8x8x128xf32, #tpu.memory_space<vmem>>, %arg10: memref<2x10x10x128xf32, #tpu.memory_space<vmem>>, %arg11: memref<128x1152xf32, #tpu.memory_space<vmem>>) attributes {dimension_semantics = [], scalar_prefetch = 0 : i64, scratch_operands = 2 : i64, tpu.core_type = #tpu.core_type<tc>} {
    %cst = arith.constant 0.000000e+00 : f32
    %0 = vector.broadcast %cst : f32 to vector<2x10x10x128xf32>
    %c0 = arith.constant 0 : index
    %c0_0 = arith.constant 0 : index
    %c0_1 = arith.constant 0 : index
    %c0_2 = arith.constant 0 : index
    %1 = vector.load %arg10[%c0, %c0_0, %c0_1, %c0_2] : memref<2x10x10x128xf32, #tpu.memory_space<vmem>>, vector<2x10x10x128xf32>
    tpu.vector_store %arg10[%c0, %c0_0, %c0_1, %c0_2], %0 {strides = array<i32>} : memref<2x10x10x128xf32, #tpu.memory_space<vmem>>, vector<2x10x10x128xf32>,
    %c0_3 = arith.constant 0 : index
    %c0_4 = arith.constant 0 : index
    %c0_5 = arith.constant 0 : index
    %c0_6 = arith.constant 0 : index
    %2 = vector.load %arg0[%c0_3, %c0_4, %c0_5, %c0_6] : memref<2x8x8x128xf32, #tpu.memory_space<vmem>>, vector<2x8x8x128xf32>
    %c0_7 = arith.constant 0 : index
    %c1 = arith.constant 1 : index
    %c1_8 = arith.constant 1 : index
    %c0_9 = arith.constant 0 : index
    %3 = vector.load %arg10[%c0_7, %c1, %c1_8, %c0_9] : memref<2x10x10x128xf32, #tpu.memory_space<vmem>>, vector<2x8x8x128xf32>
    tpu.vector_store %arg10[%c0_7, %c1, %c1_8, %c0_9], %2 {strides = array<i32>} : memref<2x10x10x128xf32, #tpu.memory_space<vmem>>, vector<2x8x8x128xf32>,
    %c0_10 = arith.constant 0 : index
    %c0_11 = arith.constant 0 : index
    %c0_12 = arith.constant 0 : index
    %c0_13 = arith.constant 0 : index
    %4 = vector.load %arg10[%c0_10, %c0_11, %c0_12, %c0_13] : memref<2x10x10x128xf32, #tpu.memory_space<vmem>>, vector<2x8x8x128xf32>
    %5 = vector.shape_cast %4 : vector<2x8x8x128xf32> to vector<128x128xf32>
    %c0_14 = arith.constant 0 : index
    %c0_15 = arith.constant 0 : index
    %6 = vector.load %arg11[%c0_14, %c0_15] : memref<128x1152xf32, #tpu.memory_space<vmem>>, vector<128x128xf32>
    tpu.vector_store %arg11[%c0_14, %c0_15], %5 {strides = array<i32>} : memref<128x1152xf32, #tpu.memory_space<vmem>>, vector<128x128xf32>,
    %c0_16 = arith.constant 0 : index
    %c0_17 = arith.constant 0 : index
    %c1_18 = arith.constant 1 : index
    %c0_19 = arith.constant 0 : index
    %7 = vector.load %arg10[%c0_16, %c0_17, %c1_18, %c0_19] : memref<2x10x10x128xf32, #tpu.memory_space<vmem>>, vector<2x8x8x128xf32>
    %8 = vector.shape_cast %7 : vector<2x8x8x128xf32> to vector<128x128xf32>
    %c0_20 = arith.constant 0 : index
    %c128 = arith.constant 128 : index
    %9 = vector.load %arg11[%c0_20, %c128] : memref<128x1152xf32, #tpu.memory_space<vmem>>, vector<128x128xf32>
    tpu.vector_store %arg11[%c0_20, %c128], %8 {strides = array<i32>} : memref<128x1152xf32, #tpu.memory_space<vmem>>, vector<128x128xf32>,
    %c0_21 = arith.constant 0 : index
    %c0_22 = arith.constant 0 : index
    %c2 = arith.constant 2 : index
    %c0_23 = arith.constant 0 : index
    %10 = vector.load %arg10[%c0_21, %c0_22, %c2, %c0_23] : memref<2x10x10x128xf32, #tpu.memory_space<vmem>>, vector<2x8x8x128xf32>
    %11 = vector.shape_cast %10 : vector<2x8x8x128xf32> to vector<128x128xf32>
    %c0_24 = arith.constant 0 : index
    %c256 = arith.constant 256 : index
    %12 = vector.load %arg11[%c0_24, %c256] : memref<128x1152xf32, #tpu.memory_space<vmem>>, vector<128x128xf32>
    tpu.vector_store %arg11[%c0_24, %c256], %11 {strides = array<i32>} : memref<128x1152xf32, #tpu.memory_space<vmem>>, vector<128x128xf32>,
    %c0_25 = arith.constant 0 : index
    %c1_26 = arith.constant 1 : index
    %c0_27 = arith.constant 0 : index
    %c0_28 = arith.constant 0 : index
    %13 = vector.load %arg10[%c0_25, %c1_26, %c0_27, %c0_28] : memref<2x10x10x128xf32, #tpu.memory_space<vmem>>, vector<2x8x8x128xf32>
    %14 = vector.shape_cast %13 : vector<2x8x8x128xf32> to vector<128x128xf32>
    %c0_29 = arith.constant 0 : index
    %c384 = arith.constant 384 : index
    %15 = vector.load %arg11[%c0_29, %c384] : memref<128x1152xf32, #tpu.memory_space<vmem>>, vector<128x128xf32>
    tpu.vector_store %arg11[%c0_29, %c384], %14 {strides = array<i32>} : memref<128x1152xf32, #tpu.memory_space<vmem>>, vector<128x128xf32>,
    %c0_30 = arith.constant 0 : index
    %c1_31 = arith.constant 1 : index
    %c1_32 = arith.constant 1 : index
    %c0_33 = arith.constant 0 : index
    %16 = vector.load %arg10[%c0_30, %c1_31, %c1_32, %c0_33] : memref<2x10x10x128xf32, #tpu.memory_space<vmem>>, vector<2x8x8x128xf32>
    %17 = vector.shape_cast %16 : vector<2x8x8x128xf32> to vector<128x128xf32>
    %c0_34 = arith.constant 0 : index
    %c512 = arith.constant 512 : index
    %18 = vector.load %arg11[%c0_34, %c512] : memref<128x1152xf32, #tpu.memory_space<vmem>>, vector<128x128xf32>
    tpu.vector_store %arg11[%c0_34, %c512], %17 {strides = array<i32>} : memref<128x1152xf32, #tpu.memory_space<vmem>>, vector<128x128xf32>,
    %c0_35 = arith.constant 0 : index
    %c1_36 = arith.constant 1 : index
    %c2_37 = arith.constant 2 : index
    %c0_38 = arith.constant 0 : index
    %19 = vector.load %arg10[%c0_35, %c1_36, %c2_37, %c0_38] : memref<2x10x10x128xf32, #tpu.memory_space<vmem>>, vector<2x8x8x128xf32>
    %20 = vector.shape_cast %19 : vector<2x8x8x128xf32> to vector<128x128xf32>
    %c0_39 = arith.constant 0 : index
    %c640 = arith.constant 640 : index
    %21 = vector.load %arg11[%c0_39, %c640] : memref<128x1152xf32, #tpu.memory_space<vmem>>, vector<128x128xf32>
    tpu.vector_store %arg11[%c0_39, %c640], %20 {strides = array<i32>} : memref<128x1152xf32, #tpu.memory_space<vmem>>, vector<128x128xf32>,
    %c0_40 = arith.constant 0 : index
    %c2_41 = arith.constant 2 : index
    %c0_42 = arith.constant 0 : index
    %c0_43 = arith.constant 0 : index
    %22 = vector.load %arg10[%c0_40, %c2_41, %c0_42, %c0_43] : memref<2x10x10x128xf32, #tpu.memory_space<vmem>>, vector<2x8x8x128xf32>
    %23 = vector.shape_cast %22 : vector<2x8x8x128xf32> to vector<128x128xf32>
    %c0_44 = arith.constant 0 : index
    %c768 = arith.constant 768 : index
    %24 = vector.load %arg11[%c0_44, %c768] : memref<128x1152xf32, #tpu.memory_space<vmem>>, vector<128x128xf32>
    tpu.vector_store %arg11[%c0_44, %c768], %23 {strides = array<i32>} : memref<128x1152xf32, #tpu.memory_space<vmem>>, vector<128x128xf32>,
    %c0_45 = arith.constant 0 : index
    %c2_46 = arith.constant 2 : index
    %c1_47 = arith.constant 1 : index
    %c0_48 = arith.constant 0 : index
    %25 = vector.load %arg10[%c0_45, %c2_46, %c1_47, %c0_48] : memref<2x10x10x128xf32, #tpu.memory_space<vmem>>, vector<2x8x8x128xf32>
    %26 = vector.shape_cast %25 : vector<2x8x8x128xf32> to vector<128x128xf32>
    %c0_49 = arith.constant 0 : index
    %c896 = arith.constant 896 : index
    %27 = vector.load %arg11[%c0_49, %c896] : memref<128x1152xf32, #tpu.memory_space<vmem>>, vector<128x128xf32>
    tpu.vector_store %arg11[%c0_49, %c896], %26 {strides = array<i32>} : memref<128x1152xf32, #tpu.memory_space<vmem>>, vector<128x128xf32>,
    %c0_50 = arith.constant 0 : index
    %c2_51 = arith.constant 2 : index
    %c2_52 = arith.constant 2 : index
    %c0_53 = arith.constant 0 : index
    %28 = vector.load %arg10[%c0_50, %c2_51, %c2_52, %c0_53] : memref<2x10x10x128xf32, #tpu.memory_space<vmem>>, vector<2x8x8x128xf32>
    %29 = vector.shape_cast %28 : vector<2x8x8x128xf32> to vector<128x128xf32>
    %c0_54 = arith.constant 0 : index
    %c1024 = arith.constant 1024 : index
    %30 = vector.load %arg11[%c0_54, %c1024] : memref<128x1152xf32, #tpu.memory_space<vmem>>, vector<128x128xf32>
    tpu.vector_store %arg11[%c0_54, %c1024], %29 {strides = array<i32>} : memref<128x1152xf32, #tpu.memory_space<vmem>>, vector<128x128xf32>,
    %c0_55 = arith.constant 0 : index
    %c0_56 = arith.constant 0 : index
    %31 = vector.load %arg11[%c0_55, %c0_56] : memref<128x1152xf32, #tpu.memory_space<vmem>>, vector<128x1152xf32>
    %c0_57 = arith.constant 0 : index
    %c0_58 = arith.constant 0 : index
    %32 = vector.load %arg1[%c0_57, %c0_58] : memref<1152x128xf32, #tpu.memory_space<vmem>>, vector<1152x128xf32>
    %cst_59 = arith.constant dense<0.000000e+00> : vector<128x128xf32>
    %33 = tpu.matmul %31, %32, %cst_59 {dimension_numbers = #tpu.dot_dimension_numbers<[1], [0], [0], [1], [0, 0, 1, 1], [], []>} : vector<128x1152xf32>, vector<1152x128xf32>, vector<128x128xf32> -> vector<128x128xf32>
    %cst_60 = arith.constant dense<0.000000e+00> : vector<128xf32>
    %34 = vector.multi_reduction <add>, %33, %cst_60 [0] : vector<128x128xf32> to vector<128xf32>
    %35 = vector.shape_cast %34 : vector<128xf32> to vector<1x128xf32>
    %36 = arith.mulf %33, %33 : vector<128x128xf32>
    %cst_61 = arith.constant dense<0.000000e+00> : vector<128xf32>
    %37 = vector.multi_reduction <add>, %36, %cst_61 [0] : vector<128x128xf32> to vector<128xf32>
    %38 = vector.shape_cast %37 : vector<128xf32> to vector<1x128xf32>
    %39 = tpu.concatenate %35, %38 in 0 : vector<1x128xf32>, vector<1x128xf32> -> vector<2x128xf32>
    %c0_62 = arith.constant 0 : index
    %c0_63 = arith.constant 0 : index
    %40 = vector.load %arg7[%c0_62, %c0_63] : memref<128x16xf32, #tpu.memory_space<vmem>>, vector<128x16xf32>
    %cst_64 = arith.constant dense<0.000000e+00> : vector<2x16xf32>
    %41 = tpu.matmul %39, %40, %cst_64 {dimension_numbers = #tpu.dot_dimension_numbers<[1], [0], [0], [1], [0, 0, 1, 1], [], []>} : vector<2x128xf32>, vector<128x16xf32>, vector<2x16xf32> -> vector<2x16xf32>
    %42 = vector.extract_strided_slice %41 {offsets = [0, 0], sizes = [1, 16], strides = [1, 1]} : vector<2x16xf32> to vector<1x16xf32>
    %cst_65 = arith.constant 9.765625E-4 : f32
    %43 = vector.broadcast %cst_65 : f32 to vector<1x16xf32>
    %44 = arith.mulf %42, %43 : vector<1x16xf32>
    %45 = vector.extract_strided_slice %41 {offsets = [1, 0], sizes = [1, 16], strides = [1, 1]} : vector<2x16xf32> to vector<1x16xf32>
    %cst_66 = arith.constant 9.765625E-4 : f32
    %46 = vector.broadcast %cst_66 : f32 to vector<1x16xf32>
    %47 = arith.mulf %45, %46 : vector<1x16xf32>
    %48 = arith.mulf %44, %44 : vector<1x16xf32>
    %49 = arith.subf %47, %48 : vector<1x16xf32>
    %c0_67 = arith.constant 0 : index
    %c0_68 = arith.constant 0 : index
    %50 = vector.load %arg2[%c0_67, %c0_68] : memref<1x16xf32, #tpu.memory_space<vmem>>, vector<1x16xf32>
    %cst_69 = arith.constant 9.99999974E-6 : f32
    %51 = vector.broadcast %cst_69 : f32 to vector<1x16xf32>
    %52 = arith.addf %49, %51 : vector<1x16xf32>
    %53 = math.rsqrt %52 : vector<1x16xf32>
    %54 = arith.mulf %50, %53 : vector<1x16xf32>
    %c0_70 = arith.constant 0 : index
    %c0_71 = arith.constant 0 : index
    %55 = vector.load %arg3[%c0_70, %c0_71] : memref<1x16xf32, #tpu.memory_space<vmem>>, vector<1x16xf32>
    %56 = arith.mulf %44, %54 : vector<1x16xf32>
    %57 = arith.subf %55, %56 : vector<1x16xf32>
    %58 = tpu.concatenate %54, %57 in 0 : vector<1x16xf32>, vector<1x16xf32> -> vector<2x16xf32>
    %c0_72 = arith.constant 0 : index
    %c0_73 = arith.constant 0 : index
    %59 = vector.load %arg8[%c0_72, %c0_73] : memref<16x128xf32, #tpu.memory_space<vmem>>, vector<16x128xf32>
    %cst_74 = arith.constant dense<0.000000e+00> : vector<2x128xf32>
    %60 = tpu.matmul %58, %59, %cst_74 {dimension_numbers = #tpu.dot_dimension_numbers<[1], [0], [0], [1], [0, 0, 1, 1], [], []>} : vector<2x16xf32>, vector<16x128xf32>, vector<2x128xf32> -> vector<2x128xf32>
    %61 = vector.extract_strided_slice %60 {offsets = [0, 0], sizes = [1, 128], strides = [1, 1]} : vector<2x128xf32> to vector<1x128xf32>
    %62 = vector.extract_strided_slice %60 {offsets = [1, 0], sizes = [1, 128], strides = [1, 1]} : vector<2x128xf32> to vector<1x128xf32>
    %63 = vector.broadcast %61 : vector<1x128xf32> to vector<128x128xf32>
    %64 = arith.mulf %33, %63 : vector<128x128xf32>
    %65 = vector.broadcast %62 : vector<1x128xf32> to vector<128x128xf32>
    %66 = arith.addf %64, %65 : vector<128x128xf32>
    %cst_75 = arith.constant 0.000000e+00 : f32
    %67 = vector.broadcast %cst_75 : f32 to vector<128x128xf32>
    %68 = arith.maximumf %66, %67 : vector<128x128xf32>
    %69 = vector.shape_cast %68 : vector<128x128xf32> to vector<2x8x8x128xf32>
    %c0_76 = arith.constant 0 : index
    %c1_77 = arith.constant 1 : index
    %c1_78 = arith.constant 1 : index
    %c0_79 = arith.constant 0 : index
    %70 = vector.load %arg10[%c0_76, %c1_77, %c1_78, %c0_79] : memref<2x10x10x128xf32, #tpu.memory_space<vmem>>, vector<2x8x8x128xf32>
    tpu.vector_store %arg10[%c0_76, %c1_77, %c1_78, %c0_79], %69 {strides = array<i32>} : memref<2x10x10x128xf32, #tpu.memory_space<vmem>>, vector<2x8x8x128xf32>,
    %c0_80 = arith.constant 0 : index
    %c0_81 = arith.constant 0 : index
    %c0_82 = arith.constant 0 : index
    %c0_83 = arith.constant 0 : index
    %71 = vector.load %arg10[%c0_80, %c0_81, %c0_82, %c0_83] : memref<2x10x10x128xf32, #tpu.memory_space<vmem>>, vector<2x8x8x128xf32>
    %72 = vector.shape_cast %71 : vector<2x8x8x128xf32> to vector<128x128xf32>
    %c0_84 = arith.constant 0 : index
    %c0_85 = arith.constant 0 : index
    %73 = vector.load %arg11[%c0_84, %c0_85] : memref<128x1152xf32, #tpu.memory_space<vmem>>, vector<128x128xf32>
    tpu.vector_store %arg11[%c0_84, %c0_85], %72 {strides = array<i32>} : memref<128x1152xf32, #tpu.memory_space<vmem>>, vector<128x128xf32>,
    %c0_86 = arith.constant 0 : index
    %c0_87 = arith.constant 0 : index
    %c1_88 = arith.constant 1 : index
    %c0_89 = arith.constant 0 : index
    %74 = vector.load %arg10[%c0_86, %c0_87, %c1_88, %c0_89] : memref<2x10x10x128xf32, #tpu.memory_space<vmem>>, vector<2x8x8x128xf32>
    %75 = vector.shape_cast %74 : vector<2x8x8x128xf32> to vector<128x128xf32>
    %c0_90 = arith.constant 0 : index
    %c128_91 = arith.constant 128 : index
    %76 = vector.load %arg11[%c0_90, %c128_91] : memref<128x1152xf32, #tpu.memory_space<vmem>>, vector<128x128xf32>
    tpu.vector_store %arg11[%c0_90, %c128_91], %75 {strides = array<i32>} : memref<128x1152xf32, #tpu.memory_space<vmem>>, vector<128x128xf32>,
    %c0_92 = arith.constant 0 : index
    %c0_93 = arith.constant 0 : index
    %c2_94 = arith.constant 2 : index
    %c0_95 = arith.constant 0 : index
    %77 = vector.load %arg10[%c0_92, %c0_93, %c2_94, %c0_95] : memref<2x10x10x128xf32, #tpu.memory_space<vmem>>, vector<2x8x8x128xf32>
    %78 = vector.shape_cast %77 : vector<2x8x8x128xf32> to vector<128x128xf32>
    %c0_96 = arith.constant 0 : index
    %c256_97 = arith.constant 256 : index
    %79 = vector.load %arg11[%c0_96, %c256_97] : memref<128x1152xf32, #tpu.memory_space<vmem>>, vector<128x128xf32>
    tpu.vector_store %arg11[%c0_96, %c256_97], %78 {strides = array<i32>} : memref<128x1152xf32, #tpu.memory_space<vmem>>, vector<128x128xf32>,
    %c0_98 = arith.constant 0 : index
    %c1_99 = arith.constant 1 : index
    %c0_100 = arith.constant 0 : index
    %c0_101 = arith.constant 0 : index
    %80 = vector.load %arg10[%c0_98, %c1_99, %c0_100, %c0_101] : memref<2x10x10x128xf32, #tpu.memory_space<vmem>>, vector<2x8x8x128xf32>
    %81 = vector.shape_cast %80 : vector<2x8x8x128xf32> to vector<128x128xf32>
    %c0_102 = arith.constant 0 : index
    %c384_103 = arith.constant 384 : index
    %82 = vector.load %arg11[%c0_102, %c384_103] : memref<128x1152xf32, #tpu.memory_space<vmem>>, vector<128x128xf32>
    tpu.vector_store %arg11[%c0_102, %c384_103], %81 {strides = array<i32>} : memref<128x1152xf32, #tpu.memory_space<vmem>>, vector<128x128xf32>,
    %c0_104 = arith.constant 0 : index
    %c1_105 = arith.constant 1 : index
    %c1_106 = arith.constant 1 : index
    %c0_107 = arith.constant 0 : index
    %83 = vector.load %arg10[%c0_104, %c1_105, %c1_106, %c0_107] : memref<2x10x10x128xf32, #tpu.memory_space<vmem>>, vector<2x8x8x128xf32>
    %84 = vector.shape_cast %83 : vector<2x8x8x128xf32> to vector<128x128xf32>
    %c0_108 = arith.constant 0 : index
    %c512_109 = arith.constant 512 : index
    %85 = vector.load %arg11[%c0_108, %c512_109] : memref<128x1152xf32, #tpu.memory_space<vmem>>, vector<128x128xf32>
    tpu.vector_store %arg11[%c0_108, %c512_109], %84 {strides = array<i32>} : memref<128x1152xf32, #tpu.memory_space<vmem>>, vector<128x128xf32>,
    %c0_110 = arith.constant 0 : index
    %c1_111 = arith.constant 1 : index
    %c2_112 = arith.constant 2 : index
    %c0_113 = arith.constant 0 : index
    %86 = vector.load %arg10[%c0_110, %c1_111, %c2_112, %c0_113] : memref<2x10x10x128xf32, #tpu.memory_space<vmem>>, vector<2x8x8x128xf32>
    %87 = vector.shape_cast %86 : vector<2x8x8x128xf32> to vector<128x128xf32>
    %c0_114 = arith.constant 0 : index
    %c640_115 = arith.constant 640 : index
    %88 = vector.load %arg11[%c0_114, %c640_115] : memref<128x1152xf32, #tpu.memory_space<vmem>>, vector<128x128xf32>
    tpu.vector_store %arg11[%c0_114, %c640_115], %87 {strides = array<i32>} : memref<128x1152xf32, #tpu.memory_space<vmem>>, vector<128x128xf32>,
    %c0_116 = arith.constant 0 : index
    %c2_117 = arith.constant 2 : index
    %c0_118 = arith.constant 0 : index
    %c0_119 = arith.constant 0 : index
    %89 = vector.load %arg10[%c0_116, %c2_117, %c0_118, %c0_119] : memref<2x10x10x128xf32, #tpu.memory_space<vmem>>, vector<2x8x8x128xf32>
    %90 = vector.shape_cast %89 : vector<2x8x8x128xf32> to vector<128x128xf32>
    %c0_120 = arith.constant 0 : index
    %c768_121 = arith.constant 768 : index
    %91 = vector.load %arg11[%c0_120, %c768_121] : memref<128x1152xf32, #tpu.memory_space<vmem>>, vector<128x128xf32>
    tpu.vector_store %arg11[%c0_120, %c768_121], %90 {strides = array<i32>} : memref<128x1152xf32, #tpu.memory_space<vmem>>, vector<128x128xf32>,
    %c0_122 = arith.constant 0 : index
    %c2_123 = arith.constant 2 : index
    %c1_124 = arith.constant 1 : index
    %c0_125 = arith.constant 0 : index
    %92 = vector.load %arg10[%c0_122, %c2_123, %c1_124, %c0_125] : memref<2x10x10x128xf32, #tpu.memory_space<vmem>>, vector<2x8x8x128xf32>
    %93 = vector.shape_cast %92 : vector<2x8x8x128xf32> to vector<128x128xf32>
    %c0_126 = arith.constant 0 : index
    %c896_127 = arith.constant 896 : index
    %94 = vector.load %arg11[%c0_126, %c896_127] : memref<128x1152xf32, #tpu.memory_space<vmem>>, vector<128x128xf32>
    tpu.vector_store %arg11[%c0_126, %c896_127], %93 {strides = array<i32>} : memref<128x1152xf32, #tpu.memory_space<vmem>>, vector<128x128xf32>,
    %c0_128 = arith.constant 0 : index
    %c2_129 = arith.constant 2 : index
    %c2_130 = arith.constant 2 : index
    %c0_131 = arith.constant 0 : index
    %95 = vector.load %arg10[%c0_128, %c2_129, %c2_130, %c0_131] : memref<2x10x10x128xf32, #tpu.memory_space<vmem>>, vector<2x8x8x128xf32>
    %96 = vector.shape_cast %95 : vector<2x8x8x128xf32> to vector<128x128xf32>
    %c0_132 = arith.constant 0 : index
    %c1024_133 = arith.constant 1024 : index
    %97 = vector.load %arg11[%c0_132, %c1024_133] : memref<128x1152xf32, #tpu.memory_space<vmem>>, vector<128x128xf32>
    tpu.vector_store %arg11[%c0_132, %c1024_133], %96 {strides = array<i32>} : memref<128x1152xf32, #tpu.memory_space<vmem>>, vector<128x128xf32>,
    %c0_134 = arith.constant 0 : index
    %c0_135 = arith.constant 0 : index
    %98 = vector.load %arg11[%c0_134, %c0_135] : memref<128x1152xf32, #tpu.memory_space<vmem>>, vector<128x1152xf32>
    %c0_136 = arith.constant 0 : index
    %c0_137 = arith.constant 0 : index
    %99 = vector.load %arg4[%c0_136, %c0_137] : memref<1152x128xf32, #tpu.memory_space<vmem>>, vector<1152x128xf32>
    %cst_138 = arith.constant dense<0.000000e+00> : vector<128x128xf32>
    %100 = tpu.matmul %98, %99, %cst_138 {dimension_numbers = #tpu.dot_dimension_numbers<[1], [0], [0], [1], [0, 0, 1, 1], [], []>} : vector<128x1152xf32>, vector<1152x128xf32>, vector<128x128xf32> -> vector<128x128xf32>
    %cst_139 = arith.constant dense<0.000000e+00> : vector<128xf32>
    %101 = vector.multi_reduction <add>, %100, %cst_139 [0] : vector<128x128xf32> to vector<128xf32>
    %102 = vector.shape_cast %101 : vector<128xf32> to vector<1x128xf32>
    %103 = arith.mulf %100, %100 : vector<128x128xf32>
    %cst_140 = arith.constant dense<0.000000e+00> : vector<128xf32>
    %104 = vector.multi_reduction <add>, %103, %cst_140 [0] : vector<128x128xf32> to vector<128xf32>
    %105 = vector.shape_cast %104 : vector<128xf32> to vector<1x128xf32>
    %106 = tpu.concatenate %102, %105 in 0 : vector<1x128xf32>, vector<1x128xf32> -> vector<2x128xf32>
    %c0_141 = arith.constant 0 : index
    %c0_142 = arith.constant 0 : index
    %107 = vector.load %arg7[%c0_141, %c0_142] : memref<128x16xf32, #tpu.memory_space<vmem>>, vector<128x16xf32>
    %cst_143 = arith.constant dense<0.000000e+00> : vector<2x16xf32>
    %108 = tpu.matmul %106, %107, %cst_143 {dimension_numbers = #tpu.dot_dimension_numbers<[1], [0], [0], [1], [0, 0, 1, 1], [], []>} : vector<2x128xf32>, vector<128x16xf32>, vector<2x16xf32> -> vector<2x16xf32>
    %109 = vector.extract_strided_slice %108 {offsets = [0, 0], sizes = [1, 16], strides = [1, 1]} : vector<2x16xf32> to vector<1x16xf32>
    %cst_144 = arith.constant 9.765625E-4 : f32
    %110 = vector.broadcast %cst_144 : f32 to vector<1x16xf32>
    %111 = arith.mulf %109, %110 : vector<1x16xf32>
    %112 = vector.extract_strided_slice %108 {offsets = [1, 0], sizes = [1, 16], strides = [1, 1]} : vector<2x16xf32> to vector<1x16xf32>
    %cst_145 = arith.constant 9.765625E-4 : f32
    %113 = vector.broadcast %cst_145 : f32 to vector<1x16xf32>
    %114 = arith.mulf %112, %113 : vector<1x16xf32>
    %115 = arith.mulf %111, %111 : vector<1x16xf32>
    %116 = arith.subf %114, %115 : vector<1x16xf32>
    %c0_146 = arith.constant 0 : index
    %c0_147 = arith.constant 0 : index
    %117 = vector.load %arg5[%c0_146, %c0_147] : memref<1x16xf32, #tpu.memory_space<vmem>>, vector<1x16xf32>
    %cst_148 = arith.constant 9.99999974E-6 : f32
    %118 = vector.broadcast %cst_148 : f32 to vector<1x16xf32>
    %119 = arith.addf %116, %118 : vector<1x16xf32>
    %120 = math.rsqrt %119 : vector<1x16xf32>
    %121 = arith.mulf %117, %120 : vector<1x16xf32>
    %c0_149 = arith.constant 0 : index
    %c0_150 = arith.constant 0 : index
    %122 = vector.load %arg6[%c0_149, %c0_150] : memref<1x16xf32, #tpu.memory_space<vmem>>, vector<1x16xf32>
    %123 = arith.mulf %111, %121 : vector<1x16xf32>
    %124 = arith.subf %122, %123 : vector<1x16xf32>
    %125 = tpu.concatenate %121, %124 in 0 : vector<1x16xf32>, vector<1x16xf32> -> vector<2x16xf32>
    %c0_151 = arith.constant 0 : index
    %c0_152 = arith.constant 0 : index
    %126 = vector.load %arg8[%c0_151, %c0_152] : memref<16x128xf32, #tpu.memory_space<vmem>>, vector<16x128xf32>
    %cst_153 = arith.constant dense<0.000000e+00> : vector<2x128xf32>
    %127 = tpu.matmul %125, %126, %cst_153 {dimension_numbers = #tpu.dot_dimension_numbers<[1], [0], [0], [1], [0, 0, 1, 1], [], []>} : vector<2x16xf32>, vector<16x128xf32>, vector<2x128xf32> -> vector<2x128xf32>
    %128 = vector.extract_strided_slice %127 {offsets = [0, 0], sizes = [1, 128], strides = [1, 1]} : vector<2x128xf32> to vector<1x128xf32>
    %129 = vector.extract_strided_slice %127 {offsets = [1, 0], sizes = [1, 128], strides = [1, 1]} : vector<2x128xf32> to vector<1x128xf32>
    %130 = vector.shape_cast %2 : vector<2x8x8x128xf32> to vector<128x128xf32>
    %131 = vector.broadcast %128 : vector<1x128xf32> to vector<128x128xf32>
    %132 = arith.mulf %100, %131 : vector<128x128xf32>
    %133 = arith.addf %130, %132 : vector<128x128xf32>
    %134 = vector.broadcast %129 : vector<1x128xf32> to vector<128x128xf32>
    %135 = arith.addf %133, %134 : vector<128x128xf32>
    %136 = vector.shape_cast %135 : vector<128x128xf32> to vector<2x8x8x128xf32>
    %c0_154 = arith.constant 0 : index
    %c0_155 = arith.constant 0 : index
    %c0_156 = arith.constant 0 : index
    %c0_157 = arith.constant 0 : index
    %137 = vector.load %arg9[%c0_154, %c0_155, %c0_156, %c0_157] : memref<2x8x8x128xf32, #tpu.memory_space<vmem>>, vector<2x8x8x128xf32>
    tpu.vector_store %arg9[%c0_154, %c0_155, %c0_156, %c0_157], %136 {strides = array<i32>} : memref<2x8x8x128xf32, #tpu.memory_space<vmem>>, vector<2x8x8x128xf32>,
    return
  }
}

</mosaic_0001>

<bundles_post_ra>
// kernel: tpu_custom_call.1
= control target key start
LH: loop header
LB: loop body
LE: loop exit
PB: predicated region body
PF: predicated region fallthrough
CT: control target
= control target key end

     0   :  { %14 = vsyncpa [#allocation5], 0  ;;  %s6056_s0 = inlined_call_operand.vmem [shape: f32[2,8,8,128], index: 0, kind: input, shape index: {}]   ;;  %s6057_s1 = inlined_call_operand.hbm [shape: f32[1152,128], index: 1, kind: input, shape index: {}]   ;;  %s6058_s2 = inlined_call_operand.vmem [shape: f32[1,16], index: 2, kind: input, shape index: {}]   ;;  %s6059_s3 = inlined_call_operand.vmem [shape: f32[1,16], index: 3, kind: input, shape index: {}]   ;;  %s6060_s4 = inlined_call_operand.hbm [shape: f32[1152,128], index: 4, kind: input, shape index: {}]   ;;  %s6061_s5 = inlined_call_operand.vmem [shape: f32[1,16], index: 5, kind: input, shape index: {}]   ;;  %s6062_s6 = inlined_call_operand.vmem [shape: f32[1,16], index: 6, kind: input, shape index: {}]   ;;  %s6063_s7 = inlined_call_operand.vmem [shape: f32[128,16], index: 7, kind: input, shape index: {}]   ;;  %s6064_s8 = inlined_call_operand.vmem [shape: f32[16,128], index: 8, kind: input, shape index: {}]   ;;  %s6065_s9 = inlined_call_operand.hbm [shape: f32[2,8,8,128], index: 9, kind: output, shape index: {}]  }
   0x1   :  { %15 = vsyncpa [#allocation8], 0 }
   0x2   :  { %16 = vsyncpa [#allocation6], 0  ;;  %s4819_s30 = smov [#allocation4]   ;;  %s4747_s13 = scalar_lea.hbm %s6057_s1, 18432 }
   0x3   :  { %s24_s10 = sshll.u32 %s4819_s30, 4  ;;  %p4748_p0 = scmp.ne.s32.totalorder %s6057_s1, %s4747_s13  ;;  %s25_s10 = int_to_ptr.vmem [resolvable:$true] %s24_s10 }
   0x4   :  { %p4751_p1 = scmp.lt.u32.totalorder %s4747_s13, %s6057_s1 }
   0x6   :  { %p4753_p2 = pnand %p4751_p1, %p4748_p0 }
   0x8   :  { %4756 = shalt.err (!%p4753_p2)
}
   0x9   :  { %s4757_s18 = scalar_lea.vmem %s25_s10, 18432  ;;  %p4762_p4 = scmp.lt.s32.totalorder %s25_s10, %s25_s10 }
   0xa   :  { %p4758_p3 = scmp.ne.s32.totalorder %s25_s10, %s4757_s18  ;;  %p4763_p5 = scmp.lt.s32.totalorder %s4757_s18, %s4757_s18 }
   0xc   :  { %p4764_p6 = por %p4763_p5, %p4762_p4 }
   0xe   :  { %p4765_p7 = pnand %p4764_p6, %p4758_p3 }
  0x10   :  { %4768 = shalt.err (!%p4765_p7)
}
  0x11   :  { %s4820_s19 = smov 128   ;;  %s4821_s20 = smov 8  }
  0x12   :  { %30 = dma.hbm_to_vmem [thread:$0]  %s6057_s1, 18432, %s25_s10, [#allocation5], %s4820_s19, %s4820_s19, %s4821_s20  }
  0x13   :  { %s4822_s23 = smov [#allocation7]   ;;  %s4769_s27 = scalar_lea.hbm %s6060_s4, 18432 }
  0x14   :  { %s40_s24 = sshll.u32 %s4822_s23, 4  ;;  %p4770_p8 = scmp.ne.s32.totalorder %s6060_s4, %s4769_s27  ;;  %s41_s24 = int_to_ptr.vmem [resolvable:$true] %s40_s24 }
  0x15   :  { %p4773_p9 = scmp.lt.u32.totalorder %s4769_s27, %s6060_s4 }
  0x17   :  { %p4775_p10 = pnand %p4773_p9, %p4770_p8 }
  0x19   :  { %4778 = shalt.err (!%p4775_p10)
}
  0x1a   :  { %s4779_s12 = scalar_lea.vmem %s41_s24, 18432  ;;  %p4784_p12 = scmp.lt.s32.totalorder %s41_s24, %s41_s24 }
  0x1b   :  { %p4780_p11 = scmp.ne.s32.totalorder %s41_s24, %s4779_s12  ;;  %p4785_p13 = scmp.lt.s32.totalorder %s4779_s12, %s4779_s12 }
  0x1d   :  { %p4786_p0 = por %p4785_p13, %p4784_p12 }
  0x1f   :  { %p4787_p1 = pnand %p4786_p0, %p4780_p11 }
  0x21   :  { %4790 = shalt.err (!%p4787_p1)
}
  0x22   :  { %46 = dma.hbm_to_vmem [thread:$0]  %s6060_s4, 18432, %s41_s24, [#allocation8], %s4820_s19, %s4820_s19, %s4821_s20  }
  0x23   :  { %4813 = dma.done.wait [#allocation5], 18432  }
  0x24   :  { %4814 = vsyncadd [#allocation5], 4294948864 }
  0x25   :  { %4815 = dma.done.wait [#allocation8], 18432  }
  0x26   :  { %4816 = vsyncadd [#allocation8], 4294948864  ;;  %v4823_v0 = vmov 0.0   ;;  %v583_v1 = vld [vmem:[#allocation4 + $0x80] sm:$0xff]  ;;  %v584_v2 = vld [vmem:[#allocation4 + $0x88] sm:$0xff]  ;;  %vm4825_vm0 = vmmov 0  }
  0x27   :  { %61 = vst [vmem:[#allocation2] sm:$0xff] %v4823_v0  ;;  %62 = vst [vmem:[#allocation2 + $0x8] sm:$0x3] %v4823_v0  ;;  %v615_v3 = vld [vmem:[#allocation4 + $0x180] sm:$0xff]  ;;  %v4357_v4 = vpack.c.bf16 %v584_v2, %v583_v1  ;;  %v616_v5 = vld [vmem:[#allocation4 + $0x188] sm:$0xff]  ;;  %vm1494_vm1 = vcmask 1040384  }
  0x28   :  { %63 = vst [vmem:[#allocation2 + $0x10] sm:$0xff] %v4823_v0  ;;  %64 = vst [vmem:[#allocation2 + $0x18] sm:$0x3] %v4823_v0  ;;  %v567_v6 = vld [vmem:[#allocation4] sm:$0xff]  ;;  %v568_v7 = vld [vmem:[#allocation4 + $0x8] sm:$0xff]  ;;  %v4389_v8 = vpack.c.bf16 %v616_v5, %v615_v3  ;;  %vm1621_vm2 = vcmask 130048  }
  0x29   :  { %65 = vst [vmem:[#allocation2 + $0x20] sm:$0xff] %v4823_v0  ;;  %66 = vst [vmem:[#allocation2 + $0x28] sm:$0x3] %v4823_v0  ;;  %v4359_v9 = vpack.c.bf16 %v568_v7, %v567_v6  ;;  %v599_v10 = vld [vmem:[#allocation4 + $0x100] sm:$0xff]  ;;  %v600_v11 = vld [vmem:[#allocation4 + $0x108] sm:$0xff]  ;;  %4358 = vmatprep.subr.bf16.mxu0 %v4357_v4 }
  0x2a   :  { %67 = vst [vmem:[#allocation2 + $0x30] sm:$0xff] %v4823_v0  ;;  %68 = vst [vmem:[#allocation2 + $0x38] sm:$0x3] %v4823_v0  ;;  %v585_v12 = vld [vmem:[#allocation4 + $0x90] sm:$0xff]  ;;  %v4391_v13 = vpack.c.bf16 %v600_v11, %v599_v10  ;;  %v586_v14 = vld [vmem:[#allocation4 + $0x98] sm:$0xff]  ;;  %4390 = vmatprep.subr.bf16.mxu1 %v4389_v8 }
  0x2b   :  { %69 = vst [vmem:[#allocation2 + $0x40] sm:$0xff] %v4823_v0  ;;  %70 = vst [vmem:[#allocation2 + $0x48] sm:$0x3] %v4823_v0  ;;  %v617_v15 = vld [vmem:[#allocation4 + $0x190] sm:$0xff]  ;;  %v618_v16 = vld [vmem:[#allocation4 + $0x198] sm:$0xff]  ;;  %4360 = vmatpush3.bf16.msra.mxu0 %v4359_v9  ;;  %v4361_v17 = vpack.c.bf16 %v586_v14, %v585_v12 }
  0x2c   :  { %71 = vst [vmem:[#allocation2 + $0x50] sm:$0xff] %v4823_v0  ;;  %72 = vst [vmem:[#allocation2 + $0x58] sm:$0x3] %v4823_v0  ;;  %v4393_v18 = vpack.c.bf16 %v618_v16, %v617_v15  ;;  %v569_v19 = vld [vmem:[#allocation4 + $0x10] sm:$0xff]  ;;  %v570_v20 = vld [vmem:[#allocation4 + $0x18] sm:$0xff]  ;;  %4392 = vmatpush3.bf16.msra.mxu1 %v4391_v13 }
  0x2d   :  { %73 = vst [vmem:[#allocation2 + $0x60] sm:$0xff] %v4823_v0  ;;  %74 = vst [vmem:[#allocation2 + $0x68] sm:$0x3] %v4823_v0  ;;  %v601_v21 = vld [vmem:[#allocation4 + $0x110] sm:$0xff]  ;;  %v4363_v22 = vpack.c.bf16 %v570_v20, %v569_v19  ;;  %v602_v23 = vld [vmem:[#allocation4 + $0x118] sm:$0xff]  ;;  %4362 = vmatprep.subr.bf16.mxu0 %v4361_v17 }
  0x2e   :  { %75 = vst [vmem:[#allocation2 + $0x70] sm:$0xff] %v4823_v0  ;;  %76 = vst [vmem:[#allocation2 + $0x78] sm:$0x3] %v4823_v0  ;;  %v587_v24 = vld [vmem:[#allocation4 + $0xa0] sm:$0xff]  ;;  %v588_v25 = vld [vmem:[#allocation4 + $0xa8] sm:$0xff]  ;;  %4394 = vmatprep.subr.bf16.mxu1 %v4393_v18  ;;  %v4395_v26 = vpack.c.bf16 %v602_v23, %v601_v21 }
  0x2f   :  { %77 = vst [vmem:[#allocation2 + $0x80] sm:$0xff] %v4823_v0  ;;  %78 = vst [vmem:[#allocation2 + $0x88] sm:$0x3] %v4823_v0  ;;  %v4365_v27 = vpack.c.bf16 %v588_v25, %v587_v24  ;;  %v619_v28 = vld [vmem:[#allocation4 + $0x1a0] sm:$0xff]  ;;  %v620_v29 = vld [vmem:[#allocation4 + $0x1a8] sm:$0xff]  ;;  %4364 = vmatpush3.bf16.msra.mxu0 %v4363_v22 }
  0x30   :  { %79 = vst [vmem:[#allocation2 + $0x90] sm:$0xff] %v4823_v0  ;;  %80 = vst [vmem:[#allocation2 + $0x98] sm:$0x3] %v4823_v0  ;;  %v571_v30 = vld [vmem:[#allocation4 + $0x20] sm:$0xff]  ;;  %v4397_v31 = vpack.c.bf16 %v620_v29, %v619_v28  ;;  %v572_v32 = vld [vmem:[#allocation4 + $0x28] sm:$0xff]  ;;  %4396 = vmatpush3.bf16.msra.mxu1 %v4395_v26 }
  0x31   :  { %81 = vst [vmem:[#allocation2 + $0xa0] sm:$0xff] %v4823_v0  ;;  %82 = vst [vmem:[#allocation2 + $0xa8] sm:$0x3] %v4823_v0  ;;  %v603_v33 = vld [vmem:[#allocation4 + $0x120] sm:$0xff]  ;;  %v604_v34 = vld [vmem:[#allocation4 + $0x128] sm:$0xff]  ;;  %v4367_v35 = vpack.c.bf16 %v572_v32, %v571_v30  ;;  %4366 = vmatprep.subr.bf16.mxu0 %v4365_v27 }
  0x32   :  { %83 = vst [vmem:[#allocation2 + $0xb0] sm:$0xff] %v4823_v0  ;;  %84 = vst [vmem:[#allocation2 + $0xb8] sm:$0x3] %v4823_v0  ;;  %v589_v36 = vld [vmem:[#allocation4 + $0xb0] sm:$0xff]  ;;  %v590_v37 = vld [vmem:[#allocation4 + $0xb8] sm:$0xff]  ;;  %v4399_v39 = vpack.c.bf16 %v604_v34, %v603_v33  ;;  %4398 = vmatprep.subr.bf16.mxu1 %v4397_v31 }
  0x33   :  { %85 = vst [vmem:[#allocation2 + $0xc0] sm:$0xff] %v4823_v0  ;;  %86 = vst [vmem:[#allocation2 + $0xc8] sm:$0x3] %v4823_v0  ;;  %v621_v38 = vld [vmem:[#allocation4 + $0x1b0] sm:$0xff]  ;;  %v4369_v40 = vpack.c.bf16 %v590_v37, %v589_v36  ;;  %v622_v41 = vld [vmem:[#allocation4 + $0x1b8] sm:$0xff]  ;;  %4368 = vmatpush3.bf16.msra.mxu0 %v4367_v35 }
  0x34   :  { %87 = vst [vmem:[#allocation2 + $0xd0] sm:$0xff] %v4823_v0  ;;  %88 = vst [vmem:[#allocation2 + $0xd8] sm:$0x3] %v4823_v0  ;;  %v573_v42 = vld [vmem:[#allocation4 + $0x30] sm:$0xff]  ;;  %v574_v43 = vld [vmem:[#allocation4 + $0x38] sm:$0xff]  ;;  %v4401_v44 = vpack.c.bf16 %v622_v41, %v621_v38  ;;  %4400 = vmatpush3.bf16.msra.mxu1 %v4399_v39 }
  0x35   :  { %89 = vst [vmem:[#allocation2 + $0xe0] sm:$0xff] %v4823_v0  ;;  %90 = vst [vmem:[#allocation2 + $0xe8] sm:$0x3] %v4823_v0  ;;  %v605_v45 = vld [vmem:[#allocation4 + $0x130] sm:$0xff]  ;;  %v606_v46 = vld [vmem:[#allocation4 + $0x138] sm:$0xff]  ;;  %v4371_v51 = vpack.c.bf16 %v574_v43, %v573_v42  ;;  %4370 = vmatprep.subr.bf16.mxu0 %v4369_v40 }
  0x36   :  { %91 = vst [vmem:[#allocation2 + $0xf0] sm:$0xff] %v4823_v0  ;;  %92 = vst [vmem:[#allocation2 + $0xf8] sm:$0x3] %v4823_v0  ;;  %v591_v47 = vld [vmem:[#allocation4 + $0xc0] sm:$0xff]  ;;  %v592_v48 = vld [vmem:[#allocation4 + $0xc8] sm:$0xff]  ;;  %v4403_v52 = vpack.c.bf16 %v606_v46, %v605_v45  ;;  %4402 = vmatprep.subr.bf16.mxu1 %v4401_v44 }
  0x37   :  { %93 = vst [vmem:[#allocation2 + $0x100] sm:$0xff] %v4823_v0  ;;  %94 = vst [vmem:[#allocation2 + $0x108] sm:$0x3] %v4823_v0  ;;  %v623_v49 = vld [vmem:[#allocation4 + $0x1c0] sm:$0xff]  ;;  %v624_v50 = vld [vmem:[#allocation4 + $0x1c8] sm:$0xff]  ;;  %v4373_v53 = vpack.c.bf16 %v592_v48, %v591_v47  ;;  %4372 = vmatpush3.bf16.msra.mxu0 %v4371_v51 }
  0x38   :  { %95 = vst [vmem:[#allocation2 + $0x110] sm:$0xff] %v4823_v0  ;;  %96 = vst [vmem:[#allocation2 + $0x118] sm:$0x3] %v4823_v0  ;;  %v575_v54 = vld [vmem:[#allocation4 + $0x40] sm:$0xff]  ;;  %v576_v55 = vld [vmem:[#allocation4 + $0x48] sm:$0xff]  ;;  %v4405_v57 = vpack.c.bf16 %v624_v50, %v623_v49  ;;  %4404 = vmatpush3.bf16.msra.mxu1 %v4403_v52 }
  0x39   :  { %97 = vst [vmem:[#allocation2 + $0x120] sm:$0xff] %v4823_v0  ;;  %98 = vst [vmem:[#allocation2 + $0x128] sm:$0x3] %v4823_v0  ;;  %v607_v56 = vld [vmem:[#allocation4 + $0x140] sm:$0xff]  ;;  %v608_v58 = vld [vmem:[#allocation4 + $0x148] sm:$0xff]  ;;  %v4375_v63 = vpack.c.bf16 %v576_v55, %v575_v54  ;;  %4374 = vmatprep.subr.bf16.mxu0 %v4373_v53 }
  0x3a   :  { %99 = vst [vmem:[#allocation2 + $0x130] sm:$0xff] %v4823_v0  ;;  %100 = vst [vmem:[#allocation2 + $0x138] sm:$0x3] %v4823_v0  ;;  %v593_v59 = vld [vmem:[#allocation4 + $0xd0] sm:$0xff]  ;;  %v594_v60 = vld [vmem:[#allocation4 + $0xd8] sm:$0xff]  ;;  %v4407_v1 = vpack.c.bf16 %v608_v58, %v607_v56  ;;  %4406 = vmatprep.subr.bf16.mxu1 %v4405_v57 }
  0x3b   :  { %v625_v61 = vld [vmem:[#allocation4 + $0x1d0] sm:$0xff]  ;;  %v626_v62 = vld [vmem:[#allocation4 + $0x1d8] sm:$0xff]  ;;  %v4377_v2 = vpack.c.bf16 %v594_v60, %v593_v59  ;;  %v595_v8 = vld [vmem:[#allocation4 + $0xe0] sm:$0xff]  ;;  %4376 = vmatpush3.bf16.msra.mxu0 %v4375_v63 }
  0x3c   :  { %v577_v3 = vld [vmem:[#allocation4 + $0x50] sm:$0xff]  ;;  %v578_v4 = vld [vmem:[#allocation4 + $0x58] sm:$0xff]  ;;  %v4409_v6 = vpack.c.bf16 %v626_v62, %v625_v61  ;;  %v596_v9 = vld [vmem:[#allocation4 + $0xe8] sm:$0xff]  ;;  %4408 = vmatpush3.bf16.msra.mxu1 %v4407_v1 }
  0x3d   :  { %v609_v5 = vld [vmem:[#allocation4 + $0x150] sm:$0xff]  ;;  %v610_v7 = vld [vmem:[#allocation4 + $0x158] sm:$0xff]  ;;  %v627_v10 = vld [vmem:[#allocation4 + $0x1e0] sm:$0xff]  ;;  %v4379_v12 = vpack.c.bf16 %v578_v4, %v577_v3  ;;  %4378 = vmatprep.subr.bf16.mxu0 %v4377_v2  ;;  %v4381_v16 = vpack.c.bf16 %v596_v9, %v595_v8 }
  0x3e   :  { %v628_v11 = vld [vmem:[#allocation4 + $0x1e8] sm:$0xff]  ;;  %v579_v13 = vld [vmem:[#allocation4 + $0x60] sm:$0xff]  ;;  %v4411_v15 = vpack.c.bf16 %v610_v7, %v609_v5  ;;  %4410 = vmatprep.subr.bf16.mxu1 %v4409_v6  ;;  %v597_v22 = vld [vmem:[#allocation4 + $0xf0] sm:$0xff] }
  0x3f   :  { %v580_v14 = vld [vmem:[#allocation4 + $0x68] sm:$0xff]  ;;  %v611_v17 = vld [vmem:[#allocation4 + $0x160] sm:$0xff]  ;;  %v4413_v20 = vpack.c.bf16 %v628_v11, %v627_v10  ;;  %v598_v23 = vld [vmem:[#allocation4 + $0xf8] sm:$0xff]  ;;  %4380 = vmatpush3.bf16.msra.mxu0 %v4379_v12 }
  0x40   :  { %v166_v18 = vld [vmem:[#allocation2 + $0x1] sm:$0xff]  ;;  %v629_v24 = vld [vmem:[#allocation4 + $0x1f0] sm:$0xff]  ;;  %v630_v25 = vld [vmem:[#allocation4 + $0x1f8] sm:$0xff]  ;;  %v4383_v27 = vpack.c.bf16 %v580_v14, %v579_v13  ;;  %4412 = vmatpush3.bf16.msra.mxu1 %v4411_v15  ;;  %4382 = vmatprep.subr.bf16.mxu0 %v4381_v16  ;;  %v4385_v32 = vpack.c.bf16 %v598_v23, %v597_v22 }
  0x41   :  { %v4951_v19 = vld [vmem:[%s6056_s0] sm:$0xff]  ;;  %v612_v21 = vld [vmem:[#allocation4 + $0x168] sm:$0xff]  ;;  %775 = vmatprep.mubr.f32.mxu0 %v166_v18  ;;  %v581_v28 = vld [vmem:[#allocation4 + $0x70] sm:$0xff]  ;;  %4414 = vmatprep.subr.bf16.mxu1 %v4413_v20  ;;  %v4417_v36 = vpack.c.bf16 %v630_v25, %v629_v24 }
  0x42   :  { %118 = vst [vmem:[#allocation2 + $0x11] sm:$0xff] %v4951_v19  ;;  %v4957_v26 = vld [vmem:[%s6056_s0 + $0x8] sm:$0xff]  ;;  %v582_v29 = vld [vmem:[#allocation4 + $0x78] sm:$0xff]  ;;  %v4963_v30 = vld [vmem:[%s6056_s0 + $0x10] sm:$0xff]  ;;  %v4415_v31 = vpack.c.bf16 %v612_v21, %v611_v17 }
  0x43   :  { %119 = vst [vmem:[#allocation2 + $0x21] sm:$0xff] %v4957_v26  ;;  %v613_v33 = vld [vmem:[#allocation4 + $0x170] sm:$0xff]  ;;  %v614_v34 = vld [vmem:[#allocation4 + $0x178] sm:$0xff]  ;;  %120 = vst [vmem:[#allocation2 + $0x31] sm:$0xff] %v4963_v30  ;;  %4384 = vmatpush3.bf16.msra.mxu0 %v4383_v27  ;;  %v4387_v41 = vpack.c.bf16 %v582_v29, %v581_v28 }
  0x44   :  { %v4969_v35 = vld [vmem:[%s6056_s0 + $0x18] sm:$0xff]  ;;  %v647_v37 = vld [vmem:[#allocation4 + $0x280] sm:$0xff]  ;;  %v648_v38 = vld [vmem:[#allocation4 + $0x288] sm:$0xff]  ;;  %4416 = vmatpush3.bf16.msra.mxu1 %v4415_v31  ;;  %4386 = vmatprep.subr.bf16.mxu0 %v4385_v32  ;;  %v4419_v43 = vpack.c.bf16 %v614_v34, %v613_v33 }
  0x45   :  { %121 = vst [vmem:[#allocation2 + $0x41] sm:$0xff] %v4969_v35  ;;  %v4975_v39 = vld [vmem:[%s6056_s0 + $0x20] sm:$0xff]  ;;  %v4981_v40 = vld [vmem:[%s6056_s0 + $0x28] sm:$0xff]  ;;  %v4987_v42 = vld [vmem:[%s6056_s0 + $0x30] sm:$0xff]  ;;  %v4421_v45 = vpack.c.bf16 %v648_v38, %v647_v37  ;;  %4418 = vmatprep.subr.bf16.mxu1 %v4417_v36 }
  0x46   :  { %122 = vst [vmem:[#allocation2 + $0x51] sm:$0xff] %v4975_v39  ;;  %123 = vst [vmem:[#allocation2 + $0x61] sm:$0xff] %v4981_v40  ;;  %v631_v46 = vld [vmem:[#allocation4 + $0x200] sm:$0xff]  ;;  %v632_v47 = vld [vmem:[#allocation4 + $0x208] sm:$0xff] }
  0x47   :  { %124 = vst [vmem:[#allocation2 + $0x71] sm:$0xff] %v4987_v42  ;;  %v4993_v48 = vld [vmem:[%s6056_s0 + $0x38] sm:$0xff]  ;;  %v679_v49 = vld [vmem:[#allocation4 + $0x380] sm:$0xff]  ;;  %v649_v50 = vld [vmem:[#allocation4 + $0x290] sm:$0xff]  ;;  %4388 = vmatpush3.bf16.msra.mxu0 %v4387_v41  ;;  %v4423_v53 = vpack.c.bf16 %v632_v47, %v631_v46 }
  0x48   :  { %v650_v51 = vld [vmem:[#allocation4 + $0x298] sm:$0xff]  ;;  %125 = vst [vmem:[#allocation2 + $0x81] sm:$0xff] %v4993_v48  ;;  %v680_v52 = vld [vmem:[#allocation4 + $0x388] sm:$0xff]  ;;  %4420 = vmatpush3.bf16.msra.mxu1 %v4419_v43  ;;  %4422 = vmatprep.subr.bf16.mxu0 %v4421_v45  ;;  %v633_v56 = vld [vmem:[#allocation4 + $0x210] sm:$0xff] }
  0x49   :  { %v230_v44 = vld [vmem:[#allocation2 + $0x10] sm:$0xff]  ;;  %v4453_v54 = vpack.c.bf16 %v680_v52, %v679_v49  ;;  %v198_v55 = vld [vmem:[#allocation2 + $0x2] sm:$0xff]  ;;  %v4425_v59 = vpack.c.bf16 %v650_v51, %v649_v50  ;;  %v634_v60 = vld [vmem:[#allocation4 + $0x218] sm:$0xff] }
  0x4a   :  { %920 = vmatprep.mubr.f32.mxu1 %v230_v44  ;;  %v4999_v57 = vld [vmem:[%s6056_s0 + $0x40] sm:$0xff]  ;;  %776 = vmatmul.mubr.f32.vlgmr.msra.gmra.mrb[0].mxu0 %v4823_v0  ;;  %v652_v63 = vld [vmem:[#allocation4 + $0x2a8] sm:$0xff]  ;;  %v5007_v4 = vld [vmem:[#allocation2 + $0x12] sm:$0xff]  ;;  %v4427_v5 = vpack.c.bf16 %v634_v60, %v633_v56 }
  0x4b   :  { %6077 = vst [vmem:[#allocation13_spill] sm:$0xff] %v4999_v57  ;;  %v5001_v58 = vld [vmem:[#allocation2 + $0x20] sm:$0xff]  ;;  %4454 = vmatprep.subr.bf16.mxu1 %v4453_v54  ;;  %126 = vst [vmem:[#allocation2 + $0xb1] sm:$0xff] %v4999_v57  ;;  %v664_v1 = vld [vmem:[#allocation4 + $0x308] sm:$0xff]  ;;  %921 = vmatmul.mubr.f32.vlgmr.msra.gmra.mrb[0].mxu1 %v198_v55 }
  0x4c   :  { %v663_v61 = vld [vmem:[#allocation4 + $0x300] sm:$0xff]  ;;  %4424 = vmatpush3.bf16.msra.mxu0 %v4423_v53  ;;  %780 = vmatprep.mubr.f32.mxu0 %v4951_v19  ;;  %v636_v6 = vld [vmem:[#allocation4 + $0x228] sm:$0xff]  ;;  %v653_v7 = vld [vmem:[#allocation4 + $0x2b0] sm:$0xff] }
  0x4d   :  { %v651_v62 = vld [vmem:[#allocation4 + $0x2a0] sm:$0xff]  ;;  %v4455_v3 = vpack.c.bf16 %v664_v1, %v663_v61  ;;  %925 = vmatprep.mubr.f32.mxu1 %v5001_v58  ;;  %v5009_v8 = vld [vmem:[#allocation2 + $0x30] sm:$0xff]  ;;  %4426 = vmatprep.subr.bf16.mxu0 %v4425_v59  ;;  %v654_v10 = vld [vmem:[#allocation4 + $0x2b8] sm:$0xff] }
  0x4e   :  { %v635_v2 = vld [vmem:[#allocation4 + $0x220] sm:$0xff]  ;;  %v4429_v9 = vpack.c.bf16 %v652_v63, %v651_v62  ;;  %v5014_v11 = vld [vmem:[%s6056_s0 + $0x48] sm:$0xff]  ;;  %781 = vmatmul.mubr.f32.gmra.mrb[2].mxu0 %v230_v44  ;;  %v681_v12 = vld [vmem:[#allocation4 + $0x390] sm:$0xff]  ;;  %v4433_v25 = vpack.c.bf16 %v654_v10, %v653_v7 }
  0x4f   :  { %4456 = vmatpush3.bf16.msra.mxu1 %v4455_v3  ;;  %6078 = vst [vmem:[#allocation14_spill] sm:$0xff] %v5014_v11  ;;  %127 = vst [vmem:[#allocation2 + $0xc1] sm:$0xff] %v5014_v11  ;;  %v682_v13 = vld [vmem:[#allocation4 + $0x398] sm:$0xff]  ;;  %v5020_v14 = vld [vmem:[%s6056_s0 + $0x50] sm:$0xff]  ;;  %785 = vmatprep.mubr.f32.mxu0 %v4957_v26  ;;  %v4431_v22 = vpack.c.bf16 %v636_v6, %v635_v2 }
  0x50   :  { %6079 = vst [vmem:[#allocation15_spill] sm:$0xff] %v5020_v14  ;;  %926 = vmatmul.mubr.f32.gmra.mrb[2].mxu1 %v5007_v4  ;;  %v637_v15 = vld [vmem:[#allocation4 + $0x230] sm:$0xff]  ;;  %v4457_v16 = vpack.c.bf16 %v682_v13, %v681_v12  ;;  %128 = vst [vmem:[#allocation2 + $0xd1] sm:$0xff] %v5020_v14  ;;  %v666_v18 = vld [vmem:[#allocation4 + $0x318] sm:$0xff]  ;;  %4428 = vmatpush3.bf16.msra.mxu0 %v4427_v5 }
  0x51   :  { %v665_v17 = vld [vmem:[#allocation4 + $0x310] sm:$0xff]  ;;  %930 = vmatprep.mubr.f32.mxu1 %v5009_v8  ;;  %v5026_v20 = vld [vmem:[#allocation2 + $0x22] sm:$0xff]  ;;  %v638_v23 = vld [vmem:[#allocation4 + $0x238] sm:$0xff]  ;;  %4430 = vmatprep.subr.bf16.mxu0 %v4429_v9 }
  0x52   :  { %v5028_v21 = vld [vmem:[#allocation2 + $0x40] sm:$0xff]  ;;  %v4459_v24 = vpack.c.bf16 %v666_v18, %v665_v17  ;;  %v656_v28 = vld [vmem:[#allocation4 + $0x2c8] sm:$0xff]  ;;  %4458 = vmatprep.subr.bf16.mxu1 %v4457_v16  ;;  %786 = vmatmul.mubr.f32.gmra.mrb[4].mxu0 %v5001_v58  ;;  %v5031_v31 = vld [vmem:[#allocation2 + $0x32] sm:$0xff]  ;;  %v4435_v43 = vpack.c.bf16 %v638_v23, %v637_v15 }
  0x53   :  { %v655_v27 = vld [vmem:[#allocation4 + $0x2c0] sm:$0xff]  ;;  %v684_v32 = vld [vmem:[#allocation4 + $0x3a8] sm:$0xff]  ;;  %v5036_v33 = vld [vmem:[%s6056_s0 + $0x58] sm:$0xff]  ;;  %790 = vmatprep.mubr.f32.mxu0 %v4963_v30 }
  0x54   :  { %v683_v29 = vld [vmem:[#allocation4 + $0x3a0] sm:$0xff]  ;;  %4460 = vmatpush3.bf16.msra.mxu1 %v4459_v24  ;;  %6080 = vst [vmem:[#allocation16_spill] sm:$0xff] %v5036_v33  ;;  %129 = vst [vmem:[#allocation2 + $0xe1] sm:$0xff] %v5036_v33  ;;  %v668_v37 = vld [vmem:[#allocation4 + $0x328] sm:$0xff]  ;;  %4432 = vmatpush3.bf16.msra.mxu0 %v4431_v22  ;;  %v4437_v50 = vpack.c.bf16 %v656_v28, %v655_v27 }
  0x55   :  { %v667_v34 = vld [vmem:[#allocation4 + $0x320] sm:$0xff]  ;;  %931 = vmatmul.mubr.f32.gmra.mrb[4].mxu1 %v5026_v20  ;;  %v4461_v36 = vpack.c.bf16 %v684_v32, %v683_v29  ;;  %v685_v38 = vld [vmem:[#allocation4 + $0x3b0] sm:$0xff]  ;;  %v686_v41 = vld [vmem:[#allocation4 + $0x3b8] sm:$0xff]  ;;  %4434 = vmatprep.subr.bf16.mxu0 %v4433_v25 }
  0x56   :  { %935 = vmatprep.mubr.f32.mxu1 %v5028_v21  ;;  %v4463_v44 = vpack.c.bf16 %v668_v37, %v667_v34  ;;  %v5045_v45 = vld [vmem:[%s6056_s0 + $0x60] sm:$0xff]  ;;  %v669_v46 = vld [vmem:[#allocation4 + $0x330] sm:$0xff]  ;;  %v670_v47 = vld [vmem:[#allocation4 + $0x338] sm:$0xff]  ;;  %v4465_v53 = vpack.c.bf16 %v686_v41, %v685_v38  ;;  %791 = vmatmul.mubr.f32.gmra.mrb[6].mxu0 %v5009_v8 }
  0x57   :  { %6081 = vst [vmem:[#allocation17_spill] sm:$0xff] %v5045_v45  ;;  %v5047_v49 = vld [vmem:[#allocation2 + $0x50] sm:$0xff]  ;;  %v639_v51 = vld [vmem:[#allocation4 + $0x240] sm:$0xff]  ;;  %v640_v52 = vld [vmem:[#allocation4 + $0x248] sm:$0xff]  ;;  %4462 = vmatprep.subr.bf16.mxu1 %v4461_v36  ;;  %v4467_v59 = vpack.c.bf16 %v670_v47, %v669_v46  ;;  %795 = vmatprep.mubr.f32.mxu0 %v4969_v35 }
  0x58   :  { %130 = vst [vmem:[#allocation2 + $0xf1] sm:$0xff] %v5045_v45  ;;  %v5051_v54 = vld [vmem:[#allocation2 + $0x42] sm:$0xff]  ;;  %v657_v55 = vld [vmem:[#allocation4 + $0x2d0] sm:$0xff]  ;;  %v658_v56 = vld [vmem:[#allocation4 + $0x2d8] sm:$0xff]  ;;  %4464 = vmatpush3.bf16.msra.mxu1 %v4463_v44  ;;  %4436 = vmatpush3.bf16.msra.mxu0 %v4435_v43  ;;  %v4439_v1 = vpack.c.bf16 %v640_v52, %v639_v51 }
  0x59   :  { %936 = vmatmul.mubr.f32.gmra.mrb[6].mxu1 %v5031_v31  ;;  %v5055_v60 = vld [vmem:[#allocation2 + $0x60] sm:$0xff]  ;;  %v641_v61 = vld [vmem:[#allocation4 + $0x250] sm:$0xff]  ;;  %v642_v62 = vld [vmem:[#allocation4 + $0x258] sm:$0xff]  ;;  %4438 = vmatprep.subr.bf16.mxu0 %v4437_v50  ;;  %v4441_v6 = vpack.c.bf16 %v658_v56, %v657_v55 }
  0x5a   :  { %v687_v63 = vld [vmem:[#allocation4 + $0x3c0] sm:$0xff]  ;;  %940 = vmatprep.mubr.f32.mxu1 %v5047_v49  ;;  %v688_v2 = vld [vmem:[#allocation4 + $0x3c8] sm:$0xff]  ;;  %4466 = vmatprep.subr.bf16.mxu1 %v4465_v53  ;;  %v689_v15 = vld [vmem:[#allocation4 + $0x3d0] sm:$0xff]  ;;  %v4443_v25 = vpack.c.bf16 %v642_v62, %v641_v61 }
  0x5b   :  { %v5061_v3 = vld [vmem:[%s6056_s0 + $0x68] sm:$0xff]  ;;  %v671_v5 = vld [vmem:[#allocation4 + $0x340] sm:$0xff]  ;;  %v4469_v10 = vpack.c.bf16 %v688_v2, %v687_v63  ;;  %796 = vmatmul.mubr.f32.gmra.mrb[8].mxu0 %v5028_v21  ;;  %v690_v16 = vld [vmem:[#allocation4 + $0x3d8] sm:$0xff] }
  0x5c   :  { %6082 = vst [vmem:[#allocation18_spill] sm:$0xff] %v5061_v3  ;;  %v659_v7 = vld [vmem:[#allocation4 + $0x2e0] sm:$0xff]  ;;  %v660_v9 = vld [vmem:[#allocation4 + $0x2e8] sm:$0xff]  ;;  %131 = vst [vmem:[#allocation2 + $0x101] sm:$0xff] %v5061_v3  ;;  %4468 = vmatpush3.bf16.msra.mxu1 %v4467_v59  ;;  %800 = vmatprep.mubr.f32.mxu0 %v4975_v39  ;;  %v4473_v32 = vpack.c.bf16 %v690_v16, %v689_v15 }
  0x5d   :  { %v672_v12 = vld [vmem:[#allocation4 + $0x348] sm:$0xff]  ;;  %v5068_v17 = vld [vmem:[%s6056_s0 + $0x70] sm:$0xff]  ;;  %941 = vmatmul.mubr.f32.gmra.mrb[8].mxu1 %v5051_v54  ;;  %v674_v22 = vld [vmem:[#allocation4 + $0x358] sm:$0xff]  ;;  %4440 = vmatpush3.bf16.msra.mxu0 %v4439_v1  ;;  %v4445_v28 = vpack.c.bf16 %v660_v9, %v659_v7 }
  0x5e   :  { %v4471_v13 = vpack.c.bf16 %v672_v12, %v671_v5  ;;  %6083 = vst [vmem:[#allocation19_spill] sm:$0xff] %v5068_v17  ;;  %132 = vst [vmem:[#allocation2 + $0x111] sm:$0xff] %v5068_v17  ;;  %v673_v18 = vld [vmem:[#allocation4 + $0x350] sm:$0xff]  ;;  %945 = vmatprep.mubr.f32.mxu1 %v5055_v60  ;;  %v643_v27 = vld [vmem:[#allocation4 + $0x260] sm:$0xff]  ;;  %4442 = vmatprep.subr.bf16.mxu0 %v4441_v6 }
  0x5f   :  { %v5074_v23 = vld [vmem:[#allocation2 + $0x52] sm:$0xff]  ;;  %v644_v29 = vld [vmem:[#allocation4 + $0x268] sm:$0xff]  ;;  %4470 = vmatprep.subr.bf16.mxu1 %v4469_v10  ;;  %801 = vmatmul.mubr.f32.gmra.mrb[10].mxu0 %v5047_v49  ;;  %v4475_v37 = vpack.c.bf16 %v674_v22, %v673_v18  ;;  %v691_v38 = vld [vmem:[#allocation4 + $0x3e0] sm:$0xff] }
  0x60   :  { %v5076_v24 = vld [vmem:[#allocation2 + $0x70] sm:$0xff]  ;;  %v662_v36 = vld [vmem:[#allocation4 + $0x2f8] sm:$0xff]  ;;  %4472 = vmatpush3.bf16.msra.mxu1 %v4471_v13  ;;  %v692_v41 = vld [vmem:[#allocation4 + $0x3e8] sm:$0xff]  ;;  %805 = vmatprep.mubr.f32.mxu0 %v4981_v40  ;;  %v4447_v51 = vpack.c.bf16 %v644_v29, %v643_v27 }
  0x61   :  { %v661_v34 = vld [vmem:[#allocation4 + $0x2f0] sm:$0xff]  ;;  %v5082_v43 = vld [vmem:[%s6056_s0 + $0x78] sm:$0xff]  ;;  %946 = vmatmul.mubr.f32.gmra.mrb[10].mxu1 %v5074_v23  ;;  %v675_v44 = vld [vmem:[#allocation4 + $0x360] sm:$0xff]  ;;  %4444 = vmatpush3.bf16.msra.mxu0 %v4443_v25  ;;  %v4477_v56 = vpack.c.bf16 %v692_v41, %v691_v38 }
  0x62   :  { %6084 = vst [vmem:[#allocation20_spill] sm:$0xff] %v5082_v43  ;;  %133 = vst [vmem:[#allocation2 + $0x121] sm:$0xff] %v5082_v43  ;;  %v676_v46 = vld [vmem:[#allocation4 + $0x368] sm:$0xff]  ;;  %950 = vmatprep.mubr.f32.mxu1 %v5076_v24  ;;  %v5090_v50 = vld [vmem:[#allocation2 + $0x80] sm:$0xff]  ;;  %4446 = vmatprep.subr.bf16.mxu0 %v4445_v28  ;;  %v4449_v52 = vpack.c.bf16 %v662_v36, %v661_v34 }
  0x63   :  { %v5088_v47 = vld [vmem:[#allocation2 + $0x62] sm:$0xff]  ;;  %4474 = vmatprep.subr.bf16.mxu1 %v4473_v32  ;;  %v645_v53 = vld [vmem:[#allocation4 + $0x270] sm:$0xff]  ;;  %v646_v55 = vld [vmem:[#allocation4 + $0x278] sm:$0xff]  ;;  %806 = vmatmul.mubr.f32.gmra.mrb[12].mxu0 %v5055_v60  ;;  %v4479_v61 = vpack.c.bf16 %v676_v46, %v675_v44 }
  0x64   :  { %v693_v59 = vld [vmem:[#allocation4 + $0x3f0] sm:$0xff]  ;;  %4476 = vmatpush3.bf16.msra.mxu1 %v4475_v37  ;;  %v694_v62 = vld [vmem:[#allocation4 + $0x3f8] sm:$0xff]  ;;  %v695_v63 = vld [vmem:[#allocation4 + $0x400] sm:$0xff]  ;;  %810 = vmatprep.mubr.f32.mxu0 %v4987_v42  ;;  %v4451_v9 = vpack.c.bf16 %v646_v55, %v645_v53 }
  0x65   :  { %v696_v1 = vld [vmem:[#allocation4 + $0x408] sm:$0xff]  ;;  %951 = vmatmul.mubr.f32.gmra.mrb[12].mxu1 %v5088_v47  ;;  %v677_v2 = vld [vmem:[#allocation4 + $0x370] sm:$0xff]  ;;  %v678_v5 = vld [vmem:[#allocation4 + $0x378] sm:$0xff]  ;;  %4448 = vmatpush3.bf16.msra.mxu0 %v4447_v51  ;;  %v4481_v12 = vpack.c.bf16 %v694_v62, %v693_v59 }
  0x66   :  { %955 = vmatprep.mubr.f32.mxu1 %v5090_v50  ;;  %v5096_v6 = vld [vmem:[#allocation2 + $0x72] sm:$0xff]  ;;  %v174_v7 = vld [vmem:[#allocation2 + $0xa1] sm:$0xff]  ;;  %4450 = vmatprep.subr.bf16.mxu0 %v4449_v52  ;;  %v5098_v13 = vpack.c.bf16 %v696_v1, %v695_v63  ;;  %v4483_v15 = vpack.c.bf16 %v678_v5, %v677_v2 }
  0x67   :  { %v238_v10 = vld [vmem:[#allocation2 + $0xb0] sm:$0xff]  ;;  %4478 = vmatprep.subr.bf16.mxu1 %v4477_v56  ;;  %811 = vmatmul.mubr.f32.gmra.mrb[14].mxu0 %v5076_v24  ;;  %v206_v16 = vld [vmem:[#allocation2 + $0xa2] sm:$0xff]  ;;  %v698_v52 = vld [vmem:[#allocation4 + $0x418] sm:$0xff] }
  0x68   :  { %4480 = vmatpush3.bf16.msra.mxu1 %v4479_v61  ;;  %815 = vmatprep.mubr.f32.mxu0 %v174_v7  ;;  %v5102_v18 = vld [vmem:[#allocation2 + $0xc0] sm:$0xff]  ;;  %v5108_v22 = vld [vmem:[#allocation2 + $0xb2] sm:$0xff]  ;;  %v700_v56 = vld [vmem:[#allocation4 + $0x428] sm:$0xff] }
  0x69   :  { %956 = vmatmul.mubr.f32.gmra.mrb[14].mxu1 %v5096_v6  ;;  %4452 = vmatpush3.bf16.msra.mxu0 %v4451_v9  ;;  %v5110_v25 = vld [vmem:[#allocation2 + $0xd0] sm:$0xff]  ;;  %v5115_v27 = vld [vmem:[#allocation2 + $0xc2] sm:$0xff]  ;;  %v702_v61 = vld [vmem:[#allocation4 + $0x438] sm:$0xff] }
  0x6a   :  { %960 = vmatprep.mubr.f32.mxu1 %v238_v10  ;;  %4482 = vmatprep.subr.bf16.mxu1 %v4481_v12  ;;  %v5117_v28 = vld [vmem:[#allocation2 + $0xe0] sm:$0xff]  ;;  %v5123_v29 = vld [vmem:[#allocation2 + $0xd2] sm:$0xff]  ;;  %v704_v63 = vld [vmem:[#allocation4 + $0x448] sm:$0xff] }
  0x6b   :  { %4486 = vmatprep.subr.bf16.mxu0 %v5098_v13  ;;  %816 = vmatmul.mubr.f32.gmra.mrb[16].mxu0 %v4823_v0  ;;  %v5125_v32 = vld [vmem:[#allocation2 + $0xf0] sm:$0xff]  ;;  %v5131_v34 = vld [vmem:[#allocation2 + $0xe2] sm:$0xff]  ;;  %v706_v2 = vld [vmem:[#allocation4 + $0x458] sm:$0xff] }
  0x6c   :  { %4484 = vmatpush3.bf16.msra.mxu1 %v4483_v15  ;;  %820 = vmatprep.mubr.f32.mxu0 %v4999_v57  ;;  %v5133_v36 = vld [vmem:[#allocation2 + $0x100] sm:$0xff]  ;;  %v5139_v37 = vld [vmem:[#allocation2 + $0xf2] sm:$0xff]  ;;  %v708_v7 = vld [vmem:[#allocation4 + $0x468] sm:$0xff] }
  0x6d   :  { %961 = vmatmul.mubr.f32.gmra.mrb[16].mxu1 %v206_v16  ;;  %v5141_v38 = vld [vmem:[#allocation2 + $0x110] sm:$0xff]  ;;  %v5147_v41 = vld [vmem:[#allocation2 + $0x102] sm:$0xff]  ;;  %v1499_v16 = vld [vmem:[%s6063_s7 + $0x18] sm:$0xff] }
  0x6e   :  { %965 = vmatprep.mubr.f32.mxu1 %v5102_v18  ;;  %v5149_v44 = vld [vmem:[#allocation2 + $0x120] sm:$0xff]  ;;  %v5155_v46 = vld [vmem:[#allocation2 + $0x112] sm:$0xff] }
  0x6f   :  { %821 = vmatmul.mubr.f32.gmra.mrb[18].mxu0 %v238_v10  ;;  %v697_v51 = vld [vmem:[#allocation4 + $0x410] sm:$0xff]  ;;  %v699_v55 = vld [vmem:[#allocation4 + $0x420] sm:$0xff]  ;;  %v710_v10 = vld [vmem:[#allocation4 + $0x478] sm:$0xff] }
  0x70   :  { %825 = vmatprep.mubr.f32.mxu0 %v5014_v11  ;;  %v4489_v53 = vpack.c.bf16 %v698_v52, %v697_v51  ;;  %v4493_v59 = vpack.c.bf16 %v700_v56, %v699_v55  ;;  %v705_v1 = vld [vmem:[#allocation4 + $0x450] sm:$0xff]  ;;  %v707_v5 = vld [vmem:[#allocation4 + $0x460] sm:$0xff]  ;;  %v1501_v52 = vld [vmem:[%s6063_s7 + $0x28] sm:$0xff] }
  0x71   :  { %966 = vmatmul.mubr.f32.gmra.mrb[18].mxu1 %v5108_v22  ;;  %v709_v9 = vld [vmem:[#allocation4 + $0x470] sm:$0xff]  ;;  %v301_v12 = vld [vmem:[#allocation2 + $0x82] sm:$0xff] }
  0x72   :  { %970 = vmatprep.mubr.f32.mxu1 %v5110_v25  ;;  %v398_v15 = vld [vmem:[#allocation2 + $0x92] sm:$0xff]  ;;  %v1500_v51 = vld [vmem:[%s6063_s7 + $0x20] sm:$0xff] }
  0x73   :  { %826 = vmatmul.mubr.f32.gmra.mrb[20].mxu0 %v5102_v18  ;;  %v4524_v55 = vpack.c.bf16 %v1501_v52, %v1500_v51 }
  0x74   :  { %830 = vmatprep.mubr.f32.mxu0 %v5020_v14 }
  0x75   :  { %971 = vmatmul.mubr.f32.gmra.mrb[20].mxu1 %v5115_v27 }
  0x76   :  { %975 = vmatprep.mubr.f32.mxu1 %v5117_v28 }
  0x77   :  { %831 = vmatmul.mubr.f32.gmra.mrb[22].mxu0 %v5110_v25 }
  0x78   :  { %835 = vmatprep.mubr.f32.mxu0 %v5036_v33 }
  0x79   :  { %976 = vmatmul.mubr.f32.gmra.mrb[22].mxu1 %v5123_v29 }
  0x7a   :  { %980 = vmatprep.mubr.f32.mxu1 %v5125_v32 }
  0x7b   :  { %836 = vmatmul.mubr.f32.gmra.mrb[24].mxu0 %v5117_v28 }
  0x7c   :  { %840 = vmatprep.mubr.f32.mxu0 %v5045_v45 }
  0x7d   :  { %981 = vmatmul.mubr.f32.gmra.mrb[24].mxu1 %v5131_v34 }
  0x7e   :  { %985 = vmatprep.mubr.f32.mxu1 %v5133_v36 }
  0x7f   :  { %841 = vmatmul.mubr.f32.gmra.mrb[26].mxu0 %v5125_v32 }
  0x80   :  { %845 = vmatprep.mubr.f32.mxu0 %v5061_v3 }
  0x81   :  { %986 = vmatmul.mubr.f32.gmra.mrb[26].mxu1 %v5139_v37 }
  0x82   :  { %990 = vmatprep.mubr.f32.mxu1 %v5141_v38 }
  0x83   :  { %846 = vmatmul.mubr.f32.gmra.mrb[28].mxu0 %v5133_v36 }
  0x84   :  { %850 = vmatprep.mubr.f32.mxu0 %v5068_v17 }
  0x85   :  { %991 = vmatmul.mubr.f32.gmra.mrb[28].mxu1 %v5147_v41 }
  0x86   :  { %995 = vmatprep.mubr.f32.mxu1 %v5149_v44 }
  0x87   :  { %851 = vmatmul.mubr.f32.gmra.mrb[30].mxu0 %v5141_v38 }
  0x88   :  { %1065 = vmatprep.mubr.f32.mxu0 %v5007_v4  ;;  %v701_v4 = vld [vmem:[#allocation4 + $0x430] sm:$0xff] }
  0x89   :  { %996 = vmatmul.mubr.f32.gmra.mrb[30].mxu1 %v5155_v46  ;;  %v4497_v62 = vpack.c.bf16 %v702_v61, %v701_v4 }
  0x8a   :  { %1210 = vmatprep.mubr.f32.mxu1 %v4957_v26 }
  0x8b   :  { %1066 = vmatmul.mubr.f32.vlgmr.msra.gmra.mrb[32].mxu0 %v4951_v19 }
  0x8c   :  { %4488 = vmatpush3.bf16.msra.mxu0 %v5098_v13  ;;  %1070 = vmatprep.mubr.f32.mxu0 %v5026_v20  ;;  %v4513_v13 = vpack.c.bf16 %v710_v10, %v709_v9  ;;  %v1503_v9 = vld [vmem:[%s6063_s7 + $0x38] sm:$0xff] }
  0x8d   :  { %1211 = vmatmul.mubr.f32.vlgmr.msra.gmra.mrb[32].mxu1 %v5001_v58  ;;  %4490 = vmatprep.subr.bf16.mxu0 %v4489_v53  ;;  %v703_v58 = vld [vmem:[#allocation4 + $0x440] sm:$0xff] }
  0x8e   :  { %1215 = vmatprep.mubr.f32.mxu1 %v4963_v30 }
  0x8f   :  { %1071 = vmatmul.mubr.f32.gmra.mrb[34].mxu0 %v4957_v26 }
  0x90   :  { %1075 = vmatprep.mubr.f32.mxu0 %v5031_v31  ;;  %4492 = vmatpush3.bf16.msra.mxu0 %v4489_v53 }
  0x91   :  { %1216 = vmatmul.mubr.f32.gmra.mrb[34].mxu1 %v5009_v8  ;;  %4494 = vmatprep.subr.bf16.mxu0 %v4493_v59  ;;  %v4501_v8 = vpack.c.bf16 %v704_v63, %v703_v58 }
  0x92   :  { %1220 = vmatprep.mubr.f32.mxu1 %v4969_v35 }
  0x93   :  { %1076 = vmatmul.mubr.f32.gmra.mrb[36].mxu0 %v4963_v30 }
  0x94   :  { %1080 = vmatprep.mubr.f32.mxu0 %v5051_v54  ;;  %4496 = vmatpush3.bf16.msra.mxu0 %v4493_v59 }
  0x95   :  { %1221 = vmatmul.mubr.f32.gmra.mrb[36].mxu1 %v5028_v21  ;;  %4498 = vmatprep.subr.bf16.mxu0 %v4497_v62  ;;  %v4505_v21 = vpack.c.bf16 %v706_v2, %v705_v1 }
  0x96   :  { %1225 = vmatprep.mubr.f32.mxu1 %v4975_v39 }
  0x97   :  { %1081 = vmatmul.mubr.f32.gmra.mrb[38].mxu0 %v4969_v35 }
  0x98   :  { %1085 = vmatprep.mubr.f32.mxu0 %v5074_v23  ;;  %4500 = vmatpush3.bf16.msra.mxu0 %v4497_v62 }
  0x99   :  { %1226 = vmatmul.mubr.f32.gmra.mrb[38].mxu1 %v5047_v49  ;;  %4502 = vmatprep.subr.bf16.mxu0 %v4501_v8  ;;  %v4509_v49 = vpack.c.bf16 %v708_v7, %v707_v5 }
  0x9a   :  { %1230 = vmatprep.mubr.f32.mxu1 %v4981_v40 }
  0x9b   :  { %1086 = vmatmul.mubr.f32.gmra.mrb[40].mxu0 %v4975_v39 }
  0x9c   :  { %1090 = vmatprep.mubr.f32.mxu0 %v5088_v47  ;;  %4504 = vmatpush3.bf16.msra.mxu0 %v4501_v8 }
  0x9d   :  { %1231 = vmatmul.mubr.f32.gmra.mrb[40].mxu1 %v5055_v60  ;;  %4506 = vmatprep.subr.bf16.mxu0 %v4505_v21  ;;  %v366_v60 = vld [vmem:[#allocation2 + $0x91] sm:$0xff] }
  0x9e   :  { %1235 = vmatprep.mubr.f32.mxu1 %v4987_v42 }
  0x9f   :  { %1091 = vmatmul.mubr.f32.gmra.mrb[42].mxu0 %v4981_v40 }
  0xa0   :  { %1095 = vmatprep.mubr.f32.mxu0 %v5096_v6  ;;  %4508 = vmatpush3.bf16.msra.mxu0 %v4505_v21 }
  0xa1   :  { %1236 = vmatmul.mubr.f32.gmra.mrb[42].mxu1 %v5076_v24  ;;  %4510 = vmatprep.subr.bf16.mxu0 %v4509_v49  ;;  %v374_v24 = vld [vmem:[#allocation2 + $0x131] sm:$0xff] }
  0xa2   :  { %1240 = vmatprep.mubr.f32.mxu1 %v4993_v48 }
  0xa3   :  { %1096 = vmatmul.mubr.f32.gmra.mrb[44].mxu0 %v4987_v42 }
  0xa4   :  { %1100 = vmatprep.mubr.f32.mxu0 %v301_v12  ;;  %4512 = vmatpush3.bf16.msra.mxu0 %v4509_v49  ;;  %v1502_v49 = vld [vmem:[%s6063_s7 + $0x30] sm:$0xff] }
  0xa5   :  { %1241 = vmatmul.mubr.f32.gmra.mrb[44].mxu1 %v5090_v50  ;;  %4514 = vmatprep.subr.bf16.mxu0 %v4513_v13  ;;  %v5219_v50 = vld [vmem:[#allocation2] sm:$0xff] }
  0xa6   :  { %1245 = vmatprep.mubr.f32.mxu1 %v366_v60 }
  0xa7   :  { %1101 = vmatmul.mubr.f32.gmra.mrb[46].mxu0 %v4993_v48 }
  0xa8   :  { %1105 = vmatprep.mubr.f32.mxu0 %v5108_v22  ;;  %4516 = vmatpush3.bf16.msra.mxu0 %v4513_v13 }
  0xa9   :  { %1246 = vmatmul.mubr.f32.gmra.mrb[46].mxu1 %v4823_v0  ;;  %v309_v0 = vld [vmem:[#allocation2 + $0x122] sm:$0xff] }
  0xaa   :  { %1250 = vmatprep.mubr.f32.mxu1 %v5014_v11 }
  0xab   :  { %1106 = vmatmul.mubr.f32.gmra.mrb[48].mxu0 %v4999_v57  ;;  %v2336_v57 = vld [vmem:[#allocation7 + $0x448] sm:$0xff] }
  0xac   :  { %1110 = vmatprep.mubr.f32.mxu0 %v5115_v27 }
  0xad   :  { %1251 = vmatmul.mubr.f32.gmra.mrb[48].mxu1 %v5102_v18 }
  0xae   :  { %1255 = vmatprep.mubr.f32.mxu1 %v5020_v14 }
  0xaf   :  { %1111 = vmatmul.mubr.f32.gmra.mrb[50].mxu0 %v5014_v11 }
  0xb0   :  { %1115 = vmatprep.mubr.f32.mxu0 %v5123_v29 }
  0xb1   :  { %1256 = vmatmul.mubr.f32.gmra.mrb[50].mxu1 %v5110_v25 }
  0xb2   :  { %1260 = vmatprep.mubr.f32.mxu1 %v5036_v33 }
  0xb3   :  { %1116 = vmatmul.mubr.f32.gmra.mrb[52].mxu0 %v5020_v14  ;;  %v2332_v14 = vld [vmem:[#allocation7 + $0x428] sm:$0xff] }
  0xb4   :  { %1120 = vmatprep.mubr.f32.mxu0 %v5131_v34 }
  0xb5   :  { %1261 = vmatmul.mubr.f32.gmra.mrb[52].mxu1 %v5117_v28 }
  0xb6   :  { %1265 = vmatprep.mubr.f32.mxu1 %v5045_v45 }
  0xb7   :  { %1121 = vmatmul.mubr.f32.gmra.mrb[54].mxu0 %v5036_v33  ;;  %v2331_v33 = vld [vmem:[#allocation7 + $0x420] sm:$0xff] }
  0xb8   :  { %1125 = vmatprep.mubr.f32.mxu0 %v5139_v37  ;;  %v4680_v11 = vpack.c.bf16 %v2332_v14, %v2331_v33  ;;  %v2337_v33 = vld [vmem:[#allocation7 + $0x450] sm:$0xff] }
  0xb9   :  { %1266 = vmatmul.mubr.f32.gmra.mrb[54].mxu1 %v5125_v32 }
  0xba   :  { %1270 = vmatprep.mubr.f32.mxu1 %v5061_v3 }
  0xbb   :  { %1126 = vmatmul.mubr.f32.gmra.mrb[56].mxu0 %v5045_v45 }
  0xbc   :  { %1130 = vmatprep.mubr.f32.mxu0 %v5147_v41 }
  0xbd   :  { %1271 = vmatmul.mubr.f32.gmra.mrb[56].mxu1 %v5133_v36 }
  0xbe   :  { %1275 = vmatprep.mubr.f32.mxu1 %v5068_v17 }
  0xbf   :  { %1131 = vmatmul.mubr.f32.gmra.mrb[58].mxu0 %v5061_v3 }
  0xc0   :  { %1135 = vmatprep.mubr.f32.mxu0 %v5155_v46 }
  0xc1   :  { %1276 = vmatmul.mubr.f32.gmra.mrb[58].mxu1 %v5141_v38 }
  0xc2   :  { %1280 = vmatprep.mubr.f32.mxu1 %v5082_v43 }
  0xc3   :  { %1136 = vmatmul.mubr.f32.gmra.mrb[60].mxu0 %v5068_v17 }
  0xc4   :  { %1140 = vmatprep.mubr.f32.mxu0 %v309_v0 }
  0xc5   :  { %1281 = vmatmul.mubr.f32.gmra.mrb[60].mxu1 %v5149_v44 }
  0xc6   :  { %1285 = vmatprep.mubr.f32.mxu1 %v374_v24 }
  0xc7   :  { %1141 = vmatmul.mubr.f32.gmra.mrb[62].mxu0 %v5082_v43  ;;  %v2330_v43 = vld [vmem:[#allocation7 + $0x418] sm:$0xff] }
  0xc8   :  { %4193 = vmatprep.mubr.f32.mxu0 %v5026_v20  ;;  %v406_v20 = vld [vmem:[#allocation2 + $0x132] sm:$0xff] }
  0xc9   :  { %1286 = vmatmul.mubr.f32.gmra.mrb[62].mxu1 %v5219_v50 }
  0xca   :  { %4249 = vmatprep.mubr.msk.f32.mxu1 %vm4825_vm0, %v5219_v50 }
  0xcb   :  { %4194 = vmatmul.mubr.f32.vlgmr.msra.gmra.mrb[64].mxu0 %v5031_v31  ;;  %v1496_v31 = vld [vmem:[%s6063_s7] sm:$0xff] }
  0xcc   :  { %4196 = vmatprep.mubr.f32.mxu0 %v5051_v54  ;;  %v1497_v54 = vld [vmem:[%s6063_s7 + $0x8] sm:$0xff] }
  0xcf   :  { %4197 = vmatmul.mubr.f32.gmra.mrb[66].mxu0 %v5074_v23  ;;  %v6067_v23 = vmov 0.0|0.0  }
  0xd0   :  { %4199 = vmatprep.mubr.f32.mxu0 %v5088_v47  ;;  %4517 = vmatprep.subr.bf16.mxu1 %v6067_v23  ;;  %v4518_v47 = vpack.c.bf16 %v1497_v54, %v1496_v31 }
  0xd2   :  { %4519 = vmatpush3.bf16.msra.mxu1 %v4518_v47 }
  0xd3   :  { %4200 = vmatmul.mubr.f32.gmra.mrb[68].mxu0 %v5096_v6  ;;  %4520 = vmatprep.subr.bf16.mxu1 %v6067_v23  ;;  %v1498_v6 = vld [vmem:[%s6063_s7 + $0x10] sm:$0xff] }
  0xd4   :  { %4202 = vmatprep.mubr.f32.mxu0 %v301_v12  ;;  %v4521_v18 = vpack.c.bf16 %v1499_v16, %v1498_v6  ;;  %v4527_v12 = vpack.c.bf16 %v1503_v9, %v1502_v49 }
  0xd6   :  { %4522 = vmatpush3.bf16.msra.mxu1 %v4521_v18 }
  0xd7   :  { %4203 = vmatmul.mubr.f32.gmra.mrb[70].mxu0 %v398_v15  ;;  %4523 = vmatprep.subr.bf16.mxu1 %v6067_v23 }
  0xd8   :  { %4205 = vmatprep.mubr.f32.mxu0 %v5115_v27 }
  0xda   :  { %4525 = vmatpush3.bf16.msra.mxu1 %v4524_v55 }
  0xdb   :  { %4206 = vmatmul.mubr.f32.gmra.mrb[72].mxu0 %v5123_v29  ;;  %4526 = vmatprep.subr.bf16.mxu1 %v6067_v23 }
  0xdc   :  { %4208 = vmatprep.mubr.f32.mxu0 %v5131_v34 }
  0xde   :  { %4528 = vmatpush3.bf16.msra.mxu1 %v4527_v12 }
  0xdf   :  { %4209 = vmatmul.mubr.f32.gmra.mrb[74].mxu0 %v5139_v37  ;;  %4529 = vmatprep.subr.bf16.mxu1 %v6067_v23 }
  0xe0   :  { %4211 = vmatprep.mubr.f32.mxu0 %v5147_v41 }
  0xe3   :  { %4212 = vmatmul.mubr.f32.gmra.mrb[76].mxu0 %v5155_v46 }
  0xe4   :  { %4214 = vmatprep.mubr.f32.mxu0 %v309_v0 }
  0xe7   :  { %4215 = vmatmul.mubr.f32.gmra.mrb[78].mxu0 %v406_v20 }
 0x11d   :  { %v3449_v22 = vpop.f32.mrb[0].mxu0 }
 0x11e   :  { %v3529_v25 = vpop.f32.mrb[0].mxu1  ;;  %v3450_v27 = vpop.f32.mrb[1].mxu0 }
 0x11f   :  { %v3451_v28 = vadd.f32 %v3450_v27, %v3449_v22  ;;  %v3530_v29 = vpop.f32.mrb[1].mxu1  ;;  %v1505_v27 = vld [vmem:[%s6063_s7 + $0x48] sm:$0xff] }
 0x120   :  { %v3531_v32 = vadd.f32 %v3530_v29, %v3529_v25  ;;  %v1504_v25 = vld [vmem:[%s6063_s7 + $0x40] sm:$0xff] }
 0x121   :  { %v3452_v34 = vpop.f32.mrb[2].mxu0  ;;  %v4530_v29 = vpack.c.bf16 %v1505_v27, %v1504_v25  ;;  %v1509_v25 = vld [vmem:[%s6063_s7 + $0x68] sm:$0xff]  ;;  %v1510_v27 = vld [vmem:[%s6063_s7 + $0x70] sm:$0xff] }
 0x122   :  { %v5249_v36 = vadd.f32 %v3531_v32, %v3451_v28  ;;  %v3453_v38 = vpop.f32.mrb[3].mxu0 }
 0x123   :  { %v3532_v37 = vpop.f32.mrb[2].mxu1  ;;  %v3454_v41 = vadd.f32 %v3453_v38, %v3452_v34  ;;  %4531 = vmatpush3.bf16.msra.mxu1 %v4530_v29 }
 0x124   :  { %v3533_v44 = vpop.f32.mrb[3].mxu1  ;;  %4532 = vmatprep.subr.bf16.mxu1 %v6067_v23 }
 0x125   :  { %v3534_v46 = vadd.f32 %v3533_v44, %v3532_v37  ;;  %v3455_v53 = vpop.f32.mrb[4].mxu0 }
 0x126   :  { %v3456_v4 = vpop.f32.mrb[5].mxu0 }
 0x127   :  { %v5257_v56 = vadd.f32 %v3534_v46, %v3454_v41  ;;  %v3457_v61 = vadd.f32 %v3456_v4, %v3455_v53 }
 0x128   :  { %v3535_v59 = vpop.f32.mrb[4].mxu1 }
 0x129   :  { %v3536_v62 = vpop.f32.mrb[5].mxu1  ;;  %v3458_v63 = vpop.f32.mrb[6].mxu0 }
 0x12a   :  { %v3537_v58 = vadd.f32 %v3536_v62, %v3535_v59  ;;  %v3459_v2 = vpop.f32.mrb[7].mxu0  ;;  %v1507_v62 = vld [vmem:[%s6063_s7 + $0x58] sm:$0xff] }
 0x12b   :  { %v3460_v21 = vadd.f32 %v3459_v2, %v3458_v63 }
 0x12c   :  { %v5260_v8 = vadd.f32 %v3537_v58, %v3457_v61  ;;  %v3538_v1 = vpop.f32.mrb[6].mxu1  ;;  %v1506_v61 = vld [vmem:[%s6063_s7 + $0x50] sm:$0xff] }
 0x12d   :  { %v3539_v5 = vpop.f32.mrb[7].mxu1  ;;  %v4533_v63 = vpack.c.bf16 %v1507_v62, %v1506_v61 }
 0x12e   :  { %v3540_v7 = vadd.f32 %v3539_v5, %v3538_v1  ;;  %v3461_v10 = vpop.f32.mrb[8].mxu0 }
 0x12f   :  { %v3462_v0 = vpop.f32.mrb[9].mxu0  ;;  %4534 = vmatpush3.bf16.msra.mxu1 %v4533_v63 }
 0x130   :  { %v5268_v60 = vadd.f32 %v3540_v7, %v3460_v21  ;;  %v3541_v13 = vpop.f32.mrb[8].mxu1  ;;  %v3463_v24 = vadd.f32 %v3462_v0, %v3461_v10  ;;  %4535 = vmatprep.subr.bf16.mxu1 %v6067_v23 }
 0x131   :  { %v3542_v15 = vpop.f32.mrb[9].mxu1 }
 0x132   :  { %v3543_v20 = vadd.f32 %v3542_v15, %v3541_v13  ;;  %v3464_v31 = vpop.f32.mrb[10].mxu0 }
 0x133   :  { %v3465_v6 = vpop.f32.mrb[11].mxu0 }
 0x134   :  { %v5271_v54 = vadd.f32 %v3543_v20, %v3463_v24  ;;  %v3544_v47 = vpop.f32.mrb[10].mxu1  ;;  %v3466_v16 = vadd.f32 %v3465_v6, %v3464_v31 }
 0x135   :  { %v3545_v18 = vpop.f32.mrb[11].mxu1 }
 0x136   :  { %v3546_v22 = vadd.f32 %v3545_v18, %v3544_v47  ;;  %v3467_v28 = vpop.f32.mrb[12].mxu0 }
 0x137   :  { %v3468_v37 = vpop.f32.mrb[13].mxu0 }
 0x138   :  { %v5279_v32 = vadd.f32 %v3546_v22, %v3466_v16  ;;  %v3547_v34 = vpop.f32.mrb[12].mxu1  ;;  %v3469_v38 = vadd.f32 %v3468_v37, %v3467_v28  ;;  %v1508_v22 = vld [vmem:[%s6063_s7 + $0x60] sm:$0xff] }
 0x139   :  { %v3548_v41 = vpop.f32.mrb[13].mxu1  ;;  %v4536_v29 = vpack.c.bf16 %v1509_v25, %v1508_v22 }
 0x13a   :  { %v3549_v44 = vadd.f32 %v3548_v41, %v3547_v34  ;;  %v3470_v46 = vpop.f32.mrb[14].mxu0  ;;  %v1511_v34 = vld [vmem:[%s6063_s7 + $0x78] sm:$0xff] }
 0x13b   :  { %v3471_v53 = vpop.f32.mrb[15].mxu0  ;;  %4537 = vmatpush3.bf16.msra.mxu1 %v4536_v29 }
 0x13c   :  { %v5282_v51 = vadd.f32 %v3549_v44, %v3469_v38  ;;  %v3550_v52 = vpop.f32.mrb[14].mxu1  ;;  %v3472_v55 = vadd.f32 %v3471_v53, %v3470_v46  ;;  %v4539_v46 = vpack.c.bf16 %v1511_v34, %v1510_v27  ;;  %4538 = vmatprep.subr.bf16.mxu1 %v6067_v23 }
 0x13d   :  { %v3551_v59 = vpop.f32.mrb[15].mxu1 }
 0x13e   :  { %v3552_v4 = vadd.f32 %v3551_v59, %v3550_v52  ;;  %v3473_v58 = vpop.f32.mrb[16].mxu0 }
 0x13f   :  { %v3474_v21 = vpop.f32.mrb[17].mxu0  ;;  %4540 = vmatpush3.bf16.msra.mxu1 %v4539_v46 }
 0x140   :  { %v5290_v1 = vadd.f32 %v3552_v4, %v3472_v55  ;;  %v3553_v2 = vpop.f32.mrb[16].mxu1  ;;  %v3475_v5 = vadd.f32 %v3474_v21, %v3473_v58  ;;  %4541 = vmatprep.subr.bf16.mxu1 %v6067_v23 }
 0x141   :  { %v3554_v7 = vpop.f32.mrb[17].mxu1 }
 0x142   :  { %v3555_v49 = vadd.f32 %v3554_v7, %v3553_v2  ;;  %v3476_v9 = vpop.f32.mrb[18].mxu0 }
 0x143   :  { %v3477_v13 = vpop.f32.mrb[19].mxu0 }
 0x144   :  { %v5293_v10 = vadd.f32 %v3555_v49, %v3475_v5  ;;  %v3556_v12 = vpop.f32.mrb[18].mxu1  ;;  %v3478_v0 = vadd.f32 %v3477_v13, %v3476_v9 }
 0x145   :  { %v3557_v24 = vpop.f32.mrb[19].mxu1 }
 0x146   :  { %v3558_v15 = vadd.f32 %v3557_v24, %v3556_v12  ;;  %v3479_v20 = vpop.f32.mrb[20].mxu0 }
 0x147   :  { %v3480_v6 = vpop.f32.mrb[21].mxu0 }
 0x148   :  { %v5295_v31 = vadd.f32 %v3558_v15, %v3478_v0  ;;  %v3559_v47 = vpop.f32.mrb[20].mxu1  ;;  %v3481_v16 = vadd.f32 %v3480_v6, %v3479_v20 }
 0x149   :  { %v3560_v18 = vpop.f32.mrb[21].mxu1 }
 0x14a   :  { %v3561_v28 = vadd.f32 %v3560_v18, %v3559_v47  ;;  %v3482_v37 = vpop.f32.mrb[22].mxu0 }
 0x14b   :  { %v3483_v44 = vpop.f32.mrb[23].mxu0 }
 0x14c   :  { %v5311_v38 = vadd.f32 %v3561_v28, %v3481_v16  ;;  %v3562_v41 = vpop.f32.mrb[22].mxu1  ;;  %v3484_v52 = vadd.f32 %v3483_v44, %v3482_v37 }
 0x14d   :  { %v3563_v53 = vpop.f32.mrb[23].mxu1 }
 0x14e   :  { %v3564_v55 = vadd.f32 %v3563_v53, %v3562_v41  ;;  %v3485_v59 = vpop.f32.mrb[24].mxu0 }
 0x14f   :  { %v3486_v62 = vpop.f32.mrb[25].mxu0 }
 0x150   :  { %v5314_v4 = vadd.f32 %v3564_v55, %v3484_v52  ;;  %v3565_v61 = vpop.f32.mrb[24].mxu1  ;;  %v3487_v58 = vadd.f32 %v3486_v62, %v3485_v59 }
 0x151   :  { %v3566_v63 = vpop.f32.mrb[25].mxu1 }
 0x152   :  { %v3567_v2 = vadd.f32 %v3566_v63, %v3565_v61  ;;  %v3488_v21 = vpop.f32.mrb[26].mxu0 }
 0x153   :  { %v3489_v49 = vpop.f32.mrb[27].mxu0 }
 0x154   :  { %v5317_v5 = vadd.f32 %v3567_v2, %v3487_v58  ;;  %v3568_v7 = vpop.f32.mrb[26].mxu1  ;;  %v3490_v9 = vadd.f32 %v3489_v49, %v3488_v21 }
 0x155   :  { %v3569_v12 = vpop.f32.mrb[27].mxu1 }
 0x156   :  { %v3570_v13 = vadd.f32 %v3569_v12, %v3568_v7  ;;  %v3491_v0 = vpop.f32.mrb[28].mxu0 }
 0x157   :  { %v3492_v20 = vpop.f32.mrb[29].mxu0 }
 0x158   :  { %v5319_v24 = vadd.f32 %v3570_v13, %v3490_v9  ;;  %v3571_v15 = vpop.f32.mrb[28].mxu1  ;;  %v3493_v47 = vadd.f32 %v3492_v20, %v3491_v0 }
 0x159   :  { %v3572_v6 = vpop.f32.mrb[29].mxu1 }
 0x15a   :  { %v3573_v16 = vadd.f32 %v3572_v6, %v3571_v15  ;;  %v3494_v18 = vpop.f32.mrb[30].mxu0 }
 0x15b   :  { %v3495_v27 = vpop.f32.mrb[31].mxu0 }
 0x15c   :  { %v5321_v22 = vadd.f32 %v3573_v16, %v3493_v47  ;;  %v3574_v25 = vpop.f32.mrb[30].mxu1  ;;  %v3496_v28 = vadd.f32 %v3495_v27, %v3494_v18 }
 0x15d   :  { %v3575_v29 = vpop.f32.mrb[31].mxu1 }
 0x15e   :  { %v3576_v34 = vadd.f32 %v3575_v29, %v3574_v25  ;;  %v3609_v37 = vpop.f32.mrb[32].mxu0 }
 0x15f   :  { %v3610_v44 = vpop.f32.mrb[33].mxu0 }
 0x160   :  { %v5323_v41 = vadd.f32 %v3576_v34, %v3496_v28  ;;  %v3689_v46 = vpop.f32.mrb[32].mxu1  ;;  %v3611_v52 = vadd.f32 %v3610_v44, %v3609_v37 }
 0x161   :  { %v3690_v53 = vpop.f32.mrb[33].mxu1 }
 0x162   :  { %v3691_v55 = vadd.f32 %v3690_v53, %v3689_v46  ;;  %v1068_v59 = vadd.f32 %v3611_v52, %v5249_v36  ;;  %v3612_v61 = vpop.f32.mrb[34].mxu0 }
 0x163   :  { %v3613_v62 = vpop.f32.mrb[35].mxu0 }
 0x164   :  { %v3692_v58 = vpop.f32.mrb[34].mxu1  ;;  %v3614_v63 = vadd.f32 %v3613_v62, %v3612_v61  ;;  %v5326_v21 = vadd.f32 %v3691_v55, %v1068_v59 }
 0x165   :  { %v3693_v2 = vpop.f32.mrb[35].mxu1 }
 0x166   :  { %v3694_v7 = vadd.f32 %v3693_v2, %v3692_v58  ;;  %v1073_v49 = vadd.f32 %v3614_v63, %v5257_v56  ;;  %v3615_v9 = vpop.f32.mrb[36].mxu0 }
 0x167   :  { %v3616_v12 = vpop.f32.mrb[37].mxu0 }
 0x168   :  { %v3695_v13 = vpop.f32.mrb[36].mxu1  ;;  %v3617_v0 = vadd.f32 %v3616_v12, %v3615_v9  ;;  %v5329_v20 = vadd.f32 %v3694_v7, %v1073_v49 }
 0x169   :  { %v3696_v15 = vpop.f32.mrb[37].mxu1 }
 0x16a   :  { %v3697_v47 = vadd.f32 %v3696_v15, %v3695_v13  ;;  %v1078_v36 = vadd.f32 %v3617_v0, %v5260_v8  ;;  %v3618_v6 = vpop.f32.mrb[38].mxu0 }
 0x16b   :  { %v3619_v16 = vpop.f32.mrb[39].mxu0 }
 0x16c   :  { %v3698_v18 = vpop.f32.mrb[38].mxu1  ;;  %v3620_v25 = vadd.f32 %v3619_v16, %v3618_v6  ;;  %v5332_v28 = vadd.f32 %v3697_v47, %v1078_v36 }
 0x16d   :  { %v3699_v27 = vpop.f32.mrb[39].mxu1 }
 0x16e   :  { %v3700_v29 = vadd.f32 %v3699_v27, %v3698_v18  ;;  %v1083_v56 = vadd.f32 %v3620_v25, %v5268_v60  ;;  %v3621_v34 = vpop.f32.mrb[40].mxu0 }
 0x16f   :  { %v3622_v37 = vpop.f32.mrb[41].mxu0 }
 0x170   :  { %v3701_v44 = vpop.f32.mrb[40].mxu1  ;;  %v3623_v46 = vadd.f32 %v3622_v37, %v3621_v34  ;;  %v5335_v53 = vadd.f32 %v3700_v29, %v1083_v56 }
 0x171   :  { %v3702_v52 = vpop.f32.mrb[41].mxu1 }
 0x172   :  { %v3703_v55 = vadd.f32 %v3702_v52, %v3701_v44  ;;  %v1088_v8 = vadd.f32 %v3623_v46, %v5271_v54  ;;  %v3624_v59 = vpop.f32.mrb[42].mxu0 }
 0x173   :  { %v3625_v61 = vpop.f32.mrb[43].mxu0 }
 0x174   :  { %v3704_v62 = vpop.f32.mrb[42].mxu1  ;;  %v3626_v58 = vadd.f32 %v3625_v61, %v3624_v59  ;;  %v5338_v2 = vadd.f32 %v3703_v55, %v1088_v8 }
 0x175   :  { %v3705_v63 = vpop.f32.mrb[43].mxu1 }
 0x176   :  { %v3706_v7 = vadd.f32 %v3705_v63, %v3704_v62  ;;  %v1093_v60 = vadd.f32 %v3626_v58, %v5279_v32  ;;  %v3627_v49 = vpop.f32.mrb[44].mxu0 }
 0x177   :  { %v3628_v9 = vpop.f32.mrb[45].mxu0 }
 0x178   :  { %v3707_v12 = vpop.f32.mrb[44].mxu1  ;;  %v3629_v13 = vadd.f32 %v3628_v9, %v3627_v49  ;;  %v5341_v15 = vadd.f32 %v3706_v7, %v1093_v60 }
 0x179   :  { %v3708_v0 = vpop.f32.mrb[45].mxu1 }
 0x17a   :  { %v3709_v47 = vadd.f32 %v3708_v0, %v3707_v12  ;;  %v1098_v54 = vadd.f32 %v3629_v13, %v5282_v51  ;;  %v3630_v36 = vpop.f32.mrb[46].mxu0 }
 0x17b   :  { %v3631_v6 = vpop.f32.mrb[47].mxu0 }
 0x17c   :  { %v3710_v16 = vpop.f32.mrb[46].mxu1  ;;  %v3632_v18 = vadd.f32 %v3631_v6, %v3630_v36  ;;  %v5344_v27 = vadd.f32 %v3709_v47, %v1098_v54 }
 0x17d   :  { %v3711_v25 = vpop.f32.mrb[47].mxu1 }
 0x17e   :  { %v3712_v29 = vadd.f32 %v3711_v25, %v3710_v16  ;;  %v1103_v32 = vadd.f32 %v3632_v18, %v5290_v1  ;;  %v3633_v56 = vpop.f32.mrb[48].mxu0 }
 0x17f   :  { %v3634_v34 = vpop.f32.mrb[49].mxu0 }
 0x180   :  { %v3713_v37 = vpop.f32.mrb[48].mxu1  ;;  %v3635_v44 = vadd.f32 %v3634_v34, %v3633_v56  ;;  %v5347_v52 = vadd.f32 %v3712_v29, %v1103_v32 }
 0x181   :  { %v3714_v46 = vpop.f32.mrb[49].mxu1 }
 0x182   :  { %v3715_v55 = vadd.f32 %v3714_v46, %v3713_v37  ;;  %v1108_v51 = vadd.f32 %v3635_v44, %v5293_v10  ;;  %v3636_v8 = vpop.f32.mrb[50].mxu0 }
 0x183   :  { %v3637_v59 = vpop.f32.mrb[51].mxu0 }
 0x184   :  { %v3716_v61 = vpop.f32.mrb[50].mxu1  ;;  %v3638_v62 = vadd.f32 %v3637_v59, %v3636_v8  ;;  %v5350_v63 = vadd.f32 %v3715_v55, %v1108_v51 }
 0x185   :  { %v3717_v58 = vpop.f32.mrb[51].mxu1 }
 0x186   :  { %v3718_v7 = vadd.f32 %v3717_v58, %v3716_v61  ;;  %v1113_v1 = vadd.f32 %v3638_v62, %v5295_v31  ;;  %v3639_v60 = vpop.f32.mrb[52].mxu0 }
 0x187   :  { %v3640_v49 = vpop.f32.mrb[53].mxu0 }
 0x188   :  { %v3719_v9 = vpop.f32.mrb[52].mxu1  ;;  %v3641_v12 = vadd.f32 %v3640_v49, %v3639_v60  ;;  %v5353_v0 = vadd.f32 %v3718_v7, %v1113_v1 }
 0x189   :  { %v3720_v13 = vpop.f32.mrb[53].mxu1 }
 0x18a   :  { %v3721_v47 = vadd.f32 %v3720_v13, %v3719_v9  ;;  %v1118_v10 = vadd.f32 %v3641_v12, %v5311_v38  ;;  %v3642_v54 = vpop.f32.mrb[54].mxu0 }
 0x18b   :  { %v3643_v36 = vpop.f32.mrb[55].mxu0 }
 0x18c   :  { %v3722_v6 = vpop.f32.mrb[54].mxu1  ;;  %v3644_v16 = vadd.f32 %v3643_v36, %v3642_v54  ;;  %v5356_v25 = vadd.f32 %v3721_v47, %v1118_v10 }
 0x18d   :  { %v3723_v18 = vpop.f32.mrb[55].mxu1 }
 0x18e   :  { %v3724_v29 = vadd.f32 %v3723_v18, %v3722_v6  ;;  %v1123_v31 = vadd.f32 %v3644_v16, %v5314_v4  ;;  %v3645_v32 = vpop.f32.mrb[56].mxu0 }
 0x18f   :  { %v3646_v56 = vpop.f32.mrb[57].mxu0 }
 0x190   :  { %v3725_v34 = vpop.f32.mrb[56].mxu1  ;;  %v3647_v37 = vadd.f32 %v3646_v56, %v3645_v32  ;;  %v5359_v46 = vadd.f32 %v3724_v29, %v1123_v31 }
 0x191   :  { %v3726_v44 = vpop.f32.mrb[57].mxu1 }
 0x192   :  { %v3727_v55 = vadd.f32 %v3726_v44, %v3725_v34  ;;  %v1128_v38 = vadd.f32 %v3647_v37, %v5317_v5  ;;  %v3648_v51 = vpop.f32.mrb[58].mxu0 }
 0x193   :  { %v3649_v8 = vpop.f32.mrb[59].mxu0 }
 0x194   :  { %v3728_v59 = vpop.f32.mrb[58].mxu1  ;;  %v3650_v61 = vadd.f32 %v3649_v8, %v3648_v51  ;;  %v5362_v58 = vadd.f32 %v3727_v55, %v1128_v38 }
 0x195   :  { %v3729_v62 = vpop.f32.mrb[59].mxu1 }
 0x196   :  { %v3730_v7 = vadd.f32 %v3729_v62, %v3728_v59  ;;  %v1133_v4 = vadd.f32 %v3650_v61, %v5319_v24  ;;  %v3651_v1 = vpop.f32.mrb[60].mxu0 }
 0x197   :  { %v3652_v60 = vpop.f32.mrb[61].mxu0 }
 0x198   :  { %v3731_v49 = vpop.f32.mrb[60].mxu1  ;;  %v3653_v9 = vadd.f32 %v3652_v60, %v3651_v1  ;;  %v5365_v13 = vadd.f32 %v3730_v7, %v1133_v4 }
 0x199   :  { %v3732_v12 = vpop.f32.mrb[61].mxu1 }
 0x19a   :  { %v3733_v47 = vadd.f32 %v3732_v12, %v3731_v49  ;;  %v1138_v5 = vadd.f32 %v3653_v9, %v5321_v22  ;;  %v3654_v10 = vpop.f32.mrb[62].mxu0 }
 0x19b   :  { %v3655_v54 = vpop.f32.mrb[63].mxu0 }
 0x19c   :  { %v3734_v36 = vpop.f32.mrb[62].mxu1  ;;  %v3656_v6 = vadd.f32 %v3655_v54, %v3654_v10  ;;  %v5368_v18 = vadd.f32 %v3733_v47, %v1138_v5 }
 0x19d   :  { %v3735_v16 = vpop.f32.mrb[63].mxu1 }
 0x19e   :  { %v3736_v29 = vadd.f32 %v3735_v16, %v3734_v36  ;;  %v1143_v24 = vadd.f32 %v3656_v6, %v5323_v41  ;;  %v4195_v31 = vpop.f32.mrb[64].mxu0 }
 0x19f   :  { %v5372_v32 = vadd.f32 %v4195_v31, %v5329_v20  ;;  %v1357_v56 = vpop.f32.mrb[65].mxu0 }
 0x1a0   :  { %v5375_v34 = vadd.f32 %v1357_v56, %v5326_v21  ;;  %v1288_v37 = vadd.f32 %v3736_v29, %v1143_v24 }
 0x1a1   :  { %v1458_v22 = vmul.f32 %v5372_v32, %v5372_v32 }
 0x1a2   :  { %v1457_v44 = vmul.f32 %v5375_v34, %v5375_v34  ;;  %v4198_v55 = vpop.f32.mrb[66].mxu0  ;;  %v1436_v20 = vadd.f32 %v5372_v32, %v5375_v34 }
 0x1a3   :  { %v5382_v38 = vadd.f32 %v4198_v55, %v5335_v53  ;;  %v1367_v41 = vpop.f32.mrb[67].mxu0 }
 0x1a4   :  { %v5387_v51 = vadd.f32 %v1367_v41, %v5332_v28  ;;  %v1473_v21 = vadd.f32 %v1458_v22, %v1457_v44 }
 0x1a5   :  { %v1460_v53 = vmul.f32 %v5382_v38, %v5382_v38 }
 0x1a6   :  { %v1437_v8 = vadd.f32 %v1436_v20, %v5387_v51  ;;  %v1459_v59 = vmul.f32 %v5387_v51, %v5387_v51  ;;  %v4201_v61 = vpop.f32.mrb[68].mxu0 }
 0x1a7   :  { %v5393_v62 = vadd.f32 %v4201_v61, %v5341_v15  ;;  %v1377_v7 = vpop.f32.mrb[69].mxu0 }
 0x1a8   :  { %v1474_v4 = vadd.f32 %v1473_v21, %v1459_v59  ;;  %v5398_v1 = vadd.f32 %v1377_v7, %v5338_v2  ;;  %v1438_v28 = vadd.f32 %v1437_v8, %v5382_v38 }
 0x1a9   :  { %v1462_v5 = vmul.f32 %v5393_v62, %v5393_v62 }
 0x1aa   :  { %v1439_v60 = vadd.f32 %v1438_v28, %v5398_v1  ;;  %v1461_v49 = vmul.f32 %v5398_v1, %v5398_v1  ;;  %v1475_v9 = vadd.f32 %v1474_v4, %v1460_v53  ;;  %v4204_v12 = vpop.f32.mrb[70].mxu0 }
 0x1ab   :  { %v5405_v15 = vadd.f32 %v4204_v12, %v5347_v52  ;;  %v1387_v47 = vpop.f32.mrb[71].mxu0 }
 0x1ac   :  { %v1476_v10 = vadd.f32 %v1475_v9, %v1461_v49  ;;  %v5410_v2 = vadd.f32 %v1387_v47, %v5344_v27  ;;  %v1440_v54 = vadd.f32 %v1439_v60, %v5393_v62 }
 0x1ad   :  { %v1464_v31 = vmul.f32 %v5405_v15, %v5405_v15 }
 0x1ae   :  { %v1441_v36 = vadd.f32 %v1440_v54, %v5410_v2  ;;  %v1463_v6 = vmul.f32 %v5410_v2, %v5410_v2  ;;  %v1477_v16 = vadd.f32 %v1476_v10, %v1462_v5  ;;  %v4207_v29 = vpop.f32.mrb[72].mxu0 }
 0x1af   :  { %v5417_v52 = vadd.f32 %v4207_v29, %v5353_v0  ;;  %v1397_v24 = vpop.f32.mrb[73].mxu0 }
 0x1b0   :  { %v1478_v56 = vadd.f32 %v1477_v16, %v1463_v6  ;;  %v5422_v27 = vadd.f32 %v1397_v24, %v5350_v63  ;;  %v1442_v22 = vadd.f32 %v1441_v36, %v5405_v15 }
 0x1b1   :  { %v1466_v8 = vmul.f32 %v5417_v52, %v5417_v52 }
 0x1b2   :  { %v1443_v44 = vadd.f32 %v1442_v22, %v5422_v27  ;;  %v1465_v55 = vmul.f32 %v5422_v27, %v5422_v27  ;;  %v1479_v41 = vadd.f32 %v1478_v56, %v1464_v31  ;;  %v4210_v20 = vpop.f32.mrb[74].mxu0 }
 0x1b3   :  { %v5429_v0 = vadd.f32 %v4210_v20, %v5359_v46  ;;  %v1407_v21 = vpop.f32.mrb[75].mxu0 }
 0x1b4   :  { %v1480_v59 = vadd.f32 %v1479_v41, %v1465_v55  ;;  %v5434_v63 = vadd.f32 %v1407_v21, %v5356_v25  ;;  %v1444_v61 = vadd.f32 %v1443_v44, %v5417_v52 }
 0x1b5   :  { %v1468_v49 = vmul.f32 %v5429_v0, %v5429_v0 }
 0x1b6   :  { %v1445_v7 = vadd.f32 %v1444_v61, %v5434_v63  ;;  %v1467_v53 = vmul.f32 %v5434_v63, %v5434_v63  ;;  %v1481_v4 = vadd.f32 %v1480_v59, %v1466_v8  ;;  %v4213_v28 = vpop.f32.mrb[76].mxu0 }
 0x1b7   :  { %v5441_v46 = vadd.f32 %v4213_v28, %v5365_v13  ;;  %v1417_v60 = vpop.f32.mrb[77].mxu0 }
 0x1b8   :  { %v1482_v9 = vadd.f32 %v1481_v4, %v1467_v53  ;;  %v5446_v25 = vadd.f32 %v1417_v60, %v5362_v58  ;;  %v1446_v12 = vadd.f32 %v1445_v7, %v5429_v0 }
 0x1b9   :  { %v1470_v6 = vmul.f32 %v5441_v46, %v5441_v46 }
 0x1ba   :  { %v1447_v47 = vadd.f32 %v1446_v12, %v5446_v25  ;;  %v1469_v5 = vmul.f32 %v5446_v25, %v5446_v25  ;;  %v1483_v10 = vadd.f32 %v1482_v9, %v1468_v49  ;;  %v4216_v54 = vpop.f32.mrb[78].mxu0  ;;  %v1619_v9 = vld [vmem:[%s6064_s8] sm:$0xff]  ;;  %v1620_v12 = vld [vmem:[%s6064_s8 + $0x8] sm:$0xff] }
 0x1bb   :  { %v5452_v36 = vadd.f32 %v4216_v54, %v1288_v37  ;;  %v1427_v13 = vpop.f32.mrb[79].mxu0  ;;  %v2199_v54 = vld [vmem:[#allocation7] sm:$0xff] }
 0x1bc   :  { %v1484_v16 = vadd.f32 %v1483_v10, %v1469_v5  ;;  %v5457_v29 = vadd.f32 %v1427_v13, %v5368_v18  ;;  %v1448_v58 = vadd.f32 %v1447_v47, %v5441_v46  ;;  %v4542_v47 = vpack.c.bf16 %v1620_v12, %v1619_v9  ;;  %v2215_v5 = vld [vmem:[#allocation7 + $0x80] sm:$0xff]  ;;  %v2216_v10 = vld [vmem:[#allocation7 + $0x88] sm:$0xff] }
 0x1bd   :  { %v1472_v37 = vmul.f32 %v5452_v36, %v5452_v36  ;;  %v4544_v13 = vpack.c.bf16 %v2216_v10, %v2215_v5  ;;  %v2208_v5 = vld [vmem:[#allocation7 + $0x48] sm:$0xff] }
 0x1be   :  { %v1449_v24 = vadd.f32 %v1448_v58, %v5457_v29  ;;  %v1471_v31 = vmul.f32 %v5457_v29, %v5457_v29  ;;  %v1485_v56 = vadd.f32 %v1484_v16, %v1470_v6  ;;  %v2200_v6 = vld [vmem:[#allocation7 + $0x8] sm:$0xff]  ;;  %v2217_v16 = vld [vmem:[#allocation7 + $0x90] sm:$0xff]  ;;  %v2218_v58 = vld [vmem:[#allocation7 + $0x98] sm:$0xff] }
 0x1bf   :  { %4545 = vmatprep.subr.bf16.mxu0 %v4544_v13 }
 0x1c0   :  { %v1450_v22 = vadd.f32 %v1449_v24, %v5452_v36  ;;  %v1486_v44 = vadd.f32 %v1485_v56, %v1471_v31  ;;  %v4546_v24 = vpack.c.bf16 %v2200_v6, %v2199_v54  ;;  %v4548_v31 = vpack.c.bf16 %v2218_v58, %v2217_v16  ;;  %v2248_v56 = vld [vmem:[#allocation7 + $0x188] sm:$0xff] }
 0x1c2   :  { %v1451_v55 = vrot.slane %v1450_v22, 4  ;;  %v1487_v41 = vadd.f32 %v1486_v44, %v1472_v37  ;;  %v2201_v37 = vld [vmem:[#allocation7 + $0x10] sm:$0xff]  ;;  %v2202_v44 = vld [vmem:[#allocation7 + $0x18] sm:$0xff]  ;;  %4547 = vmatpush3.bf16.msra.mxu0 %v4546_v24 }
 0x1c3   :  { %4549 = vmatprep.subr.bf16.mxu0 %v4548_v31 }
 0x1c4   :  { %v1452_v20 = vadd.f32 %v1451_v55, %v1450_v22  ;;  %v1488_v21 = vrot.slane %v1487_v41, 4  ;;  %v4550_v55 = vpack.c.bf16 %v2202_v44, %v2201_v37  ;;  %v1595_v37 = vlaneseq }
 0x1c6   :  { %v1453_v18 = vrot.slane %v1452_v20, 2  ;;  %v1489_v8 = vadd.f32 %v1488_v21, %v1487_v41  ;;  %v2219_v41 = vld [vmem:[#allocation7 + $0xa0] sm:$0xff]  ;;  %4551 = vmatpush3.bf16.msra.mxu0 %v4550_v55  ;;  %v5475_v44 = vshrl.u32 %v1595_v37, 7  ;;  %v2254_v37 = vld [vmem:[#allocation7 + $0x1b8] sm:$0xff] }
 0x1c8   :  { %v1454_v59 = vadd.f32 %v1453_v18, %v1452_v20  ;;  %v1490_v61 = vrot.slane %v1489_v8, 2  ;;  %v2220_v20 = vld [vmem:[#allocation7 + $0xa8] sm:$0xff]  ;;  %v2203_v18 = vld [vmem:[#allocation7 + $0x20] sm:$0xff] }
 0x1c9   :  { %v4552_v21 = vpack.c.bf16 %v2220_v20, %v2219_v41 }
 0x1ca   :  { %v1455_v7 = vrot.slane %v1454_v59, 1  ;;  %v1491_v53 = vadd.f32 %v1490_v61, %v1489_v8  ;;  %v2204_v8 = vld [vmem:[#allocation7 + $0x28] sm:$0xff]  ;;  %v2222_v61 = vld [vmem:[#allocation7 + $0xb8] sm:$0xff] }
 0x1cb   :  { %4553 = vmatprep.subr.bf16.mxu0 %v4552_v21 }
 0x1cc   :  { %v1492_v4 = vrot.slane %v1491_v53, 1  ;;  %v1456_v28 = vadd.f32 %v1455_v7, %v1454_v59  ;;  %v2221_v59 = vld [vmem:[#allocation7 + $0xb0] sm:$0xff]  ;;  %v4554_v7 = vpack.c.bf16 %v2204_v8, %v2203_v18  ;;  %v1588_v18 = vld [vmem:[%s6058_s2] sm:$0x1] }
 0x1ce   :  { %v1493_v60 = vadd.f32 %v1492_v4, %v1491_v53  ;;  %v4556_v53 = vpack.c.bf16 %v2222_v61, %v2221_v59  ;;  %v2205_v4 = vld [vmem:[#allocation7 + $0x30] sm:$0xff]  ;;  %4555 = vmatpush3.bf16.msra.mxu0 %v4554_v7  ;;  %v1609_v61 = vld [vmem:[%s6059_s3] sm:$0x1] }
 0x1d0   :  { %v1495_v49 = vsel %vm1494_vm1, %v1456_v28, %v1493_v60  ;;  %v2206_v28 = vld [vmem:[#allocation7 + $0x38] sm:$0xff]  ;;  %v2223_v60 = vld [vmem:[#allocation7 + $0xc0] sm:$0xff]  ;;  %4557 = vmatprep.subr.bf16.mxu0 %v4556_v53  ;;  %v5489_v53 = vsub.s32 0, %v5475_v44 }
 0x1d1   :  { %4250 = vmatmul.mubr.f32.vlgmr.msra.gmra.mrb[64].mxu1 %v1495_v49  ;;  %v2224_v49 = vld [vmem:[#allocation7 + $0xc8] sm:$0xff]  ;;  %v4558_v9 = vpack.c.bf16 %v2206_v28, %v2205_v4  ;;  %v2231_v4 = vld [vmem:[#allocation7 + $0x100] sm:$0xff] }
 0x1d2   :  { %4256 = vmatprep.mubr.msk.f32.mxu1 %vm4825_vm0, %v5219_v50  ;;  %4543 = vmatpush3.bf16.msra.mxu1 %v4542_v47  ;;  %v2247_v50 = vld [vmem:[#allocation7 + $0x180] sm:$0xff]  ;;  %v4560_v12 = vpack.c.bf16 %v2224_v49, %v2223_v60  ;;  %v2232_v28 = vld [vmem:[#allocation7 + $0x108] sm:$0xff]  ;;  %v2249_v49 = vld [vmem:[#allocation7 + $0x190] sm:$0xff] }
 0x1d3   :  { %v4576_v22 = vpack.c.bf16 %v2248_v56, %v2247_v50  ;;  %v2207_v47 = vld [vmem:[#allocation7 + $0x40] sm:$0xff]  ;;  %4559 = vmatpush3.bf16.msra.mxu0 %v4558_v9  ;;  %v4826_v50 = vmov 1966171168   ;;  %v2250_v9 = vld [vmem:[#allocation7 + $0x198] sm:$0xff] }
 0x1d4   :  { %v4562_v10 = vpack.c.bf16 %v2208_v5, %v2207_v47  ;;  %4561 = vmatprep.subr.bf16.mxu0 %v4560_v12  ;;  %v1593_v56 = vunpack.c.l.s4 %v4826_v50  ;;  %v4578_v47 = vpack.c.bf16 %v2232_v28, %v2231_v4  ;;  %v4580_v5 = vpack.c.bf16 %v2250_v9, %v2249_v49  ;;  %v2236_v50 = vld [vmem:[#allocation7 + $0x128] sm:$0xff]  ;;  %v2210_v4 = vld [vmem:[#allocation7 + $0x58] sm:$0xff] }
 0x1d5   :  { %4577 = vmatprep.subr.bf16.mxu1 %v4576_v22  ;;  %v2228_v49 = vld [vmem:[#allocation7 + $0xe8] sm:$0xff] }
 0x1d6   :  { %v1594_v22 = vunpack.c.0.s8 %v1593_v56  ;;  %v2253_v56 = vld [vmem:[#allocation7 + $0x1b0] sm:$0xff] }
 0x1d7   :  { %4563 = vmatpush3.bf16.msra.mxu0 %v4562_v10  ;;  %v2233_v10 = vld [vmem:[#allocation7 + $0x110] sm:$0xff] }
 0x1d8   :  { %v5478_v55 = vsub.s32 %v1594_v22, %v5475_v44 }
 0x2a4   :  { %v1578_v54 = vpop.f32.mrb[64].mxu1 }
 0x2a5   :  { %v1582_v13 = vmul.f32 0.0009765625, %v1578_v54  ;;  %v4251_v6 = vpop.f32.mrb[65].mxu1  ;;  %v2234_v54 = vld [vmem:[#allocation7 + $0x118] sm:$0xff] }
 0x2a7   :  { %v1583_v16 = vmul.f32 %v1582_v13, %v1582_v13 }
 0x2a9   :  { %v1585_v58 = vrot.slane %v1583_v16, 7  ;;  %v2251_v16 = vld [vmem:[#allocation7 + $0x1a0] sm:$0xff] }
 0x2ab   :  { %v1587_v24 = vsub.f32 %v1582_v13, %v1585_v58  ;;  %v2252_v58 = vld [vmem:[#allocation7 + $0x1a8] sm:$0xff] }
 0x2ad   :  { %v1589_v31 = vadd.f32 1e-05, %v1587_v24  ;;  %v4584_v24 = vpack.c.bf16 %v2252_v58, %v2251_v16  ;;  %v2239_v16 = vld [vmem:[#allocation7 + $0x140] sm:$0xff]  ;;  %v2240_v58 = vld [vmem:[#allocation7 + $0x148] sm:$0xff] }
 0x2af   :  { %4740 = vrsqrt.f32 %v1589_v31  ;;  %v2235_v31 = vld [vmem:[#allocation7 + $0x120] sm:$0xff] }
 0x2b0   :  { %v4586_v22 = vpack.c.bf16 %v2236_v50, %v2235_v31  ;;  %v2258_v31 = vld [vmem:[#allocation7 + $0x1d8] sm:$0xff]  ;;  %v2241_v50 = vld [vmem:[#allocation7 + $0x150] sm:$0xff] }
 0x2b9   :  { %v4741_v41 = vpop.eup %4740 }
 0x2ba   :  { %v1598_v20 = vrot.slane %v4741_v41, %v5478_v55  ;;  %v4588_v41 = vpack.c.bf16 %v2254_v37, %v2253_v56  ;;  %v2242_v56 = vld [vmem:[#allocation7 + $0x158] sm:$0xff] }
 0x2bc   :  { %v1599_v21 = vcombine.high %v1598_v20, %v1598_v20  ;;  %v2237_v20 = vld [vmem:[#allocation7 + $0x130] sm:$0xff] }
 0x2be   :  { %v1606_v8 = vrot.slane %v1599_v21, %v5478_v55  ;;  %v2238_v21 = vld [vmem:[#allocation7 + $0x138] sm:$0xff] }
 0x2c0   :  { %v1608_v59 = vmul.f32 %v1606_v8, %v1588_v18  ;;  %v4590_v18 = vpack.c.bf16 %v2238_v21, %v2237_v20  ;;  %v2225_v8 = vld [vmem:[#allocation7 + $0xd0] sm:$0xff]  ;;  %v2259_v20 = vld [vmem:[#allocation7 + $0x1e0] sm:$0xff]  ;;  %v4598_v21 = vpack.c.bf16 %v2242_v56, %v2241_v50 }
 0x2c1   :  { %v5494_v50 = vld [vmem:[#allocation2] sm:$0xff] }
 0x2c2   :  { %v1610_v7 = vmul.f32 %v1608_v59, %v1582_v13  ;;  %v4582_v13 = vpack.c.bf16 %v2234_v54, %v2233_v10  ;;  %v2256_v10 = vld [vmem:[#allocation7 + $0x1c8] sm:$0xff] }
 0x2c4   :  { %v1611_v60 = vsub.f32 %v1609_v61, %v1610_v7  ;;  %v2209_v7 = vld [vmem:[#allocation7 + $0x50] sm:$0xff] }
 0x2c5   :  { %v4566_v28 = vpack.c.bf16 %v2210_v4, %v2209_v7 }
 0x2c6   :  { %v1616_v12 = vrot.slane %v1611_v60, %v5489_v53  ;;  %v2227_v60 = vld [vmem:[#allocation7 + $0xe0] sm:$0xff] }
 0x2c7   :  { %v4568_v9 = vpack.c.bf16 %v2228_v49, %v2227_v60  ;;  %v2244_v60 = vld [vmem:[#allocation7 + $0x168] sm:$0xff] }
 0x2c8   :  { %v1618_v6 = vsel %vm1494_vm1, %v1608_v59, %v1616_v12  ;;  %v2226_v59 = vld [vmem:[#allocation7 + $0xd8] sm:$0xff]  ;;  %v2211_v12 = vld [vmem:[#allocation7 + $0x60] sm:$0xff] }
 0x2c9   :  { %4257 = vmatmul.mubr.msk.f32.vlgmr.msra.gmra.mrb[66].mxu1 %vm1621_vm2, %v1618_v6  ;;  %v4564_v61 = vpack.c.bf16 %v2226_v59, %v2225_v8  ;;  %v2260_v8 = vld [vmem:[#allocation7 + $0x1e8] sm:$0xff]  ;;  %v2213_v59 = vld [vmem:[#allocation7 + $0x70] sm:$0xff] }
 0x2ca   :  { %4579 = vmatpush3.bf16.msra.mxu1 %v4578_v47  ;;  %v2212_v47 = vld [vmem:[#allocation7 + $0x68] sm:$0xff]  ;;  %v4600_v7 = vpack.c.bf16 %v2260_v8, %v2259_v20  ;;  %v2265_v20 = vld [vmem:[#allocation7 + $0x210] sm:$0xff]  ;;  %v2283_v8 = vld [vmem:[#allocation7 + $0x2a0] sm:$0xff] }
 0x2cb   :  { %4581 = vmatprep.subr.bf16.mxu1 %v4580_v5  ;;  %4565 = vmatprep.subr.bf16.mxu0 %v4564_v61  ;;  %v2255_v5 = vld [vmem:[#allocation7 + $0x1c0] sm:$0xff]  ;;  %v4570_v54 = vpack.c.bf16 %v2212_v47, %v2211_v12  ;;  %v2214_v61 = vld [vmem:[#allocation7 + $0x78] sm:$0xff] }
 0x2cc   :  { %4567 = vmatpush3.bf16.msra.mxu0 %v4566_v28  ;;  %v4592_v6 = vpack.c.bf16 %v2256_v10, %v2255_v5  ;;  %v4574_v4 = vpack.c.bf16 %v2214_v61, %v2213_v59  ;;  %v2243_v28 = vld [vmem:[#allocation7 + $0x160] sm:$0xff]  ;;  %v2262_v12 = vld [vmem:[#allocation7 + $0x1f8] sm:$0xff]  ;;  %v2280_v5 = vld [vmem:[#allocation7 + $0x288] sm:$0xff] }
 0x2cd   :  { %4569 = vmatprep.subr.bf16.mxu0 %v4568_v9  ;;  %v1799_v49 = vld [vmem:[#allocation2 + $0x1] sm:$0xff]  ;;  %v2261_v9 = vld [vmem:[#allocation7 + $0x1f0] sm:$0xff]  ;;  %v4602_v10 = vpack.c.bf16 %v2244_v60, %v2243_v28 }
 0x2ce   :  { %4583 = vmatpush3.bf16.msra.mxu1 %v4582_v13  ;;  %v2257_v13 = vld [vmem:[#allocation7 + $0x1d0] sm:$0xff]  ;;  %2407 = vmatprep.mubr.f32.mxu0 %v1799_v49  ;;  %v2279_v47 = vld [vmem:[#allocation7 + $0x280] sm:$0xff]  ;;  %v2284_v59 = vld [vmem:[#allocation7 + $0x2a8] sm:$0xff] }
 0x2cf   :  { %4585 = vmatprep.subr.bf16.mxu1 %v4584_v24  ;;  %v4594_v24 = vpack.c.bf16 %v2240_v58, %v2239_v16  ;;  %v4596_v37 = vpack.c.bf16 %v2258_v31, %v2257_v13  ;;  %v2264_v16 = vld [vmem:[#allocation7 + $0x208] sm:$0xff]  ;;  %v4604_v58 = vpack.c.bf16 %v2262_v12, %v2261_v9  ;;  %v2245_v13 = vld [vmem:[#allocation7 + $0x170] sm:$0xff]  ;;  %v4616_v61 = vpack.c.bf16 %v2284_v59, %v2283_v8  ;;  %v2286_v49 = vld [vmem:[#allocation7 + $0x2b8] sm:$0xff] }
 0x2d0   :  { %4571 = vmatpush3.bf16.msra.mxu0 %v4570_v54  ;;  %v4608_v54 = vpack.c.bf16 %v2280_v5, %v2279_v47  ;;  %v2285_v60 = vld [vmem:[#allocation7 + $0x2b0] sm:$0xff]  ;;  %v2270_v47 = vld [vmem:[#allocation7 + $0x238] sm:$0xff]  ;;  %v2291_v8 = vld [vmem:[#allocation7 + $0x2e0] sm:$0xff] }
 0x2d1   :  { %v4620_v9 = vpack.c.bf16 %v2286_v49, %v2285_v60  ;;  %v2269_v12 = vld [vmem:[#allocation7 + $0x230] sm:$0xff]  ;;  %v2292_v59 = vld [vmem:[#allocation7 + $0x2e8] sm:$0xff]  ;;  %v2294_v49 = vld [vmem:[#allocation7 + $0x2f8] sm:$0xff] }
 0x2d2   :  { %4587 = vmatpush3.bf16.msra.mxu1 %v4586_v22  ;;  %v2229_v22 = vld [vmem:[#allocation7 + $0xf0] sm:$0xff]  ;;  %v4622_v5 = vpack.c.bf16 %v2270_v47, %v2269_v12  ;;  %v2278_v47 = vld [vmem:[#allocation7 + $0x278] sm:$0xff] }
 0x2d3   :  { %4589 = vmatprep.subr.bf16.mxu1 %v4588_v41  ;;  %v2230_v41 = vld [vmem:[#allocation7 + $0xf8] sm:$0xff]  ;;  %v2293_v60 = vld [vmem:[#allocation7 + $0x2f0] sm:$0xff] }
 0x2d4   :  { %v2277_v12 = vld [vmem:[#allocation7 + $0x270] sm:$0xff] }
 0x2d6   :  { %4591 = vmatpush3.bf16.msra.mxu1 %v4590_v18  ;;  %v4572_v18 = vpack.c.bf16 %v2230_v41, %v2229_v22  ;;  %v2282_v22 = vld [vmem:[#allocation7 + $0x298] sm:$0xff] }
 0x2d7   :  { %4593 = vmatprep.subr.bf16.mxu1 %v4592_v6  ;;  %v2263_v6 = vld [vmem:[#allocation7 + $0x200] sm:$0xff] }
 0x2d8   :  { %4573 = vmatprep.subr.bf16.mxu0 %v4572_v18  ;;  %v4610_v31 = vpack.c.bf16 %v2264_v16, %v2263_v6  ;;  %v2287_v16 = vld [vmem:[#allocation7 + $0x2c0] sm:$0xff] }
 0x2d9   :  { %4575 = vmatpush3.bf16.msra.mxu0 %v4574_v4  ;;  %v2268_v4 = vld [vmem:[#allocation7 + $0x228] sm:$0xff] }
 0x2da   :  { %4595 = vmatpush3.bf16.msra.mxu1 %v4594_v24  ;;  %v2246_v24 = vld [vmem:[#allocation7 + $0x178] sm:$0xff]  ;;  %4609 = vmatprep.subr.bf16.mxu0 %v4608_v54  ;;  %v2312_v54 = vld [vmem:[#allocation7 + $0x388] sm:$0xff] }
 0x2db   :  { %4597 = vmatprep.subr.bf16.mxu1 %v4596_v37  ;;  %v4606_v56 = vpack.c.bf16 %v2246_v24, %v2245_v13  ;;  %v2281_v37 = vld [vmem:[#allocation7 + $0x290] sm:$0xff]  ;;  %v2271_v24 = vld [vmem:[#allocation7 + $0x240] sm:$0xff] }
 0x2dc   :  { %2408 = vmatmul.mubr.f32.vlgmr.msra.gmra.mrb[80].mxu0 %v5494_v50  ;;  %v4612_v41 = vpack.c.bf16 %v2282_v22, %v2281_v37  ;;  %v2289_v37 = vld [vmem:[#allocation7 + $0x2d0] sm:$0xff]  ;;  %v2290_v22 = vld [vmem:[#allocation7 + $0x2d8] sm:$0xff] }
 0x2dd   :  { %4611 = vmatpush3.bf16.msra.mxu0 %v4610_v31  ;;  %v2272_v31 = vld [vmem:[#allocation7 + $0x248] sm:$0xff] }
 0x2de   :  { %4599 = vmatpush3.bf16.msra.mxu1 %v4598_v21  ;;  %v2266_v21 = vld [vmem:[#allocation7 + $0x218] sm:$0xff]  ;;  %4613 = vmatprep.subr.bf16.mxu0 %v4612_v41  ;;  %v4628_v41 = vpack.c.bf16 %v2290_v22, %v2289_v37 }
 0x2df   :  { %4601 = vmatprep.subr.bf16.mxu1 %v4600_v7  ;;  %v4614_v18 = vpack.c.bf16 %v2266_v21, %v2265_v20  ;;  %v2267_v7 = vld [vmem:[#allocation7 + $0x220] sm:$0xff]  ;;  %v2273_v20 = vld [vmem:[#allocation7 + $0x250] sm:$0xff]  ;;  %v2274_v21 = vld [vmem:[#allocation7 + $0x258] sm:$0xff] }
 0x2e0   :  { %v4618_v28 = vpack.c.bf16 %v2268_v4, %v2267_v7  ;;  %v2275_v7 = vld [vmem:[#allocation7 + $0x260] sm:$0xff]  ;;  %v2276_v4 = vld [vmem:[#allocation7 + $0x268] sm:$0xff] }
 0x2e1   :  { %4615 = vmatpush3.bf16.msra.mxu0 %v4614_v18  ;;  %v4630_v18 = vpack.c.bf16 %v2274_v21, %v2273_v20 }
 0x2e2   :  { %4603 = vmatpush3.bf16.msra.mxu1 %v4602_v10  ;;  %4617 = vmatprep.subr.bf16.mxu0 %v4616_v61  ;;  %v2311_v10 = vld [vmem:[#allocation7 + $0x380] sm:$0xff]  ;;  %v4632_v61 = vpack.c.bf16 %v2292_v59, %v2291_v8 }
 0x2e3   :  { %4605 = vmatprep.subr.bf16.mxu1 %v4604_v58  ;;  %v4640_v6 = vpack.c.bf16 %v2312_v54, %v2311_v10  ;;  %v2288_v58 = vld [vmem:[#allocation7 + $0x2c8] sm:$0xff]  ;;  %v2327_v10 = vld [vmem:[#allocation7 + $0x400] sm:$0xff] }
 0x2e4   :  { %v4624_v13 = vpack.c.bf16 %v2288_v58, %v2287_v16  ;;  %v2328_v54 = vld [vmem:[#allocation7 + $0x408] sm:$0xff]  ;;  %v6066_v16 = vsub.s32 1, %v5475_v44 }
 0x2e5   :  { %4619 = vmatpush3.bf16.msra.mxu0 %v4618_v28  ;;  %v4634_v28 = vpack.c.bf16 %v2276_v4, %v2275_v7 }
 0x2e6   :  { %4607 = vmatpush3.bf16.msra.mxu1 %v4606_v56  ;;  %4621 = vmatprep.subr.bf16.mxu0 %v4620_v9  ;;  %v4626_v56 = vpack.c.bf16 %v2272_v31, %v2271_v24  ;;  %v4636_v9 = vpack.c.bf16 %v2294_v49, %v2293_v60 }
 0x2e7   :  { %4641 = vmatprep.subr.bf16.mxu1 %v4640_v6  ;;  %v5497_v6 = vpack.c.bf16 %v2328_v54, %v2327_v10 }
 0x2e9   :  { %4623 = vmatpush3.bf16.msra.mxu0 %v4622_v5  ;;  %v4638_v5 = vpack.c.bf16 %v2278_v47, %v2277_v12 }
 0x2ea   :  { %4625 = vmatprep.subr.bf16.mxu0 %v4624_v13 }
 0x2ed   :  { %4627 = vmatpush3.bf16.msra.mxu0 %v4626_v56 }
 0x2ee   :  { %4629 = vmatprep.subr.bf16.mxu0 %v4628_v41 }
 0x2f1   :  { %4631 = vmatpush3.bf16.msra.mxu0 %v4630_v18 }
 0x2f2   :  { %4633 = vmatprep.subr.bf16.mxu0 %v4632_v61 }
 0x2f5   :  { %4635 = vmatpush3.bf16.msra.mxu0 %v4634_v28 }
 0x2f6   :  { %4637 = vmatprep.subr.bf16.mxu0 %v4636_v9 }
 0x2f9   :  { %4639 = vmatpush3.bf16.msra.mxu0 %v4638_v5 }
 0x2fa   :  { %4673 = vmatprep.subr.bf16.mxu0 %v5497_v6 }
 0x39c   :  { %v1691_v58 = vpop.f32.mrb[66].mxu1 }
 0x39d   :  { %v1698_v13 = vrot.slane %v1691_v58, %v5489_v53  ;;  %v4258_v24 = vpop.f32.mrb[67].mxu1  ;;  %v1718_v31 = vrot.slane %v1691_v58, %v6066_v16 }
 0x39f   :  { %v1699_v56 = vmul.f32 %v1698_v13, %v5375_v34  ;;  %v1700_v37 = vmul.f32 %v1698_v13, %v5372_v32  ;;  %v1701_v22 = vmul.f32 %v1698_v13, %v5387_v51  ;;  %v1702_v41 = vmul.f32 %v1698_v13, %v5382_v38 }
 0x3a0   :  { %v1703_v20 = vmul.f32 %v1698_v13, %v5398_v1  ;;  %v1704_v21 = vmul.f32 %v1698_v13, %v5393_v62  ;;  %v1705_v18 = vmul.f32 %v1698_v13, %v5410_v2  ;;  %v1706_v8 = vmul.f32 %v1698_v13, %v5405_v15 }
 0x3a1   :  { %v1719_v59 = vadd.f32 %v1718_v31, %v1699_v56  ;;  %v1720_v61 = vadd.f32 %v1718_v31, %v1700_v37  ;;  %v1721_v7 = vadd.f32 %v1718_v31, %v1701_v22  ;;  %v1722_v4 = vadd.f32 %v1718_v31, %v1702_v41  ;;  %v2295_v37 = vld [vmem:[#allocation7 + $0x300] sm:$0xff]  ;;  %v2296_v22 = vld [vmem:[#allocation7 + $0x308] sm:$0xff] }
 0x3a2   :  { %v1723_v28 = vadd.f32 %v1718_v31, %v1703_v20  ;;  %v1724_v34 = vadd.f32 %v1718_v31, %v1704_v21  ;;  %v1725_v60 = vadd.f32 %v1718_v31, %v1705_v18  ;;  %v1726_v32 = vadd.f32 %v1718_v31, %v1706_v8 }
 0x3a3   :  { %v5512_v49 = vmax.f32 %v1719_v59, 0.0  ;;  %v5514_v51 = vmax.f32 %v1720_v61, 0.0  ;;  %v5516_v38 = vmax.f32 %v1721_v7, 0.0  ;;  %v5518_v1 = vmax.f32 %v1722_v4, 0.0 }
 0x3a4   :  { %v5520_v62 = vmax.f32 %v1723_v28, 0.0  ;;  %v5522_v2 = vmax.f32 %v1724_v34, 0.0  ;;  %v5524_v15 = vmax.f32 %v1725_v60, 0.0  ;;  %v5526_v9 = vmax.f32 %v1726_v32, 0.0  ;;  %v1831_v28 = vld [vmem:[#allocation2 + $0x2] sm:$0xff]  ;;  %v2297_v32 = vld [vmem:[#allocation7 + $0x310] sm:$0xff] }
 0x3a5   :  { %1751 = vst [vmem:[#allocation2 + $0x11] sm:$0xff] %v5512_v49  ;;  %2412 = vmatprep.mubr.f32.mxu0 %v5512_v49  ;;  %1752 = vst [vmem:[#allocation2 + $0x21] sm:$0xff] %v5514_v51  ;;  %v1707_v12 = vmul.f32 %v1698_v13, %v5422_v27  ;;  %v1708_v47 = vmul.f32 %v1698_v13, %v5417_v52  ;;  %v1709_v5 = vmul.f32 %v1698_v13, %v5434_v63 }
 0x3a6   :  { %1753 = vst [vmem:[#allocation2 + $0x31] sm:$0xff] %v5516_v38  ;;  %1754 = vst [vmem:[#allocation2 + $0x41] sm:$0xff] %v5518_v1  ;;  %v1710_v10 = vmul.f32 %v1698_v13, %v5429_v0  ;;  %v1711_v54 = vmul.f32 %v1698_v13, %v5446_v25  ;;  %v1712_v58 = vmul.f32 %v1698_v13, %v5441_v46  ;;  %v2313_v25 = vld [vmem:[#allocation7 + $0x390] sm:$0xff]  ;;  %v2314_v46 = vld [vmem:[#allocation7 + $0x398] sm:$0xff] }
 0x3a7   :  { %1755 = vst [vmem:[#allocation2 + $0x51] sm:$0xff] %v5520_v62  ;;  %1756 = vst [vmem:[#allocation2 + $0x61] sm:$0xff] %v5522_v2  ;;  %v1713_v27 = vmul.f32 %v1698_v13, %v5457_v29  ;;  %v1714_v52 = vmul.f32 %v1698_v13, %v5452_v36  ;;  %v1727_v24 = vadd.f32 %v1718_v31, %v1707_v12  ;;  %v2298_v12 = vld [vmem:[#allocation7 + $0x318] sm:$0xff] }
 0x3a8   :  { %1757 = vst [vmem:[#allocation2 + $0x71] sm:$0xff] %v5524_v15  ;;  %1758 = vst [vmem:[#allocation2 + $0x81] sm:$0xff] %v5526_v9  ;;  %v1728_v63 = vadd.f32 %v1718_v31, %v1708_v47  ;;  %v1729_v56 = vadd.f32 %v1718_v31, %v1709_v5  ;;  %v1730_v0 = vadd.f32 %v1718_v31, %v1710_v10  ;;  %v2315_v47 = vld [vmem:[#allocation7 + $0x3a0] sm:$0xff]  ;;  %v2316_v5 = vld [vmem:[#allocation7 + $0x3a8] sm:$0xff] }
 0x3a9   :  { %v1731_v41 = vadd.f32 %v1718_v31, %v1711_v54  ;;  %v1732_v20 = vadd.f32 %v1718_v31, %v1712_v58  ;;  %v1733_v21 = vadd.f32 %v1718_v31, %v1713_v27  ;;  %v1734_v18 = vadd.f32 %v1718_v31, %v1714_v52  ;;  %v2299_v27 = vld [vmem:[#allocation7 + $0x320] sm:$0xff]  ;;  %v2300_v52 = vld [vmem:[#allocation7 + $0x328] sm:$0xff] }
 0x3aa   :  { %v5545_v8 = vmax.f32 %v1727_v24, 0.0  ;;  %v5547_v59 = vmax.f32 %v1728_v63, 0.0  ;;  %v5549_v61 = vmax.f32 %v1729_v56, 0.0  ;;  %v5551_v29 = vmax.f32 %v1730_v0, 0.0  ;;  %v2317_v63 = vld [vmem:[#allocation7 + $0x3b0] sm:$0xff]  ;;  %v2318_v56 = vld [vmem:[#allocation7 + $0x3b8] sm:$0xff] }
 0x3ab   :  { %v5553_v36 = vmax.f32 %v1731_v41, 0.0  ;;  %v5555_v13 = vmax.f32 %v1732_v20, 0.0  ;;  %v5557_v7 = vmax.f32 %v1733_v21, 0.0  ;;  %v5559_v4 = vmax.f32 %v1734_v18, 0.0  ;;  %v2301_v41 = vld [vmem:[#allocation7 + $0x330] sm:$0xff]  ;;  %v2302_v20 = vld [vmem:[#allocation7 + $0x338] sm:$0xff] }
 0x3ac   :  { %v4642_v31 = vpack.c.bf16 %v2296_v22, %v2295_v37  ;;  %1759 = vst [vmem:[#allocation2 + $0xb1] sm:$0xff] %v5545_v8  ;;  %1760 = vst [vmem:[#allocation2 + $0xc1] sm:$0xff] %v5547_v59  ;;  %v1863_v34 = vld [vmem:[#allocation2 + $0x10] sm:$0xff]  ;;  %v4644_v60 = vpack.c.bf16 %v2314_v46, %v2313_v25  ;;  %v5570_v10 = vld [vmem:[#allocation2 + $0x20] sm:$0xff]  ;;  %v4646_v54 = vpack.c.bf16 %v2298_v12, %v2297_v32 }
 0x3ad   :  { %1761 = vst [vmem:[#allocation2 + $0xd1] sm:$0xff] %v5549_v61  ;;  %1762 = vst [vmem:[#allocation2 + $0xe1] sm:$0xff] %v5551_v29  ;;  %2552 = vmatprep.mubr.f32.mxu1 %v1863_v34  ;;  %2413 = vmatmul.mubr.f32.gmra.mrb[82].mxu0 %v1863_v34  ;;  %v4648_v58 = vpack.c.bf16 %v2316_v5, %v2315_v47  ;;  %v5574_v24 = vld [vmem:[#allocation2 + $0x12] sm:$0xff]  ;;  %v4650_v37 = vpack.c.bf16 %v2300_v52, %v2299_v27  ;;  %v5582_v21 = vld [vmem:[#allocation2 + $0x22] sm:$0xff] }
 0x3ae   :  { %1763 = vst [vmem:[#allocation2 + $0xf1] sm:$0xff] %v5553_v36  ;;  %1764 = vst [vmem:[#allocation2 + $0x101] sm:$0xff] %v5555_v13  ;;  %2553 = vmatmul.mubr.f32.vlgmr.msra.gmra.mrb[68].mxu1 %v1831_v28  ;;  %2417 = vmatprep.mubr.f32.mxu0 %v5514_v51  ;;  %v5578_v0 = vld [vmem:[#allocation2 + $0x30] sm:$0xff]  ;;  %v4652_v22 = vpack.c.bf16 %v2318_v56, %v2317_v63  ;;  %v2319_v18 = vld [vmem:[#allocation7 + $0x3c0] sm:$0xff]  ;;  %v4654_v28 = vpack.c.bf16 %v2302_v20, %v2301_v41 }
 0x3af   :  { %1765 = vst [vmem:[#allocation2 + $0x111] sm:$0xff] %v5557_v7  ;;  %1766 = vst [vmem:[#allocation2 + $0x121] sm:$0xff] %v5559_v4  ;;  %2557 = vmatprep.mubr.f32.mxu1 %v5570_v10  ;;  %4643 = vmatpush3.bf16.msra.mxu1 %v4642_v31  ;;  %v2320_v25 = vld [vmem:[#allocation7 + $0x3c8] sm:$0xff]  ;;  %v5586_v46 = vld [vmem:[#allocation2 + $0x40] sm:$0xff] }
 0x3b0   :  { %4645 = vmatprep.subr.bf16.mxu1 %v4644_v60  ;;  %v4656_v31 = vpack.c.bf16 %v2320_v25, %v2319_v18  ;;  %v2303_v34 = vld [vmem:[#allocation7 + $0x340] sm:$0xff]  ;;  %v2304_v60 = vld [vmem:[#allocation7 + $0x348] sm:$0xff]  ;;  %v5590_v32 = vld [vmem:[#allocation2 + $0x32] sm:$0xff] }
 0x3b1   :  { %2418 = vmatmul.mubr.f32.gmra.mrb[84].mxu0 %v5570_v10  ;;  %v2321_v12 = vld [vmem:[#allocation7 + $0x3d0] sm:$0xff]  ;;  %v2322_v47 = vld [vmem:[#allocation7 + $0x3d8] sm:$0xff]  ;;  %v5598_v63 = vld [vmem:[#allocation2 + $0x42] sm:$0xff] }
 0x3b2   :  { %2558 = vmatmul.mubr.f32.gmra.mrb[70].mxu1 %v5574_v24  ;;  %2422 = vmatprep.mubr.f32.mxu0 %v5516_v38  ;;  %v5594_v5 = vld [vmem:[#allocation2 + $0x50] sm:$0xff]  ;;  %v2306_v52 = vld [vmem:[#allocation7 + $0x358] sm:$0xff]  ;;  %v2323_v56 = vld [vmem:[#allocation7 + $0x3e0] sm:$0xff] }
 0x3b3   :  { %2562 = vmatprep.mubr.f32.mxu1 %v5578_v0  ;;  %4647 = vmatpush3.bf16.msra.mxu1 %v4646_v54  ;;  %v4658_v54 = vpack.c.bf16 %v2304_v60, %v2303_v34  ;;  %v2305_v27 = vld [vmem:[#allocation7 + $0x350] sm:$0xff]  ;;  %v2307_v18 = vld [vmem:[#allocation7 + $0x360] sm:$0xff]  ;;  %v2308_v25 = vld [vmem:[#allocation7 + $0x368] sm:$0xff] }
 0x3b4   :  { %4649 = vmatprep.subr.bf16.mxu1 %v4648_v58  ;;  %v4660_v58 = vpack.c.bf16 %v2322_v47, %v2321_v12  ;;  %v4662_v41 = vpack.c.bf16 %v2306_v52, %v2305_v27  ;;  %v2326_v34 = vld [vmem:[#allocation7 + $0x3f8] sm:$0xff]  ;;  %v5610_v60 = vld [vmem:[#allocation2 + $0x70] sm:$0xff]  ;;  %v1807_v12 = vld [vmem:[#allocation2 + $0xa1] sm:$0xff]  ;;  %v4666_v47 = vpack.c.bf16 %v2308_v25, %v2307_v18 }
 0x3b5   :  { %2423 = vmatmul.mubr.f32.gmra.mrb[86].mxu0 %v5578_v0  ;;  %v2310_v27 = vld [vmem:[#allocation7 + $0x378] sm:$0xff]  ;;  %v5614_v52 = vld [vmem:[#allocation2 + $0x62] sm:$0xff] }
 0x3b6   :  { %2563 = vmatmul.mubr.f32.gmra.mrb[72].mxu1 %v5582_v21  ;;  %2427 = vmatprep.mubr.f32.mxu0 %v5518_v1  ;;  %v1839_v18 = vld [vmem:[#allocation2 + $0xa2] sm:$0xff]  ;;  %v5678_v45 = vld [vmem:[#allocation2 + $0x112] sm:$0xff] }
 0x3b7   :  { %2567 = vmatprep.mubr.f32.mxu1 %v5586_v46  ;;  %4651 = vmatpush3.bf16.msra.mxu1 %v4650_v37  ;;  %v2324_v37 = vld [vmem:[#allocation7 + $0x3e8] sm:$0xff]  ;;  %v5627_v25 = vld [vmem:[#allocation2 + $0xc0] sm:$0xff] }
 0x3b8   :  { %4653 = vmatprep.subr.bf16.mxu1 %v4652_v22  ;;  %v5602_v22 = vld [vmem:[#allocation2 + $0x60] sm:$0xff]  ;;  %v4664_v20 = vpack.c.bf16 %v2324_v37, %v2323_v56 }
 0x3b9   :  { %2428 = vmatmul.mubr.f32.gmra.mrb[88].mxu0 %v5586_v46  ;;  %v5617_v56 = vld [vmem:[#allocation2 + $0x80] sm:$0xff] }
 0x3ba   :  { %2568 = vmatmul.mubr.f32.gmra.mrb[74].mxu1 %v5590_v32  ;;  %2432 = vmatprep.mubr.f32.mxu0 %v5520_v62  ;;  %v5671_v16 = vld [vmem:[#allocation2 + $0x102] sm:$0xff] }
 0x3bb   :  { %2572 = vmatprep.mubr.f32.mxu1 %v5594_v5  ;;  %4655 = vmatpush3.bf16.msra.mxu1 %v4654_v28  ;;  %v5606_v28 = vld [vmem:[#allocation2 + $0x52] sm:$0xff]  ;;  %v5674_v17 = vld [vmem:[#allocation2 + $0x120] sm:$0xff] }
 0x3bc   :  { %4657 = vmatprep.subr.bf16.mxu1 %v4656_v31  ;;  %v2325_v31 = vld [vmem:[#allocation7 + $0x3f0] sm:$0xff] }
 0x3bd   :  { %2433 = vmatmul.mubr.f32.gmra.mrb[90].mxu0 %v5594_v5 }
 0x3be   :  { %2573 = vmatmul.mubr.f32.gmra.mrb[76].mxu1 %v5598_v63  ;;  %2437 = vmatprep.mubr.f32.mxu0 %v5522_v2 }
 0x3bf   :  { %2577 = vmatprep.mubr.f32.mxu1 %v5602_v22  ;;  %4659 = vmatpush3.bf16.msra.mxu1 %v4658_v54  ;;  %v4668_v54 = vpack.c.bf16 %v2326_v34, %v2325_v31  ;;  %v5631_v31 = vld [vmem:[#allocation2 + $0xb2] sm:$0xff] }
 0x3c0   :  { %4661 = vmatprep.subr.bf16.mxu1 %v4660_v58  ;;  %v2309_v58 = vld [vmem:[#allocation7 + $0x370] sm:$0xff] }
 0x3c1   :  { %2438 = vmatmul.mubr.f32.gmra.mrb[92].mxu0 %v5602_v22  ;;  %v4670_v37 = vpack.c.bf16 %v2310_v27, %v2309_v58  ;;  %v5635_v34 = vld [vmem:[#allocation2 + $0xd0] sm:$0xff]  ;;  %v5655_v27 = vld [vmem:[#allocation2 + $0xe2] sm:$0xff] }
 0x3c2   :  { %2578 = vmatmul.mubr.f32.gmra.mrb[78].mxu1 %v5606_v28  ;;  %2442 = vmatprep.mubr.f32.mxu0 %v5524_v15  ;;  %v5651_v58 = vld [vmem:[#allocation2 + $0xf0] sm:$0xff] }
 0x3c3   :  { %2582 = vmatprep.mubr.f32.mxu1 %v5610_v60  ;;  %4663 = vmatpush3.bf16.msra.mxu1 %v4662_v41  ;;  %v5621_v41 = vld [vmem:[#allocation2 + $0x72] sm:$0xff] }
 0x3c4   :  { %4665 = vmatprep.subr.bf16.mxu1 %v4664_v20  ;;  %v1871_v20 = vld [vmem:[#allocation2 + $0xb0] sm:$0xff] }
 0x3c5   :  { %2443 = vmatmul.mubr.f32.gmra.mrb[94].mxu0 %v5610_v60 }
 0x3c6   :  { %2583 = vmatmul.mubr.f32.gmra.mrb[80].mxu1 %v5614_v52  ;;  %2447 = vmatprep.mubr.f32.mxu0 %v1807_v12  ;;  %v5639_v12 = vld [vmem:[#allocation2 + $0xc2] sm:$0xff] }
 0x3c7   :  { %2587 = vmatprep.mubr.f32.mxu1 %v5617_v56  ;;  %4667 = vmatpush3.bf16.msra.mxu1 %v4666_v47  ;;  %v5643_v47 = vld [vmem:[#allocation2 + $0xe0] sm:$0xff] }
 0x3c8   :  { %4669 = vmatprep.subr.bf16.mxu1 %v4668_v54  ;;  %v5647_v54 = vld [vmem:[#allocation2 + $0xd2] sm:$0xff] }
 0x3c9   :  { %2448 = vmatmul.mubr.f32.gmra.mrb[96].mxu0 %v5494_v50 }
 0x3ca   :  { %2588 = vmatmul.mubr.f32.gmra.mrb[82].mxu1 %v5621_v41  ;;  %2452 = vmatprep.mubr.f32.mxu0 %v5545_v8 }
 0x3cb   :  { %2592 = vmatprep.mubr.f32.mxu1 %v1871_v20  ;;  %4671 = vmatpush3.bf16.msra.mxu1 %v4670_v37  ;;  %v5659_v37 = vld [vmem:[#allocation2 + $0x100] sm:$0xff] }
 0x3cc   :  { %4704 = vmatprep.subr.bf16.mxu1 %v6067_v23  ;;  %v2329_v23 = vld [vmem:[#allocation7 + $0x410] sm:$0xff] }
 0x3cd   :  { %2453 = vmatmul.mubr.f32.gmra.mrb[98].mxu0 %v1871_v20  ;;  %v5663_v20 = vld [vmem:[#allocation2 + $0xf2] sm:$0xff]  ;;  %v4676_v3 = vpack.c.bf16 %v2330_v43, %v2329_v23 }
 0x3ce   :  { %2593 = vmatmul.mubr.f32.gmra.mrb[84].mxu1 %v1839_v18  ;;  %2457 = vmatprep.mubr.f32.mxu0 %v5547_v59  ;;  %v5667_v18 = vld [vmem:[#allocation2 + $0x110] sm:$0xff]  ;;  %v2334_v43 = vld [vmem:[#allocation7 + $0x438] sm:$0xff] }
 0x3cf   :  { %2597 = vmatprep.mubr.f32.mxu1 %v5627_v25 }
 0x3d1   :  { %2458 = vmatmul.mubr.f32.gmra.mrb[100].mxu0 %v5627_v25 }
 0x3d2   :  { %2598 = vmatmul.mubr.f32.gmra.mrb[86].mxu1 %v5631_v31  ;;  %2462 = vmatprep.mubr.f32.mxu0 %v5549_v61 }
 0x3d3   :  { %2602 = vmatprep.mubr.f32.mxu1 %v5635_v34 }
 0x3d5   :  { %2463 = vmatmul.mubr.f32.gmra.mrb[102].mxu0 %v5635_v34 }
 0x3d6   :  { %2603 = vmatmul.mubr.f32.gmra.mrb[88].mxu1 %v5639_v12  ;;  %2467 = vmatprep.mubr.f32.mxu0 %v5551_v29 }
 0x3d7   :  { %2607 = vmatprep.mubr.f32.mxu1 %v5643_v47 }
 0x3d9   :  { %2468 = vmatmul.mubr.f32.gmra.mrb[104].mxu0 %v5643_v47 }
 0x3da   :  { %2608 = vmatmul.mubr.f32.gmra.mrb[90].mxu1 %v5647_v54  ;;  %2472 = vmatprep.mubr.f32.mxu0 %v5553_v36 }
 0x3db   :  { %2612 = vmatprep.mubr.f32.mxu1 %v5651_v58 }
 0x3dd   :  { %2473 = vmatmul.mubr.f32.gmra.mrb[106].mxu0 %v5651_v58 }
 0x3de   :  { %2613 = vmatmul.mubr.f32.gmra.mrb[92].mxu1 %v5655_v27  ;;  %2477 = vmatprep.mubr.f32.mxu0 %v5555_v13 }
 0x3df   :  { %2617 = vmatprep.mubr.f32.mxu1 %v5659_v37 }
 0x3e1   :  { %2478 = vmatmul.mubr.f32.gmra.mrb[108].mxu0 %v5659_v37 }
 0x3e2   :  { %2618 = vmatmul.mubr.f32.gmra.mrb[94].mxu1 %v5663_v20  ;;  %2482 = vmatprep.mubr.f32.mxu0 %v5557_v7 }
 0x3e3   :  { %2622 = vmatprep.mubr.f32.mxu1 %v5667_v18 }
 0x3e5   :  { %2483 = vmatmul.mubr.f32.gmra.mrb[110].mxu0 %v5667_v18 }
 0x3e6   :  { %2623 = vmatmul.mubr.f32.gmra.mrb[96].mxu1 %v5671_v16  ;;  %2697 = vmatprep.mubr.f32.mxu0 %v5574_v24  ;;  %v2333_v24 = vld [vmem:[#allocation7 + $0x430] sm:$0xff] }
 0x3e7   :  { %2627 = vmatprep.mubr.f32.mxu1 %v5674_v17  ;;  %v4684_v23 = vpack.c.bf16 %v2334_v43, %v2333_v24  ;;  %v3133_v24 = vld [vmem:[%s6063_s7 + $0x30] sm:$0xff]  ;;  %v3134_v43 = vld [vmem:[%s6063_s7 + $0x38] sm:$0xff] }
 0x3e9   :  { %2698 = vmatmul.mubr.f32.vlgmr.msra.gmra.mrb[112].mxu0 %v5512_v49  ;;  %v2335_v49 = vld [vmem:[#allocation7 + $0x440] sm:$0xff] }
 0x3ea   :  { %2628 = vmatmul.mubr.f32.gmra.mrb[98].mxu1 %v5678_v45  ;;  %2702 = vmatprep.mubr.f32.mxu0 %v5582_v21  ;;  %v4688_v14 = vpack.c.bf16 %v2336_v57, %v2335_v49  ;;  %v4714_v49 = vpack.c.bf16 %v3134_v43, %v3133_v24 }
 0x3eb   :  { %2842 = vmatprep.mubr.f32.mxu1 %v5514_v51  ;;  %4675 = vmatpush3.bf16.msra.mxu0 %v5497_v6  ;;  %v2338_v6 = vld [vmem:[#allocation7 + $0x458] sm:$0xff] }
 0x3ec   :  { %4677 = vmatprep.subr.bf16.mxu0 %v4676_v3 }
 0x3ed   :  { %2703 = vmatmul.mubr.f32.gmra.mrb[114].mxu0 %v5514_v51  ;;  %v2339_v51 = vld [vmem:[#allocation7 + $0x460] sm:$0xff] }
 0x3ee   :  { %2843 = vmatmul.mubr.f32.vlgmr.msra.gmra.mrb[100].mxu1 %v5570_v10  ;;  %2707 = vmatprep.mubr.f32.mxu0 %v5590_v32 }
 0x3ef   :  { %2847 = vmatprep.mubr.f32.mxu1 %v5516_v38  ;;  %4679 = vmatpush3.bf16.msra.mxu0 %v4676_v3  ;;  %v4692_v3 = vpack.c.bf16 %v2338_v6, %v2337_v33 }
 0x3f0   :  { %4681 = vmatprep.subr.bf16.mxu0 %v4680_v11 }
 0x3f1   :  { %2708 = vmatmul.mubr.f32.gmra.mrb[116].mxu0 %v5516_v38  ;;  %v2340_v38 = vld [vmem:[#allocation7 + $0x468] sm:$0xff] }
 0x3f2   :  { %2848 = vmatmul.mubr.f32.gmra.mrb[102].mxu1 %v5578_v0  ;;  %2712 = vmatprep.mubr.f32.mxu0 %v5598_v63  ;;  %v4696_v10 = vpack.c.bf16 %v2340_v38, %v2339_v51  ;;  %v2341_v0 = vld [vmem:[#allocation7 + $0x470] sm:$0xff] }
 0x3f3   :  { %2852 = vmatprep.mubr.f32.mxu1 %v5518_v1  ;;  %4683 = vmatpush3.bf16.msra.mxu0 %v4680_v11  ;;  %v3821_v11 = vpop.f32.mrb[80].mxu0 }
 0x3f4   :  { %4685 = vmatprep.subr.bf16.mxu0 %v4684_v23  ;;  %v3822_v57 = vpop.f32.mrb[81].mxu0 }
 0x3f5   :  { %2713 = vmatmul.mubr.f32.gmra.mrb[118].mxu0 %v5518_v1  ;;  %v5701_v1 = vadd.f32 %v3822_v57, %v3821_v11 }
 0x3f6   :  { %2853 = vmatmul.mubr.f32.gmra.mrb[104].mxu1 %v5586_v46  ;;  %2717 = vmatprep.mubr.f32.mxu0 %v5606_v28  ;;  %v2342_v46 = vld [vmem:[#allocation7 + $0x478] sm:$0xff] }
 0x3f7   :  { %2857 = vmatprep.mubr.f32.mxu1 %v5520_v62  ;;  %4687 = vmatpush3.bf16.msra.mxu0 %v4684_v23 }
 0x3f8   :  { %4689 = vmatprep.subr.bf16.mxu0 %v4688_v14 }
 0x3f9   :  { %2718 = vmatmul.mubr.f32.gmra.mrb[120].mxu0 %v5520_v62  ;;  %v4700_v62 = vpack.c.bf16 %v2342_v46, %v2341_v0 }
 0x3fa   :  { %2858 = vmatmul.mubr.f32.gmra.mrb[106].mxu1 %v5594_v5  ;;  %2722 = vmatprep.mubr.f32.mxu0 %v5614_v52  ;;  %v1934_v5 = vld [vmem:[#allocation2 + $0x82] sm:$0xff] }
 0x3fb   :  { %2862 = vmatprep.mubr.f32.mxu1 %v5522_v2  ;;  %4691 = vmatpush3.bf16.msra.mxu0 %v4688_v14 }
 0x3fc   :  { %4693 = vmatprep.subr.bf16.mxu0 %v4692_v3 }
 0x3fd   :  { %2723 = vmatmul.mubr.f32.gmra.mrb[122].mxu0 %v5522_v2  ;;  %v1998_v2 = vld [vmem:[#allocation2 + $0x91] sm:$0xff] }
 0x3fe   :  { %2863 = vmatmul.mubr.f32.gmra.mrb[108].mxu1 %v5602_v22  ;;  %2727 = vmatprep.mubr.f32.mxu0 %v5621_v41  ;;  %v3131_v22 = vld [vmem:[%s6063_s7 + $0x20] sm:$0xff] }
 0x3ff   :  { %2867 = vmatprep.mubr.f32.mxu1 %v5524_v15  ;;  %4695 = vmatpush3.bf16.msra.mxu0 %v4692_v3 }
 0x400   :  { %4697 = vmatprep.subr.bf16.mxu0 %v4696_v10 }
 0x401   :  { %2728 = vmatmul.mubr.f32.gmra.mrb[124].mxu0 %v5524_v15  ;;  %v1942_v15 = vld [vmem:[#allocation2 + $0x122] sm:$0xff] }
 0x402   :  { %2868 = vmatmul.mubr.f32.gmra.mrb[110].mxu1 %v5610_v60  ;;  %2732 = vmatprep.mubr.f32.mxu0 %v1934_v5 }
 0x403   :  { %2872 = vmatprep.mubr.f32.mxu1 %v5526_v9  ;;  %4699 = vmatpush3.bf16.msra.mxu0 %v4696_v10 }
 0x404   :  { %4701 = vmatprep.subr.bf16.mxu0 %v4700_v62 }
 0x405   :  { %2733 = vmatmul.mubr.f32.gmra.mrb[126].mxu0 %v5526_v9  ;;  %v2006_v9 = vld [vmem:[#allocation2 + $0x131] sm:$0xff] }
 0x406   :  { %2873 = vmatmul.mubr.f32.gmra.mrb[112].mxu1 %v5617_v56  ;;  %2737 = vmatprep.mubr.f32.mxu0 %v5631_v31 }
 0x407   :  { %2877 = vmatprep.mubr.f32.mxu1 %v1998_v2  ;;  %4703 = vmatpush3.bf16.msra.mxu0 %v4700_v62  ;;  %v3136_v2 = vld [vmem:[%s6063_s7 + $0x48] sm:$0xff] }
 0x409   :  { %2738 = vmatmul.mubr.f32.gmra.mrb[128].mxu0 %v5545_v8  ;;  %v3127_v8 = vld [vmem:[%s6063_s7] sm:$0xff] }
 0x40a   :  { %2878 = vmatmul.mubr.f32.gmra.mrb[114].mxu1 %v5494_v50  ;;  %2742 = vmatprep.mubr.f32.mxu0 %v5639_v12 }
 0x40b   :  { %2882 = vmatprep.mubr.f32.mxu1 %v5547_v59 }
 0x40d   :  { %2743 = vmatmul.mubr.f32.gmra.mrb[130].mxu0 %v5547_v59  ;;  %v3128_v59 = vld [vmem:[%s6063_s7 + $0x8] sm:$0xff] }
 0x40e   :  { %2883 = vmatmul.mubr.f32.gmra.mrb[116].mxu1 %v5627_v25  ;;  %2747 = vmatprep.mubr.f32.mxu0 %v5647_v54 }
 0x40f   :  { %2887 = vmatprep.mubr.f32.mxu1 %v5549_v61 }
 0x411   :  { %2748 = vmatmul.mubr.f32.gmra.mrb[132].mxu0 %v5549_v61  ;;  %v4705_v61 = vpack.c.bf16 %v3128_v59, %v3127_v8 }
 0x412   :  { %2888 = vmatmul.mubr.f32.gmra.mrb[118].mxu1 %v5635_v34  ;;  %2752 = vmatprep.mubr.f32.mxu0 %v5655_v27 }
 0x413   :  { %2892 = vmatprep.mubr.f32.mxu1 %v5551_v29  ;;  %4706 = vmatpush3.bf16.msra.mxu1 %v4705_v61 }
 0x415   :  { %2753 = vmatmul.mubr.f32.gmra.mrb[134].mxu0 %v5551_v29  ;;  %v6085_v29 = vmov 0.0|0.0  }
 0x416   :  { %2893 = vmatmul.mubr.f32.gmra.mrb[120].mxu1 %v5643_v47  ;;  %2757 = vmatprep.mubr.f32.mxu0 %v5663_v20 }
 0x417   :  { %2897 = vmatprep.mubr.f32.mxu1 %v5553_v36  ;;  %4707 = vmatprep.subr.bf16.mxu1 %v6085_v29 }
 0x419   :  { %2758 = vmatmul.mubr.f32.gmra.mrb[136].mxu0 %v5553_v36 }
 0x41a   :  { %2898 = vmatmul.mubr.f32.gmra.mrb[122].mxu1 %v5651_v58  ;;  %2762 = vmatprep.mubr.f32.mxu0 %v5671_v16 }
 0x41b   :  { %2902 = vmatprep.mubr.f32.mxu1 %v5555_v13 }
 0x41d   :  { %2763 = vmatmul.mubr.f32.gmra.mrb[138].mxu0 %v5555_v13 }
 0x41e   :  { %2903 = vmatmul.mubr.f32.gmra.mrb[124].mxu1 %v5659_v37  ;;  %2767 = vmatprep.mubr.f32.mxu0 %v5678_v45 }
 0x41f   :  { %2907 = vmatprep.mubr.f32.mxu1 %v5557_v7 }
 0x421   :  { %2768 = vmatmul.mubr.f32.gmra.mrb[140].mxu0 %v5557_v7 }
 0x422   :  { %2908 = vmatmul.mubr.f32.gmra.mrb[126].mxu1 %v5667_v18  ;;  %2772 = vmatprep.mubr.f32.mxu0 %v1942_v15 }
 0x423   :  { %2912 = vmatprep.mubr.f32.mxu1 %v5559_v4 }
 0x425   :  { %2773 = vmatmul.mubr.f32.gmra.mrb[142].mxu0 %v5559_v4 }
 0x426   :  { %2913 = vmatmul.mubr.f32.gmra.mrb[128].mxu1 %v5674_v17  ;;  %4291 = vmatprep.mubr.f32.mxu0 %v5582_v21  ;;  %v2030_v17 = vld [vmem:[#allocation2 + $0x92] sm:$0xff] }
 0x427   :  { %2917 = vmatprep.mubr.f32.mxu1 %v2006_v9 }
 0x429   :  { %4292 = vmatmul.mubr.f32.vlgmr.msra.gmra.mrb[144].mxu0 %v5590_v32 }
 0x42a   :  { %2918 = vmatmul.mubr.f32.gmra.mrb[130].mxu1 %v5494_v50  ;;  %4294 = vmatprep.mubr.f32.mxu0 %v5598_v63 }
 0x42b   :  { %4347 = vmatprep.mubr.msk.f32.mxu1 %vm4825_vm0, %v5494_v50  ;;  %v2038_v50 = vld [vmem:[#allocation2 + $0x132] sm:$0xff] }
 0x42d   :  { %4295 = vmatmul.mubr.f32.gmra.mrb[146].mxu0 %v5606_v28  ;;  %v3132_v28 = vld [vmem:[%s6063_s7 + $0x28] sm:$0xff] }
 0x42e   :  { %4297 = vmatprep.mubr.f32.mxu0 %v5614_v52  ;;  %v4711_v52 = vpack.c.bf16 %v3132_v28, %v3131_v22  ;;  %v3138_v22 = vld [vmem:[%s6063_s7 + $0x58] sm:$0xff] }
 0x431   :  { %4298 = vmatmul.mubr.f32.gmra.mrb[148].mxu0 %v5621_v41 }
 0x432   :  { %4300 = vmatprep.mubr.f32.mxu0 %v1934_v5  ;;  %v3135_v5 = vld [vmem:[%s6063_s7 + $0x40] sm:$0xff] }
 0x433   :  { %v4717_v9 = vpack.c.bf16 %v3136_v2, %v3135_v5 }
 0x435   :  { %4301 = vmatmul.mubr.f32.gmra.mrb[150].mxu0 %v2030_v17 }
 0x436   :  { %4303 = vmatprep.mubr.f32.mxu0 %v5639_v12 }
 0x439   :  { %4304 = vmatmul.mubr.f32.gmra.mrb[152].mxu0 %v5647_v54 }
 0x43a   :  { %4306 = vmatprep.mubr.f32.mxu0 %v5655_v27 }
 0x43d   :  { %4307 = vmatmul.mubr.f32.gmra.mrb[154].mxu0 %v5663_v20 }
 0x43e   :  { %4309 = vmatprep.mubr.f32.mxu0 %v5671_v16  ;;  %v3129_v16 = vld [vmem:[%s6063_s7 + $0x10] sm:$0xff] }
 0x441   :  { %4310 = vmatmul.mubr.f32.gmra.mrb[156].mxu0 %v5678_v45  ;;  %v3130_v45 = vld [vmem:[%s6063_s7 + $0x18] sm:$0xff] }
 0x442   :  { %4312 = vmatprep.mubr.f32.mxu0 %v1942_v15  ;;  %v4708_v36 = vpack.c.bf16 %v3130_v45, %v3129_v16 }
 0x444   :  { %4709 = vmatpush3.bf16.msra.mxu1 %v4708_v36 }
 0x445   :  { %4313 = vmatmul.mubr.f32.gmra.mrb[158].mxu0 %v2038_v50  ;;  %4710 = vmatprep.subr.bf16.mxu1 %v6085_v29 }
 0x448   :  { %4712 = vmatpush3.bf16.msra.mxu1 %v4711_v52 }
 0x449   :  { %4713 = vmatprep.subr.bf16.mxu1 %v6085_v29 }
 0x44c   :  { %4715 = vmatpush3.bf16.msra.mxu1 %v4714_v49 }
 0x44d   :  { %4716 = vmatprep.subr.bf16.mxu1 %v6085_v29 }
 0x450   :  { %4718 = vmatpush3.bf16.msra.mxu1 %v4717_v9 }
 0x451   :  { %4719 = vmatprep.subr.bf16.mxu1 %v6085_v29 }
 0x480   :  { %v3824_v13 = vpop.f32.mrb[82].mxu0 }
 0x481   :  { %v3901_v7 = vpop.f32.mrb[68].mxu1  ;;  %v3825_v4 = vpop.f32.mrb[83].mxu0 }
 0x482   :  { %v3826_v21 = vadd.f32 %v3825_v4, %v3824_v13  ;;  %v3902_v32 = vpop.f32.mrb[69].mxu1 }
 0x483   :  { %v3903_v63 = vadd.f32 %v3902_v32, %v3901_v7 }
 0x484   :  { %v3827_v60 = vpop.f32.mrb[84].mxu0 }
 0x485   :  { %v5778_v56 = vadd.f32 %v3903_v63, %v5701_v1  ;;  %v3904_v41 = vpop.f32.mrb[70].mxu1  ;;  %v3828_v25 = vpop.f32.mrb[85].mxu0  ;;  %v3137_v63 = vld [vmem:[%s6063_s7 + $0x50] sm:$0xff] }
 0x486   :  { %v3829_v31 = vadd.f32 %v3828_v25, %v3827_v60  ;;  %v3905_v34 = vpop.f32.mrb[71].mxu1  ;;  %v4720_v60 = vpack.c.bf16 %v3138_v22, %v3137_v63 }
 0x487   :  { %v3906_v12 = vadd.f32 %v3905_v34, %v3904_v41 }
 0x488   :  { %v3830_v47 = vpop.f32.mrb[86].mxu0  ;;  %4721 = vmatpush3.bf16.msra.mxu1 %v4720_v60 }
 0x489   :  { %v5781_v54 = vadd.f32 %v3906_v12, %v3826_v21  ;;  %v3907_v58 = vpop.f32.mrb[72].mxu1  ;;  %v3831_v27 = vpop.f32.mrb[87].mxu0  ;;  %4722 = vmatprep.subr.bf16.mxu1 %v6085_v29 }
 0x48a   :  { %v3832_v37 = vadd.f32 %v3831_v27, %v3830_v47  ;;  %v3908_v20 = vpop.f32.mrb[73].mxu1 }
 0x48b   :  { %v3909_v18 = vadd.f32 %v3908_v20, %v3907_v58 }
 0x48c   :  { %v3833_v23 = vpop.f32.mrb[88].mxu0 }
 0x48d   :  { %v5789_v14 = vadd.f32 %v3909_v18, %v3829_v31  ;;  %v3910_v33 = vpop.f32.mrb[74].mxu1  ;;  %v3834_v6 = vpop.f32.mrb[89].mxu0 }
 0x48e   :  { %v3835_v3 = vadd.f32 %v3834_v6, %v3833_v23  ;;  %v3911_v51 = vpop.f32.mrb[75].mxu1 }
 0x48f   :  { %v3912_v38 = vadd.f32 %v3911_v51, %v3910_v33  ;;  %v3139_v51 = vld [vmem:[%s6063_s7 + $0x60] sm:$0xff] }
 0x490   :  { %v3836_v11 = vpop.f32.mrb[90].mxu0 }
 0x491   :  { %v5792_v57 = vadd.f32 %v3912_v38, %v3832_v37  ;;  %v3913_v1 = vpop.f32.mrb[76].mxu1  ;;  %v3837_v10 = vpop.f32.mrb[91].mxu0  ;;  %v3140_v38 = vld [vmem:[%s6063_s7 + $0x68] sm:$0xff] }
 0x492   :  { %v3838_v0 = vadd.f32 %v3837_v10, %v3836_v11  ;;  %v3914_v46 = vpop.f32.mrb[77].mxu1  ;;  %v3141_v11 = vld [vmem:[%s6063_s7 + $0x70] sm:$0xff]  ;;  %v4723_v10 = vpack.c.bf16 %v3140_v38, %v3139_v51 }
 0x493   :  { %v3915_v62 = vadd.f32 %v3914_v46, %v3913_v1 }
 0x494   :  { %v3839_v15 = vpop.f32.mrb[92].mxu0  ;;  %4724 = vmatpush3.bf16.msra.mxu1 %v4723_v10 }
 0x495   :  { %v5800_v17 = vadd.f32 %v3915_v62, %v3835_v3  ;;  %v3916_v50 = vpop.f32.mrb[78].mxu1  ;;  %v3840_v8 = vpop.f32.mrb[93].mxu0  ;;  %4725 = vmatprep.subr.bf16.mxu1 %v6085_v29 }
 0x496   :  { %v3841_v59 = vadd.f32 %v3840_v8, %v3839_v15  ;;  %v3917_v61 = vpop.f32.mrb[79].mxu1 }
 0x497   :  { %v3918_v16 = vadd.f32 %v3917_v61, %v3916_v50 }
 0x498   :  { %v3842_v45 = vpop.f32.mrb[94].mxu0 }
 0x499   :  { %v5803_v36 = vadd.f32 %v3918_v16, %v3838_v0  ;;  %v3919_v13 = vpop.f32.mrb[80].mxu1  ;;  %v3843_v7 = vpop.f32.mrb[95].mxu0  ;;  %v3142_v0 = vld [vmem:[%s6063_s7 + $0x78] sm:$0xff] }
 0x49a   :  { %v3844_v4 = vadd.f32 %v3843_v7, %v3842_v45  ;;  %v3920_v21 = vpop.f32.mrb[81].mxu1  ;;  %v4726_v15 = vpack.c.bf16 %v3142_v0, %v3141_v11 }
 0x49b   :  { %v3921_v32 = vadd.f32 %v3920_v21, %v3919_v13 }
 0x49c   :  { %v3845_v28 = vpop.f32.mrb[96].mxu0  ;;  %4727 = vmatpush3.bf16.msra.mxu1 %v4726_v15 }
 0x49d   :  { %v5811_v52 = vadd.f32 %v3921_v32, %v3841_v59  ;;  %v3922_v41 = vpop.f32.mrb[82].mxu1  ;;  %v3846_v25 = vpop.f32.mrb[97].mxu0  ;;  %4728 = vmatprep.subr.bf16.mxu1 %v6085_v29 }
 0x49e   :  { %v3847_v31 = vadd.f32 %v3846_v25, %v3845_v28  ;;  %v3923_v34 = vpop.f32.mrb[83].mxu1 }
 0x49f   :  { %v3924_v12 = vadd.f32 %v3923_v34, %v3922_v41 }
 0x4a0   :  { %v3848_v47 = vpop.f32.mrb[98].mxu0 }
 0x4a1   :  { %v5814_v58 = vadd.f32 %v3924_v12, %v3844_v4  ;;  %v3925_v27 = vpop.f32.mrb[84].mxu1  ;;  %v3849_v37 = vpop.f32.mrb[99].mxu0 }
 0x4a2   :  { %v3850_v20 = vadd.f32 %v3849_v37, %v3848_v47  ;;  %v3926_v18 = vpop.f32.mrb[85].mxu1 }
 0x4a3   :  { %v3927_v24 = vadd.f32 %v3926_v18, %v3925_v27 }
 0x4a4   :  { %v3851_v43 = vpop.f32.mrb[100].mxu0 }
 0x4a5   :  { %v5816_v23 = vadd.f32 %v3927_v24, %v3847_v31  ;;  %v3928_v49 = vpop.f32.mrb[86].mxu1  ;;  %v3852_v33 = vpop.f32.mrb[101].mxu0 }
 0x4a6   :  { %v3853_v6 = vadd.f32 %v3852_v33, %v3851_v43  ;;  %v3929_v3 = vpop.f32.mrb[87].mxu1 }
 0x4a7   :  { %v3930_v1 = vadd.f32 %v3929_v3, %v3928_v49 }
 0x4a8   :  { %v3854_v46 = vpop.f32.mrb[102].mxu0 }
 0x4a9   :  { %v5830_v62 = vadd.f32 %v3930_v1, %v3850_v20  ;;  %v3931_v5 = vpop.f32.mrb[88].mxu1  ;;  %v3855_v2 = vpop.f32.mrb[103].mxu0 }
 0x4aa   :  { %v3856_v9 = vadd.f32 %v3855_v2, %v3854_v46  ;;  %v3932_v50 = vpop.f32.mrb[89].mxu1 }
 0x4ab   :  { %v3933_v8 = vadd.f32 %v3932_v50, %v3931_v5 }
 0x4ac   :  { %v3857_v59 = vpop.f32.mrb[104].mxu0 }
 0x4ad   :  { %v5833_v61 = vadd.f32 %v3933_v8, %v3853_v6  ;;  %v3934_v16 = vpop.f32.mrb[90].mxu1  ;;  %v3858_v45 = vpop.f32.mrb[105].mxu0 }
 0x4ae   :  { %v3859_v13 = vadd.f32 %v3858_v45, %v3857_v59  ;;  %v3935_v7 = vpop.f32.mrb[91].mxu1 }
 0x4af   :  { %v3936_v4 = vadd.f32 %v3935_v7, %v3934_v16 }
 0x4b0   :  { %v3860_v21 = vpop.f32.mrb[106].mxu0 }
 0x4b1   :  { %v5836_v32 = vadd.f32 %v3936_v4, %v3856_v9  ;;  %v3937_v63 = vpop.f32.mrb[92].mxu1  ;;  %v3861_v22 = vpop.f32.mrb[107].mxu0 }
 0x4b2   :  { %v3862_v28 = vadd.f32 %v3861_v22, %v3860_v21  ;;  %v3938_v60 = vpop.f32.mrb[93].mxu1 }
 0x4b3   :  { %v3939_v41 = vadd.f32 %v3938_v60, %v3937_v63 }
 0x4b4   :  { %v3863_v25 = vpop.f32.mrb[108].mxu0 }
 0x4b5   :  { %v5838_v31 = vadd.f32 %v3939_v41, %v3859_v13  ;;  %v3940_v34 = vpop.f32.mrb[94].mxu1  ;;  %v3864_v12 = vpop.f32.mrb[109].mxu0 }
 0x4b6   :  { %v3865_v47 = vadd.f32 %v3864_v12, %v3863_v25  ;;  %v3941_v27 = vpop.f32.mrb[95].mxu1 }
 0x4b7   :  { %v3942_v37 = vadd.f32 %v3941_v27, %v3940_v34 }
 0x4b8   :  { %v3866_v20 = vpop.f32.mrb[110].mxu0 }
 0x4b9   :  { %v5840_v18 = vadd.f32 %v3942_v37, %v3862_v28  ;;  %v3943_v29 = vpop.f32.mrb[96].mxu1  ;;  %v3867_v24 = vpop.f32.mrb[111].mxu0 }
 0x4ba   :  { %v3868_v43 = vadd.f32 %v3867_v24, %v3866_v20  ;;  %v3944_v49 = vpop.f32.mrb[97].mxu1 }
 0x4bb   :  { %v3945_v33 = vadd.f32 %v3944_v49, %v3943_v29 }
 0x4bc   :  { %v3981_v6 = vpop.f32.mrb[112].mxu0 }
 0x4bd   :  { %v5842_v3 = vadd.f32 %v3945_v33, %v3865_v47  ;;  %v3946_v51 = vpop.f32.mrb[98].mxu1  ;;  %v3982_v38 = vpop.f32.mrb[113].mxu0 }
 0x4be   :  { %v3947_v11 = vpop.f32.mrb[99].mxu1  ;;  %v3983_v1 = vadd.f32 %v3982_v38, %v3981_v6 }
 0x4bf   :  { %v3948_v10 = vadd.f32 %v3947_v11, %v3946_v51 }
 0x4c0   :  { %v2700_v0 = vadd.f32 %v3983_v1, %v5778_v56  ;;  %v3984_v46 = vpop.f32.mrb[114].mxu0 }
 0x4c1   :  { %v5845_v5 = vadd.f32 %v3948_v10, %v3868_v43  ;;  %v4061_v2 = vpop.f32.mrb[100].mxu1  ;;  %v3985_v15 = vpop.f32.mrb[115].mxu0 }
 0x4c2   :  { %v3986_v9 = vadd.f32 %v3985_v15, %v3984_v46  ;;  %v4062_v50 = vpop.f32.mrb[101].mxu1 }
 0x4c3   :  { %v4063_v8 = vadd.f32 %v4062_v50, %v4061_v2 }
 0x4c4   :  { %v2705_v59 = vadd.f32 %v3986_v9, %v5781_v54  ;;  %v3987_v16 = vpop.f32.mrb[116].mxu0 }
 0x4c5   :  { %v4064_v45 = vpop.f32.mrb[102].mxu1  ;;  %v3988_v13 = vpop.f32.mrb[117].mxu0  ;;  %v5848_v7 = vadd.f32 %v4063_v8, %v2700_v0 }
 0x4c6   :  { %v3989_v4 = vadd.f32 %v3988_v13, %v3987_v16  ;;  %v4065_v21 = vpop.f32.mrb[103].mxu1 }
 0x4c7   :  { %v4066_v63 = vadd.f32 %v4065_v21, %v4064_v45 }
 0x4c8   :  { %v2710_v56 = vadd.f32 %v3989_v4, %v5789_v14  ;;  %v3990_v22 = vpop.f32.mrb[118].mxu0 }
 0x4c9   :  { %v4067_v28 = vpop.f32.mrb[104].mxu1  ;;  %v3991_v60 = vpop.f32.mrb[119].mxu0  ;;  %v5851_v41 = vadd.f32 %v4066_v63, %v2705_v59 }
 0x4ca   :  { %v3992_v25 = vadd.f32 %v3991_v60, %v3990_v22  ;;  %v4068_v34 = vpop.f32.mrb[105].mxu1 }
 0x4cb   :  { %v4069_v12 = vadd.f32 %v4068_v34, %v4067_v28 }
 0x4cc   :  { %v2715_v54 = vadd.f32 %v3992_v25, %v5792_v57  ;;  %v3993_v47 = vpop.f32.mrb[120].mxu0 }
 0x4cd   :  { %v4070_v27 = vpop.f32.mrb[106].mxu1  ;;  %v3994_v37 = vpop.f32.mrb[121].mxu0  ;;  %v5854_v20 = vadd.f32 %v4069_v12, %v2710_v56 }
 0x4ce   :  { %v3995_v29 = vadd.f32 %v3994_v37, %v3993_v47  ;;  %v4071_v24 = vpop.f32.mrb[107].mxu1 }
 0x4cf   :  { %v4072_v43 = vadd.f32 %v4071_v24, %v4070_v27 }
 0x4d0   :  { %v2720_v14 = vadd.f32 %v3995_v29, %v5800_v17  ;;  %v3996_v49 = vpop.f32.mrb[122].mxu0 }
 0x4d1   :  { %v4073_v33 = vpop.f32.mrb[108].mxu1  ;;  %v3997_v6 = vpop.f32.mrb[123].mxu0  ;;  %v5857_v51 = vadd.f32 %v4072_v43, %v2715_v54 }
 0x4d2   :  { %v3998_v38 = vadd.f32 %v3997_v6, %v3996_v49  ;;  %v4074_v11 = vpop.f32.mrb[109].mxu1 }
 0x4d3   :  { %v4075_v1 = vadd.f32 %v4074_v11, %v4073_v33 }
 0x4d4   :  { %v2725_v57 = vadd.f32 %v3998_v38, %v5803_v36  ;;  %v3999_v10 = vpop.f32.mrb[124].mxu0 }
 0x4d5   :  { %v4076_v0 = vpop.f32.mrb[110].mxu1  ;;  %v4000_v46 = vpop.f32.mrb[125].mxu0  ;;  %v5860_v2 = vadd.f32 %v4075_v1, %v2720_v14 }
 0x4d6   :  { %v4001_v15 = vadd.f32 %v4000_v46, %v3999_v10  ;;  %v4077_v9 = vpop.f32.mrb[111].mxu1 }
 0x4d7   :  { %v4078_v50 = vadd.f32 %v4077_v9, %v4076_v0 }
 0x4d8   :  { %v2730_v17 = vadd.f32 %v4001_v15, %v5811_v52  ;;  %v4002_v8 = vpop.f32.mrb[126].mxu0 }
 0x4d9   :  { %v4079_v59 = vpop.f32.mrb[112].mxu1  ;;  %v4003_v16 = vpop.f32.mrb[127].mxu0  ;;  %v5863_v45 = vadd.f32 %v4078_v50, %v2725_v57 }
 0x4da   :  { %v4004_v13 = vadd.f32 %v4003_v16, %v4002_v8  ;;  %v4080_v4 = vpop.f32.mrb[113].mxu1 }
 0x4db   :  { %v4081_v21 = vadd.f32 %v4080_v4, %v4079_v59 }
 0x4dc   :  { %v2735_v36 = vadd.f32 %v4004_v13, %v5814_v58  ;;  %v4005_v63 = vpop.f32.mrb[128].mxu0 }
 0x4dd   :  { %v4082_v56 = vpop.f32.mrb[114].mxu1  ;;  %v4006_v22 = vpop.f32.mrb[129].mxu0  ;;  %v5866_v28 = vadd.f32 %v4081_v21, %v2730_v17 }
 0x4de   :  { %v4007_v60 = vadd.f32 %v4006_v22, %v4005_v63  ;;  %v4083_v25 = vpop.f32.mrb[115].mxu1 }
 0x4df   :  { %v4084_v34 = vadd.f32 %v4083_v25, %v4082_v56 }
 0x4e0   :  { %v2740_v52 = vadd.f32 %v4007_v60, %v5816_v23  ;;  %v4008_v12 = vpop.f32.mrb[130].mxu0 }
 0x4e1   :  { %v4085_v54 = vpop.f32.mrb[116].mxu1  ;;  %v4009_v47 = vpop.f32.mrb[131].mxu0  ;;  %v5869_v27 = vadd.f32 %v4084_v34, %v2735_v36 }
 0x4e2   :  { %v4010_v37 = vadd.f32 %v4009_v47, %v4008_v12  ;;  %v4086_v29 = vpop.f32.mrb[117].mxu1 }
 0x4e3   :  { %v4087_v24 = vadd.f32 %v4086_v29, %v4085_v54 }
 0x4e4   :  { %v2745_v58 = vadd.f32 %v4010_v37, %v5830_v62  ;;  %v4011_v43 = vpop.f32.mrb[132].mxu0 }
 0x4e5   :  { %v4088_v14 = vpop.f32.mrb[118].mxu1  ;;  %v4012_v49 = vpop.f32.mrb[133].mxu0  ;;  %v5872_v33 = vadd.f32 %v4087_v24, %v2740_v52 }
 0x4e6   :  { %v4013_v6 = vadd.f32 %v4012_v49, %v4011_v43  ;;  %v4089_v38 = vpop.f32.mrb[119].mxu1 }
 0x4e7   :  { %v4090_v11 = vadd.f32 %v4089_v38, %v4088_v14 }
 0x4e8   :  { %v2750_v23 = vadd.f32 %v4013_v6, %v5833_v61  ;;  %v4014_v1 = vpop.f32.mrb[134].mxu0 }
 0x4e9   :  { %v4091_v57 = vpop.f32.mrb[120].mxu1  ;;  %v4015_v10 = vpop.f32.mrb[135].mxu0  ;;  %v5875_v0 = vadd.f32 %v4090_v11, %v2745_v58 }
 0x4ea   :  { %v4016_v46 = vadd.f32 %v4015_v10, %v4014_v1  ;;  %v4092_v15 = vpop.f32.mrb[121].mxu1 }
 0x4eb   :  { %v4093_v9 = vadd.f32 %v4092_v15, %v4091_v57 }
 0x4ec   :  { %v2755_v62 = vadd.f32 %v4016_v46, %v5836_v32  ;;  %v4017_v50 = vpop.f32.mrb[136].mxu0 }
 0x4ed   :  { %v4094_v17 = vpop.f32.mrb[122].mxu1  ;;  %v4018_v8 = vpop.f32.mrb[137].mxu0  ;;  %v5878_v59 = vadd.f32 %v4093_v9, %v2750_v23 }
 0x4ee   :  { %v4019_v16 = vadd.f32 %v4018_v8, %v4017_v50  ;;  %v4095_v13 = vpop.f32.mrb[123].mxu1 }
 0x4ef   :  { %v4096_v4 = vadd.f32 %v4095_v13, %v4094_v17 }
 0x4f0   :  { %v2760_v61 = vadd.f32 %v4019_v16, %v5838_v31  ;;  %v4020_v21 = vpop.f32.mrb[138].mxu0 }
 0x4f1   :  { %v4097_v36 = vpop.f32.mrb[124].mxu1  ;;  %v4021_v63 = vpop.f32.mrb[139].mxu0  ;;  %v5881_v56 = vadd.f32 %v4096_v4, %v2755_v62 }
 0x4f2   :  { %v4022_v22 = vadd.f32 %v4021_v63, %v4020_v21  ;;  %v4098_v60 = vpop.f32.mrb[125].mxu1 }
 0x4f3   :  { %v4099_v25 = vadd.f32 %v4098_v60, %v4097_v36 }
 0x4f4   :  { %v2765_v32 = vadd.f32 %v4022_v22, %v5840_v18  ;;  %v4023_v34 = vpop.f32.mrb[140].mxu0 }
 0x4f5   :  { %v4100_v52 = vpop.f32.mrb[126].mxu1  ;;  %v4024_v12 = vpop.f32.mrb[141].mxu0  ;;  %v5884_v54 = vadd.f32 %v4099_v25, %v2760_v61 }
 0x4f6   :  { %v4025_v47 = vadd.f32 %v4024_v12, %v4023_v34  ;;  %v4101_v37 = vpop.f32.mrb[127].mxu1 }
 0x4f7   :  { %v4102_v29 = vadd.f32 %v4101_v37, %v4100_v52 }
 0x4f8   :  { %v2770_v31 = vadd.f32 %v4025_v47, %v5842_v3  ;;  %v4026_v24 = vpop.f32.mrb[142].mxu0 }
 0x4f9   :  { %v4103_v58 = vpop.f32.mrb[128].mxu1  ;;  %v4027_v43 = vpop.f32.mrb[143].mxu0  ;;  %v5887_v14 = vadd.f32 %v4102_v29, %v2765_v32 }
 0x4fa   :  { %v4028_v49 = vadd.f32 %v4027_v43, %v4026_v24  ;;  %v4104_v6 = vpop.f32.mrb[129].mxu1 }
 0x4fb   :  { %v4105_v38 = vadd.f32 %v4104_v6, %v4103_v58 }
 0x4fc   :  { %v2775_v18 = vadd.f32 %v4028_v49, %v5845_v5  ;;  %v4293_v11 = vpop.f32.mrb[144].mxu0 }
 0x4fd   :  { %v4106_v23 = vpop.f32.mrb[130].mxu1  ;;  %v5891_v1 = vadd.f32 %v4293_v11, %v5851_v41  ;;  %v2989_v57 = vpop.f32.mrb[145].mxu0  ;;  %v5893_v10 = vadd.f32 %v4105_v38, %v2770_v31 }
 0x4fe   :  { %v4107_v46 = vpop.f32.mrb[131].mxu1  ;;  %v5896_v3 = vadd.f32 %v2989_v57, %v5848_v7 }
 0x4ff   :  { %v4108_v15 = vadd.f32 %v4107_v46, %v4106_v23  ;;  %v3090_v9 = vmul.f32 %v5891_v1, %v5891_v1 }
 0x500   :  { %v3089_v62 = vmul.f32 %v5896_v3, %v5896_v3  ;;  %v4296_v5 = vpop.f32.mrb[146].mxu0  ;;  %v3068_v8 = vadd.f32 %v5891_v1, %v5896_v3 }
 0x501   :  { %v5903_v50 = vadd.f32 %v4296_v5, %v5857_v51  ;;  %v2999_v41 = vpop.f32.mrb[147].mxu0  ;;  %v2920_v17 = vadd.f32 %v4108_v15, %v2775_v18 }
 0x502   :  { %v5908_v16 = vadd.f32 %v2999_v41, %v5854_v20  ;;  %v3105_v7 = vadd.f32 %v3090_v9, %v3089_v62 }
 0x503   :  { %v3092_v36 = vmul.f32 %v5903_v50, %v5903_v50 }
 0x504   :  { %v3069_v13 = vadd.f32 %v3068_v8, %v5908_v16  ;;  %v3091_v4 = vmul.f32 %v5908_v16, %v5908_v16  ;;  %v4299_v61 = vpop.f32.mrb[148].mxu0 }
 0x505   :  { %v5914_v21 = vadd.f32 %v4299_v61, %v5863_v45  ;;  %v3009_v51 = vpop.f32.mrb[149].mxu0 }
 0x506   :  { %v3106_v63 = vadd.f32 %v3105_v7, %v3091_v4  ;;  %v5919_v22 = vadd.f32 %v3009_v51, %v5860_v2  ;;  %v3070_v20 = vadd.f32 %v3069_v13, %v5903_v50 }
 0x507   :  { %v3094_v12 = vmul.f32 %v5914_v21, %v5914_v21 }
 0x508   :  { %v3071_v60 = vadd.f32 %v3070_v20, %v5919_v22  ;;  %v3093_v25 = vmul.f32 %v5919_v22, %v5919_v22  ;;  %v3107_v32 = vadd.f32 %v3106_v63, %v3092_v36  ;;  %v4302_v34 = vpop.f32.mrb[150].mxu0 }
 0x509   :  { %v5926_v45 = vadd.f32 %v4302_v34, %v5869_v27  ;;  %v3019_v52 = vpop.f32.mrb[151].mxu0 }
 0x50a   :  { %v3108_v47 = vadd.f32 %v3107_v32, %v3093_v25  ;;  %v5931_v2 = vadd.f32 %v3019_v52, %v5866_v28  ;;  %v3072_v37 = vadd.f32 %v3071_v60, %v5914_v21 }
 0x50b   :  { %v3096_v49 = vmul.f32 %v5926_v45, %v5926_v45 }
 0x50c   :  { %v3073_v29 = vadd.f32 %v3072_v37, %v5931_v2  ;;  %v3095_v31 = vmul.f32 %v5931_v2, %v5931_v2  ;;  %v3109_v24 = vadd.f32 %v3108_v47, %v3094_v12  ;;  %v4305_v58 = vpop.f32.mrb[152].mxu0 }
 0x50d   :  { %v5938_v27 = vadd.f32 %v4305_v58, %v5875_v0  ;;  %v3029_v43 = vpop.f32.mrb[153].mxu0 }
 0x50e   :  { %v3110_v6 = vadd.f32 %v3109_v24, %v3095_v31  ;;  %v5943_v28 = vadd.f32 %v3029_v43, %v5872_v33  ;;  %v3074_v38 = vadd.f32 %v3073_v29, %v5926_v45 }
 0x50f   :  { %v3098_v15 = vmul.f32 %v5938_v27, %v5938_v27 }
 0x510   :  { %v3075_v18 = vadd.f32 %v3074_v38, %v5943_v28  ;;  %v3097_v11 = vmul.f32 %v5943_v28, %v5943_v28  ;;  %v3111_v23 = vadd.f32 %v3110_v6, %v3096_v49  ;;  %v4308_v57 = vpop.f32.mrb[154].mxu0 }
 0x511   :  { %v5950_v0 = vadd.f32 %v4308_v57, %v5881_v56  ;;  %v3039_v46 = vpop.f32.mrb[155].mxu0 }
 0x512   :  { %v3112_v9 = vadd.f32 %v3111_v23, %v3097_v11  ;;  %v5955_v33 = vadd.f32 %v3039_v46, %v5878_v59  ;;  %v3076_v62 = vadd.f32 %v3075_v18, %v5938_v27 }
 0x513   :  { %v3100_v4 = vmul.f32 %v5950_v0, %v5950_v0 }
 0x514   :  { %v3077_v5 = vadd.f32 %v3076_v62, %v5955_v33  ;;  %v3099_v41 = vmul.f32 %v5955_v33, %v5955_v33  ;;  %v3113_v8 = vadd.f32 %v3112_v9, %v3098_v15  ;;  %v4311_v7 = vpop.f32.mrb[156].mxu0  ;;  %v4746_v62 = vld [vmem:[#allocation2] sm:$0xff] }
 0x515   :  { %v5962_v56 = vadd.f32 %v4311_v7, %v5887_v14  ;;  %v3049_v13 = vpop.f32.mrb[157].mxu0 }
 0x516   :  { %v3114_v61 = vadd.f32 %v3113_v8, %v3099_v41  ;;  %v5967_v59 = vadd.f32 %v3049_v13, %v5884_v54  ;;  %v3078_v51 = vadd.f32 %v3077_v5, %v5950_v0  ;;  %v3250_v5 = vld [vmem:[%s6064_s8] sm:$0xff]  ;;  %v3251_v41 = vld [vmem:[%s6064_s8 + $0x8] sm:$0xff] }
 0x517   :  { %v3102_v32 = vmul.f32 %v5962_v56, %v5962_v56  ;;  %v4729_v8 = vpack.c.bf16 %v3251_v41, %v3250_v5  ;;  %v6091_v5 = vld [vmem:[#allocation17_spill] sm:$0xff]  ;;  %v6092_v41 = vld [vmem:[#allocation18_spill] sm:$0xff] }
 0x518   :  { %v3079_v36 = vadd.f32 %v3078_v51, %v5967_v59  ;;  %v3101_v63 = vmul.f32 %v5967_v59, %v5967_v59  ;;  %v3115_v20 = vadd.f32 %v3114_v61, %v3100_v4  ;;  %v4314_v60 = vpop.f32.mrb[158].mxu0 }
 0x519   :  { %v5973_v25 = vadd.f32 %v4314_v60, %v2920_v17  ;;  %v3059_v14 = vpop.f32.mrb[159].mxu0 }
 0x51a   :  { %v3116_v34 = vadd.f32 %v3115_v20, %v3101_v63  ;;  %v5978_v52 = vadd.f32 %v3059_v14, %v5893_v10  ;;  %v3080_v54 = vadd.f32 %v3079_v36, %v5962_v56 }
 0x51b   :  { %v3104_v17 = vmul.f32 %v5973_v25, %v5973_v25 }
 0x51c   :  { %v3081_v12 = vadd.f32 %v3080_v54, %v5978_v52  ;;  %v3103_v47 = vmul.f32 %v5978_v52, %v5978_v52  ;;  %v3117_v37 = vadd.f32 %v3116_v34, %v3102_v32  ;;  %v3219_v32 = vld [vmem:[%s6061_s5] sm:$0x1]  ;;  %s4827_s5 = smov [#allocation9]  }
 0x51e   :  { %v3082_v29 = vadd.f32 %v3081_v12, %v5973_v25  ;;  %v3118_v31 = vadd.f32 %v3117_v37, %v3103_v47  ;;  %v3240_v12 = vld [vmem:[%s6062_s6] sm:$0x1]  ;;  %s3402_s6 = sshll.u32 %s4827_s5, 4  ;;  %s3403_s6 = int_to_ptr.vmem [resolvable:$true] %s3402_s6 }
 0x51f   :  { %s4791_s12 = scalar_lea.vmem %s3403_s6, 2048  ;;  %p4796_p3 = scmp.lt.s32.totalorder %s3403_s6, %s3403_s6 }
 0x520   :  { %v3083_v24 = vrot.slane %v3082_v29, 4  ;;  %v3119_v58 = vadd.f32 %v3118_v31, %v3104_v17  ;;  %p4792_p2 = scmp.ne.s32.totalorder %s3403_s6, %s4791_s12  ;;  %p4797_p4 = scmp.lt.s32.totalorder %s4791_s12, %s4791_s12 }
 0x522   :  { %v3084_v43 = vadd.f32 %v3083_v24, %v3082_v29  ;;  %v3120_v49 = vrot.slane %v3119_v58, 4  ;;  %p4798_p5 = por %p4797_p4, %p4796_p3 }
 0x524   :  { %v3085_v10 = vrot.slane %v3084_v43, 2  ;;  %v3121_v6 = vadd.f32 %v3120_v49, %v3119_v58  ;;  %p4799_p6 = pnand %p4798_p5, %p4792_p2 }
 0x526   :  { %v3086_v38 = vadd.f32 %v3085_v10, %v3084_v43  ;;  %v3122_v18 = vrot.slane %v3121_v6, 2  ;;  %v6086_v43 = vsub.s32 1, %v5475_v44 }
 0x528   :  { %v3087_v11 = vrot.slane %v3086_v38, 1  ;;  %v3123_v23 = vadd.f32 %v3122_v18, %v3121_v6 }
 0x52a   :  { %v3124_v57 = vrot.slane %v3123_v23, 1  ;;  %v3088_v46 = vadd.f32 %v3087_v11, %v3086_v38 }
 0x52c   :  { %v3125_v15 = vadd.f32 %v3124_v57, %v3123_v23 }
 0x52e   :  { %v3126_v9 = vsel %vm1494_vm1, %v3088_v46, %v3125_v15  ;;  %v6087_v46 = vld [vmem:[#allocation13_spill] sm:$0xff]  ;;  %v6088_v15 = vld [vmem:[#allocation14_spill] sm:$0xff] }
 0x52f   :  { %4348 = vmatmul.mubr.f32.vlgmr.msra.gmra.mrb[132].mxu1 %v3126_v9  ;;  %v6089_v9 = vld [vmem:[#allocation15_spill] sm:$0xff] }
 0x530   :  { %4354 = vmatprep.mubr.msk.f32.mxu1 %vm4825_vm0, %v4746_v62  ;;  %4730 = vmatpush3.bf16.msra.mxu1 %v4729_v8  ;;  %v6090_v62 = vld [vmem:[#allocation16_spill] sm:$0xff]  ;;  %v6093_v8 = vld [vmem:[#allocation19_spill] sm:$0xff] }
 0x602   :  { %v3209_v7 = vpop.f32.mrb[132].mxu1 }
 0x603   :  { %v3213_v13 = vmul.f32 0.0009765625, %v3209_v7  ;;  %v4349_v4 = vpop.f32.mrb[133].mxu1  ;;  %v6094_v7 = vld [vmem:[#allocation20_spill] sm:$0xff] }
 0x605   :  { %v3214_v61 = vmul.f32 %v3213_v13, %v3213_v13 }
 0x607   :  { %v3216_v51 = vrot.slane %v3214_v61, 7 }
 0x609   :  { %v3218_v36 = vsub.f32 %v3213_v13, %v3216_v51 }
 0x60b   :  { %v3220_v63 = vadd.f32 1e-05, %v3218_v36 }
 0x60d   :  { %4742 = vrsqrt.f32 %v3220_v63 }
 0x617   :  { %v4743_v20 = vpop.eup %4742 }
 0x618   :  { %v3229_v60 = vrot.slane %v4743_v20, %v5478_v55 }
 0x61a   :  { %v3230_v14 = vcombine.high %v3229_v60, %v3229_v60 }
 0x61c   :  { %v3237_v34 = vrot.slane %v3230_v14, %v5478_v55 }
 0x61e   :  { %v3239_v54 = vmul.f32 %v3237_v34, %v3219_v32 }
 0x620   :  { %v3241_v47 = vmul.f32 %v3239_v54, %v3213_v13 }
 0x622   :  { %v3242_v37 = vsub.f32 %v3240_v12, %v3241_v47 }
 0x624   :  { %v3247_v17 = vrot.slane %v3242_v37, %v5489_v53 }
 0x626   :  { %v3249_v29 = vsel %vm1494_vm1, %v3239_v54, %v3247_v17 }
 0x627   :  { %4355 = vmatmul.mubr.msk.f32.vlgmr.msra.gmra.mrb[134].mxu1 %vm1621_vm2, %v3249_v29 }
 0x6fa   :  { %v3321_v31 = vpop.f32.mrb[134].mxu1 }
 0x6fb   :  { %v3328_v24 = vrot.slane %v3321_v31, %v5489_v53  ;;  %v4356_v58 = vpop.f32.mrb[135].mxu1  ;;  %v3364_v55 = vrot.slane %v3321_v31, %v6086_v43 }
 0x6fd   :  { %v3329_v49 = vmul.f32 %v3328_v24, %v5896_v3  ;;  %v3330_v10 = vmul.f32 %v3328_v24, %v5891_v1  ;;  %v3331_v6 = vmul.f32 %v3328_v24, %v5908_v16  ;;  %v3332_v38 = vmul.f32 %v3328_v24, %v5903_v50 }
 0x6fe   :  { %v3333_v18 = vmul.f32 %v3328_v24, %v5919_v22  ;;  %v3334_v11 = vmul.f32 %v3328_v24, %v5914_v21  ;;  %v3335_v23 = vmul.f32 %v3328_v24, %v5931_v2  ;;  %v3336_v53 = vmul.f32 %v3328_v24, %v5926_v45 }
 0x6ff   :  { %v3337_v57 = vmul.f32 %v3328_v24, %v5943_v28  ;;  %v3338_v44 = vmul.f32 %v3328_v24, %v5938_v27  ;;  %v3339_v3 = vmul.f32 %v3328_v24, %v5955_v33  ;;  %v3340_v1 = vmul.f32 %v3328_v24, %v5950_v0 }
 0x700   :  { %v3341_v16 = vmul.f32 %v3328_v24, %v5967_v59  ;;  %v3342_v50 = vmul.f32 %v3328_v24, %v5962_v56  ;;  %v3343_v22 = vmul.f32 %v3328_v24, %v5978_v52  ;;  %v3344_v21 = vmul.f32 %v3328_v24, %v5973_v25 }
 0x701   :  { %v3345_v2 = vadd.f32 %v3329_v49, %v4951_v19  ;;  %v3346_v45 = vadd.f32 %v3330_v10, %v4957_v26  ;;  %v3347_v28 = vadd.f32 %v3331_v6, %v4963_v30  ;;  %v3348_v27 = vadd.f32 %v3332_v38, %v4969_v35 }
 0x702   :  { %v3349_v33 = vadd.f32 %v3333_v18, %v4975_v39  ;;  %v3350_v0 = vadd.f32 %v3334_v11, %v4981_v40  ;;  %v3351_v59 = vadd.f32 %v3335_v23, %v4987_v42  ;;  %v3352_v56 = vadd.f32 %v3336_v53, %v4993_v48 }
 0x703   :  { %v3353_v52 = vadd.f32 %v3337_v57, %v6087_v46  ;;  %v3354_v25 = vadd.f32 %v3338_v44, %v6088_v15  ;;  %v3355_v19 = vadd.f32 %v3339_v3, %v6089_v9  ;;  %v3356_v26 = vadd.f32 %v3340_v1, %v6090_v62 }
 0x704   :  { %v3357_v30 = vadd.f32 %v3341_v16, %v6091_v5  ;;  %v3358_v35 = vadd.f32 %v3342_v50, %v6092_v41  ;;  %v3359_v39 = vadd.f32 %v3343_v22, %v6093_v8  ;;  %v3360_v40 = vadd.f32 %v3344_v21, %v6094_v7 }
 0x705   :  { %v3365_v13 = vadd.f32 %v3364_v55, %v3345_v2  ;;  %v3366_v42 = vadd.f32 %v3364_v55, %v3346_v45  ;;  %v3367_v4 = vadd.f32 %v3364_v55, %v3347_v28  ;;  %v3368_v48 = vadd.f32 %v3364_v55, %v3348_v27 }
 0x706   :  { %v3369_v61 = vadd.f32 %v3364_v55, %v3349_v33  ;;  %v3370_v51 = vadd.f32 %v3364_v55, %v3350_v0  ;;  %v3371_v36 = vadd.f32 %v3364_v55, %v3351_v59  ;;  %v3372_v63 = vadd.f32 %v3364_v55, %v3352_v56 }
 0x707   :  { %v3373_v20 = vadd.f32 %v3364_v55, %v3353_v52  ;;  %v3374_v60 = vadd.f32 %v3364_v55, %v3354_v25  ;;  %v3375_v14 = vadd.f32 %v3364_v55, %v3355_v19  ;;  %v3376_v32 = vadd.f32 %v3364_v55, %v3356_v26  ;;  %3381 = vst [vmem:[#allocation9] sm:$0xff] %v3365_v13 }
 0x708   :  { %3382 = vst [vmem:[#allocation9 + $0x8] sm:$0xff] %v3366_v42  ;;  %3383 = vst [vmem:[#allocation9 + $0x10] sm:$0xff] %v3367_v4  ;;  %v3377_v34 = vadd.f32 %v3364_v55, %v3357_v30  ;;  %v3378_v54 = vadd.f32 %v3364_v55, %v3358_v35  ;;  %v3379_v12 = vadd.f32 %v3364_v55, %v3359_v39 }
 0x709   :  { %3384 = vst [vmem:[#allocation9 + $0x18] sm:$0xff] %v3368_v48  ;;  %v3380_v47 = vadd.f32 %v3364_v55, %v3360_v40  ;;  %3385 = vst [vmem:[#allocation9 + $0x20] sm:$0xff] %v3369_v61 }
 0x70a   :  { %3386 = vst [vmem:[#allocation9 + $0x28] sm:$0xff] %v3370_v51  ;;  %3387 = vst [vmem:[#allocation9 + $0x30] sm:$0xff] %v3371_v36 }
 0x70b   :  { %3388 = vst [vmem:[#allocation9 + $0x38] sm:$0xff] %v3372_v63  ;;  %3389 = vst [vmem:[#allocation9 + $0x40] sm:$0xff] %v3373_v20 }
 0x70c   :  { %3390 = vst [vmem:[#allocation9 + $0x48] sm:$0xff] %v3374_v60  ;;  %3391 = vst [vmem:[#allocation9 + $0x50] sm:$0xff] %v3375_v14 }
 0x70d   :  { %3392 = vst [vmem:[#allocation9 + $0x58] sm:$0xff] %v3376_v32  ;;  %3393 = vst [vmem:[#allocation9 + $0x60] sm:$0xff] %v3377_v34 }
 0x70e   :  { %3394 = vst [vmem:[#allocation9 + $0x68] sm:$0xff] %v3378_v54  ;;  %3395 = vst [vmem:[#allocation9 + $0x70] sm:$0xff] %v3379_v12 }
 0x70f   :  { %3396 = vst [vmem:[#allocation9 + $0x78] sm:$0xff] %v3380_v47 }
 0x710   :  { %4802 = shalt.err (!%p4799_p6)
}
 0x711   :  { %s4803_s4 = scalar_lea.hbm %s6065_s9, 2048 }
 0x712   :  { %p4804_p7 = scmp.ne.s32.totalorder %s6065_s9, %s4803_s4  ;;  %p4807_p8 = scmp.lt.u32.totalorder %s4803_s4, %s6065_s9 }
 0x714   :  { %p4809_p9 = pnand %p4807_p8, %p4804_p7 }
 0x716   :  { %4812 = shalt.err (!%p4809_p9)
}
 0x717   :  { %3408 = dma.vmem_to_hbm [thread:$0]  %s3403_s6, 2048, %s6065_s9, [#allocation6], %s4820_s19, %s4820_s19, %s4821_s20  }
 0x718   :  { %4817 = dma.done.wait [#allocation6], 2048  }
 0x719   :  { %4818 = vsyncadd [#allocation6], 4294965248 }
 0x71a   :  { %3412 = vsyncpa [#allocation5], 1 }
 0x71b   :  { %3413 = vsyncpa [#allocation8], 1 }
 0x71c   :  { %3414 = vsyncpa [#allocation6], 1 }

</bundles_post_ra>
